<compile_context>
chip_gen: v6e
topology: v6e:2x2x1
jax: 0.10.0
libtpu: 0.0.40
codegen_flags: <defaults>
</compile_context>

<pallas_src>
import functools

import jax
import jax.numpy as jnp
from jax.experimental import pallas as pl
from jax.experimental.pallas import tpu as pltpu


def _round_up(x, m):
    return ((x + m - 1) // m) * m


# --------------------------------------------------------------------------- Pallas kernels
def _conv_core(xp, w_ref, b_ref, y_ref, sum_ref, ssq_ref, *, H, W):
    """Shared conv3x3 core.

    xp      : (H+2, W+2, Cin) f32 VMEM scratch (zero-padded activation)
    w_ref   : (9*Cin, Cout)   bf16 pre-packed weights (tap-major, channel-minor)
    b_ref   : (1, Cout)       f32 bias
    y_ref   : (1, H, W, Cout) f32 pre-BN conv output
    sum_ref, ssq_ref : (1, Cout) f32 per-channel batch stats (accumulated over the grid)
    """
    x = xp[...]                                           # (H+2, W+2, Cin) f32
    cin = x.shape[-1]

    # in-VMEM im2col: 9 shifted views concatenated along the contraction (lane) dim
    cols = []
    for di in range(3):
        for dj in range(3):
            cols.append(x[di:di + H, dj:dj + W, :].reshape(H * W, cin))
    patches = jnp.concatenate(cols, axis=-1).astype(jnp.bfloat16)   # (H*W, 9*Cin)

    y = jnp.dot(patches, w_ref[...], preferred_element_type=jnp.float32)
    y = y + b_ref[...]                                    # (H*W, Cout) f32
    y_ref[...] = y.reshape(y_ref.shape)

    sum_ref[...] += jnp.sum(y, axis=0, keepdims=True)
    ssq_ref[...] += jnp.sum(y * y, axis=0, keepdims=True)


def _conv1_kernel(x_ref, w_ref, b_ref, y_ref, sum_ref, ssq_ref, xp, *, H, W):
    """conv3x3 + bias + fused batch stats; zero padding done in VMEM."""
    n = pl.program_id(0)

    @pl.when(n == 0)
    def _():
        xp[...] = jnp.zeros_like(xp)          # border zeroed once; stays zero afterwards
        sum_ref[...] = jnp.zeros_like(sum_ref)
        ssq_ref[...] = jnp.zeros_like(ssq_ref)

    xp[pl.ds(1, H), pl.ds(1, W), :] = x_ref[0].astype(xp.dtype)
    _conv_core(xp, w_ref, b_ref, y_ref, sum_ref, ssq_ref, H=H, W=W)


def _bnrelu_conv_kernel(y1_ref, s_ref, t_ref, w_ref, b_ref,
                        y_ref, sum_ref, ssq_ref, xp, *, H, W):
    """(BN1 affine + ReLU) fused with conv3x3 #2 + bias + batch stats."""
    n = pl.program_id(0)

    @pl.when(n == 0)
    def _():
        xp[...] = jnp.zeros_like(xp)
        sum_ref[...] = jnp.zeros_like(sum_ref)
        ssq_ref[...] = jnp.zeros_like(ssq_ref)

    c1 = y1_ref.shape[-1]
    y1 = y1_ref[...].reshape(H * W, c1)                   # (H*W, C1) f32
    a = jnp.maximum(y1 * s_ref[...] + t_ref[...], 0.0)    # BN1 affine + ReLU
    xp[pl.ds(1, H), pl.ds(1, W), :] = a.reshape(H, W, c1).astype(xp.dtype)
    _conv_core(xp, w_ref, b_ref, y_ref, sum_ref, ssq_ref, H=H, W=W)


def _bn_relu_kernel(y_ref, s_ref, t_ref, o_ref):
    """out = relu(y * scale + shift); scale/shift broadcast along rows (lane-dense layout)."""
    z = y_ref[...] * s_ref[...] + t_ref[...]
    o_ref[...] = jnp.maximum(z, 0.0).astype(o_ref.dtype)


# --------------------------------------------------------------------------- wrappers
def conv3x3_stats(x_nhwc_bf16, w_mat_bf16, bias_row_f32):
    """3x3 'same' conv (stride 1) + bias, fused per-channel sum / sum-of-squares."""
    N, H, W, Cin = x_nhwc_bf16.shape
    K, Cout = w_mat_bf16.shape
    assert K == 9 * Cin

    kernel = functools.partial(_conv1_kernel, H=H, W=W)
    y, s, ss = pl.pallas_call(
        kernel,
        out_shape=(
            jax.ShapeDtypeStruct((N, H, W, Cout), jnp.float32),
            jax.ShapeDtypeStruct((1, Cout), jnp.float32),
            jax.ShapeDtypeStruct((1, Cout), jnp.float32),
        ),
        grid_spec=pltpu.PrefetchScalarGridSpec(
            num_scalar_prefetch=0,
            grid=(N,),
            in_specs=[
                pl.BlockSpec((1, H, W, Cin), lambda n: (n, 0, 0, 0)),
                pl.BlockSpec((K, Cout), lambda n: (0, 0)),
                pl.BlockSpec((1, Cout), lambda n: (0, 0)),
            ],
            out_specs=[
                pl.BlockSpec((1, H, W, Cout), lambda n: (n, 0, 0, 0)),
                pl.BlockSpec((1, Cout), lambda n: (0, 0)),
                pl.BlockSpec((1, Cout), lambda n: (0, 0)),
            ],
            scratch_shapes=[pltpu.VMEM((H + 2, W + 2, Cin), jnp.float32)],
        ),
        # stats outputs are revisited every step -> the batch axis must stay sequential
        compiler_params=pltpu.CompilerParams(dimension_semantics=("arbitrary",)),
    )(x_nhwc_bf16, w_mat_bf16, bias_row_f32)
    return y, s, ss


def bnrelu_conv3x3_stats(y1_f32, scale_row, shift_row, w_mat_bf16, bias_row_f32):
    """Fused (BN1 affine + ReLU) -> 3x3 'same' conv + bias, plus per-channel batch stats."""
    N, H, W, C1 = y1_f32.shape
    K, Cout = w_mat_bf16.shape
    assert K == 9 * C1

    kernel = functools.partial(_bnrelu_conv_kernel, H=H, W=W)
    y, s, ss = pl.pallas_call(
        kernel,
        out_shape=(
            jax.ShapeDtypeStruct((N, H, W, Cout), jnp.float32),
            jax.ShapeDtypeStruct((1, Cout), jnp.float32),
            jax.ShapeDtypeStruct((1, Cout), jnp.float32),
        ),
        grid_spec=pltpu.PrefetchScalarGridSpec(
            num_scalar_prefetch=0,
            grid=(N,),
            in_specs=[
                pl.BlockSpec((1, H, W, C1), lambda n: (n, 0, 0, 0)),
                pl.BlockSpec((1, C1), lambda n: (0, 0)),
                pl.BlockSpec((1, C1), lambda n: (0, 0)),
                pl.BlockSpec((K, Cout), lambda n: (0, 0)),
                pl.BlockSpec((1, Cout), lambda n: (0, 0)),
            ],
            out_specs=[
                pl.BlockSpec((1, H, W, Cout), lambda n: (n, 0, 0, 0)),
                pl.BlockSpec((1, Cout), lambda n: (0, 0)),
                pl.BlockSpec((1, Cout), lambda n: (0, 0)),
            ],
            scratch_shapes=[pltpu.VMEM((H + 2, W + 2, C1), jnp.float32)],
        ),
        compiler_params=pltpu.CompilerParams(dimension_semantics=("arbitrary",)),
    )(y1_f32, scale_row, shift_row, w_mat_bf16, bias_row_f32)
    return y, s, ss


def bn_relu_apply(y_nhwc, scale_c, shift_c, out_dtype, block_rows=256):
    """out = relu(y * scale + shift), per-channel scale/shift, lane-dense fused kernel."""
    N, H, W, C = y_nhwc.shape
    M = N * H * W

    # group pixels so the lane dim is 128-wide (unmasked stores) when C < 128
    G = 1
    if C < 128 and 128 % C == 0:
        G = 128 // C
        while G > 1 and M % G != 0:
            G //= 2
    L = G * C
    ML = M // G

    s = jnp.tile(scale_c.astype(jnp.float32).reshape(1, C), (1, G))
    t = jnp.tile(shift_c.astype(jnp.float32).reshape(1, C), (1, G))

    tm = min(block_rows, _round_up(ML, 8))
    MLp = _round_up(ML, tm)
    yf = y_nhwc.reshape(ML, L)
    if MLp != ML:
        yf = jnp.pad(yf, ((0, MLp - ML), (0, 0)))

    out = pl.pallas_call(
        _bn_relu_kernel,
        out_shape=jax.ShapeDtypeStruct((MLp, L), out_dtype),
        grid_spec=pltpu.PrefetchScalarGridSpec(
            num_scalar_prefetch=0,
            grid=(MLp // tm,),
            in_specs=[
                pl.BlockSpec((tm, L), lambda i: (i, 0)),
                pl.BlockSpec((1, L), lambda i: (0, 0)),
                pl.BlockSpec((1, L), lambda i: (0, 0)),
            ],
            out_specs=pl.BlockSpec((tm, L), lambda i: (i, 0)),
        ),
        compiler_params=pltpu.CompilerParams(dimension_semantics=("parallel",)),
    )(yf, s, t)
    return out[:ML].reshape(N, H, W, C)


# --------------------------------------------------------------------------- DoubleConv forward
def double_conv_forward(params, x_nchw, eps=1e-5):
    """DoubleConv: (Conv3x3 + BN(batch stats) + ReLU) x 2.  Input/output are NCHW f32."""
    x = jnp.transpose(x_nchw, (0, 2, 3, 1)).astype(jnp.bfloat16)   # NCHW -> NHWC, bf16
    N, H, W, _ = x.shape
    cnt = float(N * H * W)

    def bn_scale_shift(s, ss, gamma, beta):
        mean = s[0] / cnt
        var = ss[0] / cnt - mean * mean                   # biased var (BatchNorm semantics)
        scale = gamma * jax.lax.rsqrt(var + eps)
        shift = beta - mean * scale
        return scale.reshape(1, -1), shift.reshape(1, -1)

    # conv1 + fused batch stats (padding done in VMEM)
    y1, s1, ss1 = conv3x3_stats(x, params["w1m"], params["b1r"])
    sc1, sh1 = bn_scale_shift(s1, ss1, params["g1"], params["be1"])

    # BN1 + ReLU fused into conv2 (+ conv2 batch stats)
    y2, s2, ss2 = bnrelu_conv3x3_stats(y1, sc1, sh1, params["w2m"], params["b2r"])
    sc2, sh2 = bn_scale_shift(s2, ss2, params["g2"], params["be2"])

    # final BN2 + ReLU (lane-dense elementwise kernel)
    out = bn_relu_apply(y2, sc2[0], sh2[0], jnp.float32)

    return jnp.transpose(out, (0, 3, 1, 2))               # NHWC -> NCHW


# --------------------------------------------------------------------------- pure-JAX reference
def double_conv_ref(params, x_nchw, eps=1e-5):
    x = jnp.transpose(x_nchw, (0, 2, 3, 1)).astype(jnp.bfloat16)

    def conv(a, w, b):
        y = jax.lax.conv_general_dilated(
            a, w.astype(jnp.bfloat16), window_strides=(1, 1), padding="SAME",
            dimension_numbers=("NHWC", "HWIO", "NHWC"),
            preferred_element_type=jnp.float32)
        return y + b

    def bn_relu(y, g, b):
        m = jnp.mean(y, axis=(0, 1, 2))
        v = jnp.mean(jnp.square(y - m), axis=(0, 1, 2))
        return jnp.maximum((y - m) * jax.lax.rsqrt(v + eps) * g + b, 0.0)

    y1 = conv(x, params["w1"], params["b1"])
    a1 = bn_relu(y1, params["g1"], params["be1"]).astype(jnp.bfloat16)
    y2 = conv(a1, params["w2"], params["b2"])
    out = bn_relu(y2, params["g2"], params["be2"])
    return jnp.transpose(out, (0, 3, 1, 2))


# --------------------------------------------------------------------------- params
def build_params(key, in_ch, out_ch):
    ks = jax.random.split(key, 8)

    def conv_w(k, ci, co):
        std = (2.0 / (9 * ci)) ** 0.5
        return jax.random.normal(k, (3, 3, ci, co), jnp.float32) * std

    w1 = conv_w(ks[0], in_ch, out_ch)
    b1 = 0.05 * jax.random.normal(ks[1], (out_ch,), jnp.float32)
    w2 = conv_w(ks[2], out_ch, out_ch)
    b2 = 0.05 * jax.random.normal(ks[3], (out_ch,), jnp.float32)
    g1 = 1.0 + 0.1 * jax.random.normal(ks[4], (out_ch,), jnp.float32)
    be1 = 0.1 * jax.random.normal(ks[5], (out_ch,), jnp.float32)
    g2 = 1.0 + 0.1 * jax.random.normal(ks[6], (out_ch,), jnp.float32)
    be2 = 0.1 * jax.random.normal(ks[7], (out_ch,), jnp.float32)

    p = dict(w1=w1, b1=b1, w2=w2, b2=b2, g1=g1, be1=be1, g2=g2, be2=be2)
    # pre-pack once (bf16 (9*Cin, Cout) weight matrices, (1, Cout) f32 bias rows)
    p["w1m"] = w1.reshape(9 * in_ch, out_ch).astype(jnp.bfloat16)
    p["b1r"] = b1.reshape(1, out_ch)
    p["w2m"] = w2.reshape(9 * out_ch, out_ch).astype(jnp.bfloat16)
    p["b2r"] = b2.reshape(1, out_ch)
    return p


# --------------------------------------------------------------------------- main
if __name__ == "__main__":
    key = jax.random.PRNGKey(0)
    pkey, xkey = jax.random.split(key)

    in_ch, out_ch = 4, 32
    N, Hs, Ws = 2, 16, 16

    params = build_params(pkey, in_ch, out_ch)
    x = jax.random.normal(xkey, (N, in_ch, Hs, Ws), jnp.float32)

    out = jax.block_until_ready(jax.jit(double_conv_forward)(params, x))
    assert out.shape == (N, out_ch, Hs, Ws), out.shape
    assert bool(jnp.all(jnp.isfinite(out)))

    ref = jax.block_until_ready(jax.jit(double_conv_ref)(params, x))
    err = float(jnp.max(jnp.abs(out - ref)))
    assert err < 1e-2, f"max abs err vs reference = {err}"

    print("KERNEL_OK")
</pallas_src>

<mosaic_0001>
module attributes {stable_mosaic.version = 11 : i64} {
  func.func @_conv1_kernel(%arg0: i32, %arg1: memref<1x16x16x4xbf16, #tpu.memory_space<vmem>>, %arg2: memref<36x32xbf16, #tpu.memory_space<vmem>>, %arg3: memref<1x32xf32, #tpu.memory_space<vmem>>, %arg4: memref<1x16x16x32xf32, #tpu.memory_space<vmem>>, %arg5: memref<1x32xf32, #tpu.memory_space<vmem>>, %arg6: memref<1x32xf32, #tpu.memory_space<vmem>>, %arg7: memref<18x18x4xf32, #tpu.memory_space<vmem>>) attributes {dimension_semantics = [#tpu.dimension_semantics<arbitrary>], iteration_bounds = array<i64: 2>, scalar_prefetch = 0 : i64, scratch_operands = 1 : i64, tpu.core_type = #tpu.core_type<tc>, window_params = [{transform_indices = @transform_0, window_bounds = array<i64: 1, 16, 16, 4>}, {pipeline_mode = #tpu.pipeline_mode<synchronous>, transform_indices = @transform_1, window_bounds = array<i64: 36, 32>}, {pipeline_mode = #tpu.pipeline_mode<synchronous>, transform_indices = @transform_2, window_bounds = array<i64: 1, 32>}, {transform_indices = @transform_3, window_bounds = array<i64: 1, 16, 16, 32>}, {pipeline_mode = #tpu.pipeline_mode<synchronous>, transform_indices = @transform_4, window_bounds = array<i64: 1, 32>}, {pipeline_mode = #tpu.pipeline_mode<synchronous>, transform_indices = @transform_5, window_bounds = array<i64: 1, 32>}]} {
    %c0_i32 = arith.constant 0 : i32
    %0 = arith.cmpi eq, %arg0, %c0_i32 : i32
    %1 = arith.extui %0 : i1 to i32
    %c0_i32_0 = arith.constant 0 : i32
    %2 = arith.cmpi ne, %1, %c0_i32_0 : i32
    scf.if %2 {
      %cst_27 = arith.constant 0.000000e+00 : f32
      %46 = vector.broadcast %cst_27 : f32 to vector<18x18x4xf32>
      %c0_28 = arith.constant 0 : index
      %c0_29 = arith.constant 0 : index
      %c0_30 = arith.constant 0 : index
      %47 = vector.load %arg7[%c0_28, %c0_29, %c0_30] : memref<18x18x4xf32, #tpu.memory_space<vmem>>, vector<18x18x4xf32>
      tpu.vector_store %arg7[%c0_28, %c0_29, %c0_30], %46 {strides = array<i32>} : memref<18x18x4xf32, #tpu.memory_space<vmem>>, vector<18x18x4xf32>,
      %cst_31 = arith.constant 0.000000e+00 : f32
      %48 = vector.broadcast %cst_31 : f32 to vector<1x32xf32>
      %c0_32 = arith.constant 0 : index
      %c0_33 = arith.constant 0 : index
      %49 = vector.load %arg5[%c0_32, %c0_33] : memref<1x32xf32, #tpu.memory_space<vmem>>, vector<1x32xf32>
      tpu.vector_store %arg5[%c0_32, %c0_33], %48 {strides = array<i32>} : memref<1x32xf32, #tpu.memory_space<vmem>>, vector<1x32xf32>,
      %cst_34 = arith.constant 0.000000e+00 : f32
      %50 = vector.broadcast %cst_34 : f32 to vector<1x32xf32>
      %c0_35 = arith.constant 0 : index
      %c0_36 = arith.constant 0 : index
      %51 = vector.load %arg6[%c0_35, %c0_36] : memref<1x32xf32, #tpu.memory_space<vmem>>, vector<1x32xf32>
      tpu.vector_store %arg6[%c0_35, %c0_36], %50 {strides = array<i32>} : memref<1x32xf32, #tpu.memory_space<vmem>>, vector<1x32xf32>,
    } else {
    }
    %c0 = arith.constant 0 : index
    %c0_1 = arith.constant 0 : index
    %c0_2 = arith.constant 0 : index
    %c0_3 = arith.constant 0 : index
    %3 = vector.load %arg1[%c0, %c0_1, %c0_2, %c0_3] : memref<1x16x16x4xbf16, #tpu.memory_space<vmem>>, vector<1x16x16x4xbf16>
    %4 = vector.shape_cast %3 : vector<1x16x16x4xbf16> to vector<16x16x4xbf16>
    %5 = arith.extf %4 : vector<16x16x4xbf16> to vector<16x16x4xf32>
    %c1 = arith.constant 1 : index
    %c1_4 = arith.constant 1 : index
    %c0_5 = arith.constant 0 : index
    %6 = vector.load %arg7[%c1, %c1_4, %c0_5] : memref<18x18x4xf32, #tpu.memory_space<vmem>>, vector<16x16x4xf32>
    tpu.vector_store %arg7[%c1, %c1_4, %c0_5], %5 {strides = array<i32>} : memref<18x18x4xf32, #tpu.memory_space<vmem>>, vector<16x16x4xf32>,
    %c0_6 = arith.constant 0 : index
    %c0_7 = arith.constant 0 : index
    %c0_8 = arith.constant 0 : index
    %7 = vector.load %arg7[%c0_6, %c0_7, %c0_8] : memref<18x18x4xf32, #tpu.memory_space<vmem>>, vector<18x18x4xf32>
    %8 = vector.extract_strided_slice %7 {offsets = [0, 0, 0], sizes = [16, 16, 4], strides = [1, 1, 1]} : vector<18x18x4xf32> to vector<16x16x4xf32>
    %9 = vector.shape_cast %8 : vector<16x16x4xf32> to vector<256x4xf32>
    %10 = vector.extract_strided_slice %7 {offsets = [0, 1, 0], sizes = [16, 16, 4], strides = [1, 1, 1]} : vector<18x18x4xf32> to vector<16x16x4xf32>
    %11 = vector.shape_cast %10 : vector<16x16x4xf32> to vector<256x4xf32>
    %12 = vector.extract_strided_slice %7 {offsets = [0, 2, 0], sizes = [16, 16, 4], strides = [1, 1, 1]} : vector<18x18x4xf32> to vector<16x16x4xf32>
    %13 = vector.shape_cast %12 : vector<16x16x4xf32> to vector<256x4xf32>
    %14 = vector.extract_strided_slice %7 {offsets = [1, 0, 0], sizes = [16, 16, 4], strides = [1, 1, 1]} : vector<18x18x4xf32> to vector<16x16x4xf32>
    %15 = vector.shape_cast %14 : vector<16x16x4xf32> to vector<256x4xf32>
    %16 = vector.extract_strided_slice %7 {offsets = [1, 1, 0], sizes = [16, 16, 4], strides = [1, 1, 1]} : vector<18x18x4xf32> to vector<16x16x4xf32>
    %17 = vector.shape_cast %16 : vector<16x16x4xf32> to vector<256x4xf32>
    %18 = vector.extract_strided_slice %7 {offsets = [1, 2, 0], sizes = [16, 16, 4], strides = [1, 1, 1]} : vector<18x18x4xf32> to vector<16x16x4xf32>
    %19 = vector.shape_cast %18 : vector<16x16x4xf32> to vector<256x4xf32>
    %20 = vector.extract_strided_slice %7 {offsets = [2, 0, 0], sizes = [16, 16, 4], strides = [1, 1, 1]} : vector<18x18x4xf32> to vector<16x16x4xf32>
    %21 = vector.shape_cast %20 : vector<16x16x4xf32> to vector<256x4xf32>
    %22 = vector.extract_strided_slice %7 {offsets = [2, 1, 0], sizes = [16, 16, 4], strides = [1, 1, 1]} : vector<18x18x4xf32> to vector<16x16x4xf32>
    %23 = vector.shape_cast %22 : vector<16x16x4xf32> to vector<256x4xf32>
    %24 = vector.extract_strided_slice %7 {offsets = [2, 2, 0], sizes = [16, 16, 4], strides = [1, 1, 1]} : vector<18x18x4xf32> to vector<16x16x4xf32>
    %25 = vector.shape_cast %24 : vector<16x16x4xf32> to vector<256x4xf32>
    %26 = tpu.concatenate %9, %11, %13, %15, %17, %19, %21, %23, %25 in 1 : vector<256x4xf32>, vector<256x4xf32>, vector<256x4xf32>, vector<256x4xf32>, vector<256x4xf32>, vector<256x4xf32>, vector<256x4xf32>, vector<256x4xf32>, vector<256x4xf32> -> vector<256x36xf32>
    %27 = arith.truncf %26 : vector<256x36xf32> to vector<256x36xbf16>
    %c0_9 = arith.constant 0 : index
    %c0_10 = arith.constant 0 : index
    %28 = vector.load %arg2[%c0_9, %c0_10] : memref<36x32xbf16, #tpu.memory_space<vmem>>, vector<36x32xbf16>
    %cst = arith.constant dense<0.000000e+00> : vector<256x32xf32>
    %29 = tpu.matmul %27, %28, %cst {dimension_numbers = #tpu.dot_dimension_numbers<[1], [0], [0], [1], [0, 0, 1, 1], [], []>} : vector<256x36xbf16>, vector<36x32xbf16>, vector<256x32xf32> -> vector<256x32xf32>
    %c0_11 = arith.constant 0 : index
    %c0_12 = arith.constant 0 : index
    %30 = vector.load %arg3[%c0_11, %c0_12] : memref<1x32xf32, #tpu.memory_space<vmem>>, vector<1x32xf32>
    %31 = vector.broadcast %30 : vector<1x32xf32> to vector<256x32xf32>
    %32 = arith.addf %29, %31 : vector<256x32xf32>
    %33 = vector.shape_cast %32 : vector<256x32xf32> to vector<1x16x16x32xf32>
    %c0_13 = arith.constant 0 : index
    %c0_14 = arith.constant 0 : index
    %c0_15 = arith.constant 0 : index
    %c0_16 = arith.constant 0 : index
    %34 = vector.load %arg4[%c0_13, %c0_14, %c0_15, %c0_16] : memref<1x16x16x32xf32, #tpu.memory_space<vmem>>, vector<1x16x16x32xf32>
    tpu.vector_store %arg4[%c0_13, %c0_14, %c0_15, %c0_16], %33 {strides = array<i32>} : memref<1x16x16x32xf32, #tpu.memory_space<vmem>>, vector<1x16x16x32xf32>,
    %c0_17 = arith.constant 0 : index
    %c0_18 = arith.constant 0 : index
    %35 = vector.load %arg5[%c0_17, %c0_18] : memref<1x32xf32, #tpu.memory_space<vmem>>, vector<1x32xf32>
    %cst_19 = arith.constant dense<0.000000e+00> : vector<32xf32>
    %36 = vector.multi_reduction <add>, %32, %cst_19 [0] : vector<256x32xf32> to vector<32xf32>
    %37 = vector.shape_cast %36 : vector<32xf32> to vector<1x32xf32>
    %38 = arith.addf %35, %37 : vector<1x32xf32>
    %c0_20 = arith.constant 0 : index
    %c0_21 = arith.constant 0 : index
    %39 = vector.load %arg5[%c0_20, %c0_21] : memref<1x32xf32, #tpu.memory_space<vmem>>, vector<1x32xf32>
    tpu.vector_store %arg5[%c0_20, %c0_21], %38 {strides = array<i32>} : memref<1x32xf32, #tpu.memory_space<vmem>>, vector<1x32xf32>,
    %c0_22 = arith.constant 0 : index
    %c0_23 = arith.constant 0 : index
    %40 = vector.load %arg6[%c0_22, %c0_23] : memref<1x32xf32, #tpu.memory_space<vmem>>, vector<1x32xf32>
    %41 = arith.mulf %32, %32 : vector<256x32xf32>
    %cst_24 = arith.constant dense<0.000000e+00> : vector<32xf32>
    %42 = vector.multi_reduction <add>, %41, %cst_24 [0] : vector<256x32xf32> to vector<32xf32>
    %43 = vector.shape_cast %42 : vector<32xf32> to vector<1x32xf32>
    %44 = arith.addf %40, %43 : vector<1x32xf32>
    %c0_25 = arith.constant 0 : index
    %c0_26 = arith.constant 0 : index
    %45 = vector.load %arg6[%c0_25, %c0_26] : memref<1x32xf32, #tpu.memory_space<vmem>>, vector<1x32xf32>
    tpu.vector_store %arg6[%c0_25, %c0_26], %44 {strides = array<i32>} : memref<1x32xf32, #tpu.memory_space<vmem>>, vector<1x32xf32>,
    return
  }
  func.func @transform_0(%arg0: i32) -> (i32, i32, i32, i32) {
    %c0_i32 = arith.constant 0 : i32
    %c0_i32_0 = arith.constant 0 : i32
    %c0_i32_1 = arith.constant 0 : i32
    %c0_i32_2 = arith.constant 0 : i32
    return %arg0, %c0_i32, %c0_i32_0, %c0_i32_1 : i32, i32, i32, i32
  }
  func.func @transform_1(%arg0: i32) -> (i32, i32) {
    %c0_i32 = arith.constant 0 : i32
    %c0_i32_0 = arith.constant 0 : i32
    %c0_i32_1 = arith.constant 0 : i32
    return %c0_i32, %c0_i32_0 : i32, i32
  }
  func.func @transform_2(%arg0: i32) -> (i32, i32) {
    %c0_i32 = arith.constant 0 : i32
    %c0_i32_0 = arith.constant 0 : i32
    %c0_i32_1 = arith.constant 0 : i32
    return %c0_i32, %c0_i32_0 : i32, i32
  }
  func.func @transform_3(%arg0: i32) -> (i32, i32, i32, i32) {
    %c0_i32 = arith.constant 0 : i32
    %c0_i32_0 = arith.constant 0 : i32
    %c0_i32_1 = arith.constant 0 : i32
    %c0_i32_2 = arith.constant 0 : i32
    return %arg0, %c0_i32, %c0_i32_0, %c0_i32_1 : i32, i32, i32, i32
  }
  func.func @transform_4(%arg0: i32) -> (i32, i32) {
    %c0_i32 = arith.constant 0 : i32
    %c0_i32_0 = arith.constant 0 : i32
    %c0_i32_1 = arith.constant 0 : i32
    return %c0_i32, %c0_i32_0 : i32, i32
  }
  func.func @transform_5(%arg0: i32) -> (i32, i32) {
    %c0_i32 = arith.constant 0 : i32
    %c0_i32_0 = arith.constant 0 : i32
    %c0_i32_1 = arith.constant 0 : i32
    return %c0_i32, %c0_i32_0 : i32, i32
  }
}

module attributes {stable_mosaic.version = 11 : i64} {
  func.func @_bnrelu_conv_kernel(%arg0: i32, %arg1: memref<1x16x16x32xf32, #tpu.memory_space<vmem>>, %arg2: memref<1x32xf32, #tpu.memory_space<vmem>>, %arg3: memref<1x32xf32, #tpu.memory_space<vmem>>, %arg4: memref<288x32xbf16, #tpu.memory_space<vmem>>, %arg5: memref<1x32xf32, #tpu.memory_space<vmem>>, %arg6: memref<1x16x16x32xf32, #tpu.memory_space<vmem>>, %arg7: memref<1x32xf32, #tpu.memory_space<vmem>>, %arg8: memref<1x32xf32, #tpu.memory_space<vmem>>, %arg9: memref<18x18x32xf32, #tpu.memory_space<vmem>>) attributes {dimension_semantics = [#tpu.dimension_semantics<arbitrary>], iteration_bounds = array<i64: 2>, scalar_prefetch = 0 : i64, scratch_operands = 1 : i64, tpu.core_type = #tpu.core_type<tc>, window_params = [{transform_indices = @transform_0, window_bounds = array<i64: 1, 16, 16, 32>}, {pipeline_mode = #tpu.pipeline_mode<synchronous>, transform_indices = @transform_1, window_bounds = array<i64: 1, 32>}, {pipeline_mode = #tpu.pipeline_mode<synchronous>, transform_indices = @transform_2, window_bounds = array<i64: 1, 32>}, {pipeline_mode = #tpu.pipeline_mode<synchronous>, transform_indices = @transform_3, window_bounds = array<i64: 288, 32>}, {pipeline_mode = #tpu.pipeline_mode<synchronous>, transform_indices = @transform_4, window_bounds = array<i64: 1, 32>}, {transform_indices = @transform_5, window_bounds = array<i64: 1, 16, 16, 32>}, {pipeline_mode = #tpu.pipeline_mode<synchronous>, transform_indices = @transform_6, window_bounds = array<i64: 1, 32>}, {pipeline_mode = #tpu.pipeline_mode<synchronous>, transform_indices = @transform_7, window_bounds = array<i64: 1, 32>}]} {
    %c0_i32 = arith.constant 0 : i32
    %0 = arith.cmpi eq, %arg0, %c0_i32 : i32
    %1 = arith.extui %0 : i1 to i32
    %c0_i32_0 = arith.constant 0 : i32
    %2 = arith.cmpi ne, %1, %c0_i32_0 : i32
    scf.if %2 {
      %cst_32 = arith.constant 0.000000e+00 : f32
      %54 = vector.broadcast %cst_32 : f32 to vector<18x18x32xf32>
      %c0_33 = arith.constant 0 : index
      %c0_34 = arith.constant 0 : index
      %c0_35 = arith.constant 0 : index
      %55 = vector.load %arg9[%c0_33, %c0_34, %c0_35] : memref<18x18x32xf32, #tpu.memory_space<vmem>>, vector<18x18x32xf32>
      tpu.vector_store %arg9[%c0_33, %c0_34, %c0_35], %54 {strides = array<i32>} : memref<18x18x32xf32, #tpu.memory_space<vmem>>, vector<18x18x32xf32>,
      %cst_36 = arith.constant 0.000000e+00 : f32
      %56 = vector.broadcast %cst_36 : f32 to vector<1x32xf32>
      %c0_37 = arith.constant 0 : index
      %c0_38 = arith.constant 0 : index
      %57 = vector.load %arg7[%c0_37, %c0_38] : memref<1x32xf32, #tpu.memory_space<vmem>>, vector<1x32xf32>
      tpu.vector_store %arg7[%c0_37, %c0_38], %56 {strides = array<i32>} : memref<1x32xf32, #tpu.memory_space<vmem>>, vector<1x32xf32>,
      %cst_39 = arith.constant 0.000000e+00 : f32
      %58 = vector.broadcast %cst_39 : f32 to vector<1x32xf32>
      %c0_40 = arith.constant 0 : index
      %c0_41 = arith.constant 0 : index
      %59 = vector.load %arg8[%c0_40, %c0_41] : memref<1x32xf32, #tpu.memory_space<vmem>>, vector<1x32xf32>
      tpu.vector_store %arg8[%c0_40, %c0_41], %58 {strides = array<i32>} : memref<1x32xf32, #tpu.memory_space<vmem>>, vector<1x32xf32>,
    } else {
    }
    %c0 = arith.constant 0 : index
    %c0_1 = arith.constant 0 : index
    %c0_2 = arith.constant 0 : index
    %c0_3 = arith.constant 0 : index
    %3 = vector.load %arg1[%c0, %c0_1, %c0_2, %c0_3] : memref<1x16x16x32xf32, #tpu.memory_space<vmem>>, vector<1x16x16x32xf32>
    %4 = vector.shape_cast %3 : vector<1x16x16x32xf32> to vector<256x32xf32>
    %c0_4 = arith.constant 0 : index
    %c0_5 = arith.constant 0 : index
    %5 = vector.load %arg2[%c0_4, %c0_5] : memref<1x32xf32, #tpu.memory_space<vmem>>, vector<1x32xf32>
    %6 = vector.broadcast %5 : vector<1x32xf32> to vector<256x32xf32>
    %7 = arith.mulf %4, %6 : vector<256x32xf32>
    %c0_6 = arith.constant 0 : index
    %c0_7 = arith.constant 0 : index
    %8 = vector.load %arg3[%c0_6, %c0_7] : memref<1x32xf32, #tpu.memory_space<vmem>>, vector<1x32xf32>
    %9 = vector.broadcast %8 : vector<1x32xf32> to vector<256x32xf32>
    %10 = arith.addf %7, %9 : vector<256x32xf32>
    %cst = arith.constant 0.000000e+00 : f32
    %11 = vector.broadcast %cst : f32 to vector<256x32xf32>
    %12 = arith.maximumf %10, %11 : vector<256x32xf32>
    %13 = vector.shape_cast %12 : vector<256x32xf32> to vector<16x16x32xf32>
    %c1 = arith.constant 1 : index
    %c1_8 = arith.constant 1 : index
    %c0_9 = arith.constant 0 : index
    %14 = vector.load %arg9[%c1, %c1_8, %c0_9] : memref<18x18x32xf32, #tpu.memory_space<vmem>>, vector<16x16x32xf32>
    tpu.vector_store %arg9[%c1, %c1_8, %c0_9], %13 {strides = array<i32>} : memref<18x18x32xf32, #tpu.memory_space<vmem>>, vector<16x16x32xf32>,
    %c0_10 = arith.constant 0 : index
    %c0_11 = arith.constant 0 : index
    %c0_12 = arith.constant 0 : index
    %15 = vector.load %arg9[%c0_10, %c0_11, %c0_12] : memref<18x18x32xf32, #tpu.memory_space<vmem>>, vector<18x18x32xf32>
    %16 = vector.extract_strided_slice %15 {offsets = [0, 0, 0], sizes = [16, 16, 32], strides = [1, 1, 1]} : vector<18x18x32xf32> to vector<16x16x32xf32>
    %17 = vector.shape_cast %16 : vector<16x16x32xf32> to vector<256x32xf32>
    %18 = vector.extract_strided_slice %15 {offsets = [0, 1, 0], sizes = [16, 16, 32], strides = [1, 1, 1]} : vector<18x18x32xf32> to vector<16x16x32xf32>
    %19 = vector.shape_cast %18 : vector<16x16x32xf32> to vector<256x32xf32>
    %20 = vector.extract_strided_slice %15 {offsets = [0, 2, 0], sizes = [16, 16, 32], strides = [1, 1, 1]} : vector<18x18x32xf32> to vector<16x16x32xf32>
    %21 = vector.shape_cast %20 : vector<16x16x32xf32> to vector<256x32xf32>
    %22 = vector.extract_strided_slice %15 {offsets = [1, 0, 0], sizes = [16, 16, 32], strides = [1, 1, 1]} : vector<18x18x32xf32> to vector<16x16x32xf32>
    %23 = vector.shape_cast %22 : vector<16x16x32xf32> to vector<256x32xf32>
    %24 = vector.extract_strided_slice %15 {offsets = [1, 1, 0], sizes = [16, 16, 32], strides = [1, 1, 1]} : vector<18x18x32xf32> to vector<16x16x32xf32>
    %25 = vector.shape_cast %24 : vector<16x16x32xf32> to vector<256x32xf32>
    %26 = vector.extract_strided_slice %15 {offsets = [1, 2, 0], sizes = [16, 16, 32], strides = [1, 1, 1]} : vector<18x18x32xf32> to vector<16x16x32xf32>
    %27 = vector.shape_cast %26 : vector<16x16x32xf32> to vector<256x32xf32>
    %28 = vector.extract_strided_slice %15 {offsets = [2, 0, 0], sizes = [16, 16, 32], strides = [1, 1, 1]} : vector<18x18x32xf32> to vector<16x16x32xf32>
    %29 = vector.shape_cast %28 : vector<16x16x32xf32> to vector<256x32xf32>
    %30 = vector.extract_strided_slice %15 {offsets = [2, 1, 0], sizes = [16, 16, 32], strides = [1, 1, 1]} : vector<18x18x32xf32> to vector<16x16x32xf32>
    %31 = vector.shape_cast %30 : vector<16x16x32xf32> to vector<256x32xf32>
    %32 = vector.extract_strided_slice %15 {offsets = [2, 2, 0], sizes = [16, 16, 32], strides = [1, 1, 1]} : vector<18x18x32xf32> to vector<16x16x32xf32>
    %33 = vector.shape_cast %32 : vector<16x16x32xf32> to vector<256x32xf32>
    %34 = tpu.concatenate %17, %19, %21, %23, %25, %27, %29, %31, %33 in 1 : vector<256x32xf32>, vector<256x32xf32>, vector<256x32xf32>, vector<256x32xf32>, vector<256x32xf32>, vector<256x32xf32>, vector<256x32xf32>, vector<256x32xf32>, vector<256x32xf32> -> vector<256x288xf32>
    %35 = arith.truncf %34 : vector<256x288xf32> to vector<256x288xbf16>
    %c0_13 = arith.constant 0 : index
    %c0_14 = arith.constant 0 : index
    %36 = vector.load %arg4[%c0_13, %c0_14] : memref<288x32xbf16, #tpu.memory_space<vmem>>, vector<288x32xbf16>
    %cst_15 = arith.constant dense<0.000000e+00> : vector<256x32xf32>
    %37 = tpu.matmul %35, %36, %cst_15 {dimension_numbers = #tpu.dot_dimension_numbers<[1], [0], [0], [1], [0, 0, 1, 1], [], []>} : vector<256x288xbf16>, vector<288x32xbf16>, vector<256x32xf32> -> vector<256x32xf32>
    %c0_16 = arith.constant 0 : index
    %c0_17 = arith.constant 0 : index
    %38 = vector.load %arg5[%c0_16, %c0_17] : memref<1x32xf32, #tpu.memory_space<vmem>>, vector<1x32xf32>
    %39 = vector.broadcast %38 : vector<1x32xf32> to vector<256x32xf32>
    %40 = arith.addf %37, %39 : vector<256x32xf32>
    %41 = vector.shape_cast %40 : vector<256x32xf32> to vector<1x16x16x32xf32>
    %c0_18 = arith.constant 0 : index
    %c0_19 = arith.constant 0 : index
    %c0_20 = arith.constant 0 : index
    %c0_21 = arith.constant 0 : index
    %42 = vector.load %arg6[%c0_18, %c0_19, %c0_20, %c0_21] : memref<1x16x16x32xf32, #tpu.memory_space<vmem>>, vector<1x16x16x32xf32>
    tpu.vector_store %arg6[%c0_18, %c0_19, %c0_20, %c0_21], %41 {strides = array<i32>} : memref<1x16x16x32xf32, #tpu.memory_space<vmem>>, vector<1x16x16x32xf32>,
    %c0_22 = arith.constant 0 : index
    %c0_23 = arith.constant 0 : index
    %43 = vector.load %arg7[%c0_22, %c0_23] : memref<1x32xf32, #tpu.memory_space<vmem>>, vector<1x32xf32>
    %cst_24 = arith.constant dense<0.000000e+00> : vector<32xf32>
    %44 = vector.multi_reduction <add>, %40, %cst_24 [0] : vector<256x32xf32> to vector<32xf32>
    %45 = vector.shape_cast %44 : vector<32xf32> to vector<1x32xf32>
    %46 = arith.addf %43, %45 : vector<1x32xf32>
    %c0_25 = arith.constant 0 : index
    %c0_26 = arith.constant 0 : index
    %47 = vector.load %arg7[%c0_25, %c0_26] : memref<1x32xf32, #tpu.memory_space<vmem>>, vector<1x32xf32>
    tpu.vector_store %arg7[%c0_25, %c0_26], %46 {strides = array<i32>} : memref<1x32xf32, #tpu.memory_space<vmem>>, vector<1x32xf32>,
    %c0_27 = arith.constant 0 : index
    %c0_28 = arith.constant 0 : index
    %48 = vector.load %arg8[%c0_27, %c0_28] : memref<1x32xf32, #tpu.memory_space<vmem>>, vector<1x32xf32>
    %49 = arith.mulf %40, %40 : vector<256x32xf32>
    %cst_29 = arith.constant dense<0.000000e+00> : vector<32xf32>
    %50 = vector.multi_reduction <add>, %49, %cst_29 [0] : vector<256x32xf32> to vector<32xf32>
    %51 = vector.shape_cast %50 : vector<32xf32> to vector<1x32xf32>
    %52 = arith.addf %48, %51 : vector<1x32xf32>
    %c0_30 = arith.constant 0 : index
    %c0_31 = arith.constant 0 : index
    %53 = vector.load %arg8[%c0_30, %c0_31] : memref<1x32xf32, #tpu.memory_space<vmem>>, vector<1x32xf32>
    tpu.vector_store %arg8[%c0_30, %c0_31], %52 {strides = array<i32>} : memref<1x32xf32, #tpu.memory_space<vmem>>, vector<1x32xf32>,
    return
  }
  func.func @transform_0(%arg0: i32) -> (i32, i32, i32, i32) {
    %c0_i32 = arith.constant 0 : i32
    %c0_i32_0 = arith.constant 0 : i32
    %c0_i32_1 = arith.constant 0 : i32
    %c0_i32_2 = arith.constant 0 : i32
    return %arg0, %c0_i32, %c0_i32_0, %c0_i32_1 : i32, i32, i32, i32
  }
  func.func @transform_1(%arg0: i32) -> (i32, i32) {
    %c0_i32 = arith.constant 0 : i32
    %c0_i32_0 = arith.constant 0 : i32
    %c0_i32_1 = arith.constant 0 : i32
    return %c0_i32, %c0_i32_0 : i32, i32
  }
  func.func @transform_2(%arg0: i32) -> (i32, i32) {
    %c0_i32 = arith.constant 0 : i32
    %c0_i32_0 = arith.constant 0 : i32
    %c0_i32_1 = arith.constant 0 : i32
    return %c0_i32, %c0_i32_0 : i32, i32
  }
  func.func @transform_3(%arg0: i32) -> (i32, i32) {
    %c0_i32 = arith.constant 0 : i32
    %c0_i32_0 = arith.constant 0 : i32
    %c0_i32_1 = arith.constant 0 : i32
    return %c0_i32, %c0_i32_0 : i32, i32
  }
  func.func @transform_4(%arg0: i32) -> (i32, i32) {
    %c0_i32 = arith.constant 0 : i32
    %c0_i32_0 = arith.constant 0 : i32
    %c0_i32_1 = arith.constant 0 : i32
    return %c0_i32, %c0_i32_0 : i32, i32
  }
  func.func @transform_5(%arg0: i32) -> (i32, i32, i32, i32) {
    %c0_i32 = arith.constant 0 : i32
    %c0_i32_0 = arith.constant 0 : i32
    %c0_i32_1 = arith.constant 0 : i32
    %c0_i32_2 = arith.constant 0 : i32
    return %arg0, %c0_i32, %c0_i32_0, %c0_i32_1 : i32, i32, i32, i32
  }
  func.func @transform_6(%arg0: i32) -> (i32, i32) {
    %c0_i32 = arith.constant 0 : i32
    %c0_i32_0 = arith.constant 0 : i32
    %c0_i32_1 = arith.constant 0 : i32
    return %c0_i32, %c0_i32_0 : i32, i32
  }
  func.func @transform_7(%arg0: i32) -> (i32, i32) {
    %c0_i32 = arith.constant 0 : i32
    %c0_i32_0 = arith.constant 0 : i32
    %c0_i32_1 = arith.constant 0 : i32
    return %c0_i32, %c0_i32_0 : i32, i32
  }
}

module attributes {stable_mosaic.version = 11 : i64} {
  func.func @_bn_relu_kernel(%arg0: i32, %arg1: memref<128x128xf32, #tpu.memory_space<vmem>>, %arg2: memref<1x128xf32, #tpu.memory_space<vmem>>, %arg3: memref<1x128xf32, #tpu.memory_space<vmem>>, %arg4: memref<128x128xf32, #tpu.memory_space<vmem>>) attributes {dimension_semantics = [#tpu.dimension_semantics<parallel>], iteration_bounds = array<i64: 1>, scalar_prefetch = 0 : i64, scratch_operands = 0 : i64, tpu.core_type = #tpu.core_type<tc>, window_params = [{transform_indices = @transform_0, window_bounds = array<i64: 128, 128>}, {pipeline_mode = #tpu.pipeline_mode<synchronous>, transform_indices = @transform_1, window_bounds = array<i64: 1, 128>}, {pipeline_mode = #tpu.pipeline_mode<synchronous>, transform_indices = @transform_2, window_bounds = array<i64: 1, 128>}, {transform_indices = @transform_3, window_bounds = array<i64: 128, 128>}]} {
    %c0 = arith.constant 0 : index
    %c0_0 = arith.constant 0 : index
    %0 = vector.load %arg1[%c0, %c0_0] : memref<128x128xf32, #tpu.memory_space<vmem>>, vector<128x128xf32>
    %c0_1 = arith.constant 0 : index
    %c0_2 = arith.constant 0 : index
    %1 = vector.load %arg2[%c0_1, %c0_2] : memref<1x128xf32, #tpu.memory_space<vmem>>, vector<1x128xf32>
    %2 = vector.broadcast %1 : vector<1x128xf32> to vector<128x128xf32>
    %3 = arith.mulf %0, %2 : vector<128x128xf32>
    %c0_3 = arith.constant 0 : index
    %c0_4 = arith.constant 0 : index
    %4 = vector.load %arg3[%c0_3, %c0_4] : memref<1x128xf32, #tpu.memory_space<vmem>>, vector<1x128xf32>
    %5 = vector.broadcast %4 : vector<1x128xf32> to vector<128x128xf32>
    %6 = arith.addf %3, %5 : vector<128x128xf32>
    %cst = arith.constant 0.000000e+00 : f32
    %7 = vector.broadcast %cst : f32 to vector<128x128xf32>
    %8 = arith.maximumf %6, %7 : vector<128x128xf32>
    %c0_5 = arith.constant 0 : index
    %c0_6 = arith.constant 0 : index
    %9 = vector.load %arg4[%c0_5, %c0_6] : memref<128x128xf32, #tpu.memory_space<vmem>>, vector<128x128xf32>
    tpu.vector_store %arg4[%c0_5, %c0_6], %8 {strides = array<i32>} : memref<128x128xf32, #tpu.memory_space<vmem>>, vector<128x128xf32>,
    return
  }
  func.func @transform_0(%arg0: i32) -> (i32, i32) {
    %c0_i32 = arith.constant 0 : i32
    %c0_i32_0 = arith.constant 0 : i32
    return %arg0, %c0_i32 : i32, i32
  }
  func.func @transform_1(%arg0: i32) -> (i32, i32) {
    %c0_i32 = arith.constant 0 : i32
    %c0_i32_0 = arith.constant 0 : i32
    %c0_i32_1 = arith.constant 0 : i32
    return %c0_i32, %c0_i32_0 : i32, i32
  }
  func.func @transform_2(%arg0: i32) -> (i32, i32) {
    %c0_i32 = arith.constant 0 : i32
    %c0_i32_0 = arith.constant 0 : i32
    %c0_i32_1 = arith.constant 0 : i32
    return %c0_i32, %c0_i32_0 : i32, i32
  }
  func.func @transform_3(%arg0: i32) -> (i32, i32) {
    %c0_i32 = arith.constant 0 : i32
    %c0_i32_0 = arith.constant 0 : i32
    return %arg0, %c0_i32 : i32, i32
  }
}

</mosaic_0001>

<bundles_post_ra>
// kernel: double_conv_forward.5
= control target key start
LH: loop header
LB: loop body
LE: loop exit
PB: predicated region body
PF: predicated region fallthrough
CT: control target
= control target key end

     0   :  { %s254_s0 = inlined_call_operand.vmem [shape: f32[128,128], index: 0, kind: input, shape index: {}]   ;;  %s255_s1 = inlined_call_operand.vmem [shape: f32[1,128], index: 1, kind: input, shape index: {}]   ;;  %s256_s2 = inlined_call_operand.vmem [shape: f32[1,128], index: 2, kind: input, shape index: {}]   ;;  %s257_s3 = inlined_call_operand.vmem [shape: f32[128,128], index: 3, kind: output, shape index: {}]  }
   0x1   :  { %v14_v0 = vld [vmem:[%s254_s0] sm:$0xff]  ;;  %v15_v4 = vld [vmem:[%s254_s0 + $0x8] sm:$0xff]  ;;  %v16_v5 = vld [vmem:[%s254_s0 + $0x10] sm:$0xff] }
   0x2   :  { %v112_v1 = vld [vmem:[%s255_s1] ss:$0 sm:$0xff]  ;;  %v17_v6 = vld [vmem:[%s254_s0 + $0x18] sm:$0xff]  ;;  %v19_v11 = vld [vmem:[%s254_s0 + $0x28] sm:$0xff] }
   0x3   :  { %v143_v2 = vld [vmem:[%s256_s2] ss:$0 sm:$0xff]  ;;  %v37_v3 = vmul.f32 %v112_v1, %v14_v0  ;;  %v38_v7 = vmul.f32 %v112_v1, %v15_v4  ;;  %v39_v8 = vmul.f32 %v112_v1, %v16_v5  ;;  %v40_v9 = vmul.f32 %v112_v1, %v17_v6  ;;  %v20_v12 = vld [vmem:[%s254_s0 + $0x30] sm:$0xff]  ;;  %v21_v17 = vld [vmem:[%s254_s0 + $0x38] sm:$0xff] }
   0x4   :  { %v18_v10 = vld [vmem:[%s254_s0 + $0x20] sm:$0xff]  ;;  %v42_v15 = vmul.f32 %v112_v1, %v19_v11  ;;  %v43_v16 = vmul.f32 %v112_v1, %v20_v12  ;;  %v44_v21 = vmul.f32 %v112_v1, %v21_v17  ;;  %v23_v27 = vld [vmem:[%s254_s0 + $0x48] sm:$0xff]  ;;  %v24_v28 = vld [vmem:[%s254_s0 + $0x50] sm:$0xff] }
   0x5   :  { %v60_v13 = vadd.f32 %v143_v2, %v37_v3  ;;  %v41_v14 = vmul.f32 %v112_v1, %v18_v10  ;;  %v61_v18 = vadd.f32 %v143_v2, %v38_v7  ;;  %v62_v19 = vadd.f32 %v143_v2, %v39_v8  ;;  %v22_v22 = vld [vmem:[%s254_s0 + $0x40] sm:$0xff]  ;;  %v25_v29 = vld [vmem:[%s254_s0 + $0x58] sm:$0xff]  ;;  %v27_v35 = vld [vmem:[%s254_s0 + $0x68] sm:$0xff] }
   0x6   :  { %v63_v20 = vadd.f32 %v143_v2, %v40_v9  ;;  %v65_v25 = vadd.f32 %v143_v2, %v42_v15  ;;  %v66_v26 = vadd.f32 %v143_v2, %v43_v16  ;;  %v67_v33 = vadd.f32 %v143_v2, %v44_v21  ;;  %v26_v34 = vld [vmem:[%s254_s0 + $0x60] sm:$0xff]  ;;  %v28_v36 = vld [vmem:[%s254_s0 + $0x70] sm:$0xff]  ;;  %v29_v41 = vld [vmem:[%s254_s0 + $0x78] sm:$0xff] }
   0x7   :  { %v76_v23 = vmax.f32 %v60_v13, 0.0  ;;  %v64_v24 = vadd.f32 %v143_v2, %v41_v14  ;;  %v77_v30 = vmax.f32 %v61_v18, 0.0  ;;  %v78_v31 = vmax.f32 %v62_v19, 0.0 }
   0x8   :  { %v79_v32 = vmax.f32 %v63_v20, 0.0  ;;  %v81_v38 = vmax.f32 %v65_v25, 0.0  ;;  %v82_v39 = vmax.f32 %v66_v26, 0.0  ;;  %v45_v40 = vmul.f32 %v112_v1, %v22_v22 }
   0x9   :  { %92 = vst [vmem:[%s257_s3] sm:$0xff] %v76_v23  ;;  %v80_v37 = vmax.f32 %v64_v24, 0.0  ;;  %93 = vst [vmem:[%s257_s3 + $0x8] sm:$0xff] %v77_v30  ;;  %v83_v42 = vmax.f32 %v67_v33, 0.0  ;;  %v46_v43 = vmul.f32 %v112_v1, %v23_v27  ;;  %v47_v44 = vmul.f32 %v112_v1, %v24_v28 }
   0xa   :  { %94 = vst [vmem:[%s257_s3 + $0x10] sm:$0xff] %v78_v31  ;;  %95 = vst [vmem:[%s257_s3 + $0x18] sm:$0xff] %v79_v32  ;;  %v48_v45 = vmul.f32 %v112_v1, %v25_v29  ;;  %v68_v46 = vadd.f32 %v143_v2, %v45_v40  ;;  %v49_v47 = vmul.f32 %v112_v1, %v26_v34 }
   0xb   :  { %96 = vst [vmem:[%s257_s3 + $0x20] sm:$0xff] %v80_v37  ;;  %97 = vst [vmem:[%s257_s3 + $0x28] sm:$0xff] %v81_v38  ;;  %v50_v48 = vmul.f32 %v112_v1, %v27_v35  ;;  %v51_v49 = vmul.f32 %v112_v1, %v28_v36  ;;  %v69_v50 = vadd.f32 %v143_v2, %v46_v43 }
   0xc   :  { %98 = vst [vmem:[%s257_s3 + $0x30] sm:$0xff] %v82_v39  ;;  %99 = vst [vmem:[%s257_s3 + $0x38] sm:$0xff] %v83_v42  ;;  %v70_v51 = vadd.f32 %v143_v2, %v47_v44  ;;  %v71_v52 = vadd.f32 %v143_v2, %v48_v45  ;;  %v52_v53 = vmul.f32 %v112_v1, %v29_v41  ;;  %v84_v54 = vmax.f32 %v68_v46, 0.0 }
   0xd   :  { %v72_v55 = vadd.f32 %v143_v2, %v49_v47  ;;  %v73_v56 = vadd.f32 %v143_v2, %v50_v48  ;;  %v74_v57 = vadd.f32 %v143_v2, %v51_v49  ;;  %v85_v58 = vmax.f32 %v69_v50, 0.0 }
   0xe   :  { %v86_v59 = vmax.f32 %v70_v51, 0.0  ;;  %v87_v60 = vmax.f32 %v71_v52, 0.0  ;;  %v75_v61 = vadd.f32 %v143_v2, %v52_v53  ;;  %100 = vst [vmem:[%s257_s3 + $0x40] sm:$0xff] %v84_v54 }
   0xf   :  { %v88_v62 = vmax.f32 %v72_v55, 0.0  ;;  %v89_v63 = vmax.f32 %v73_v56, 0.0  ;;  %v90_v0 = vmax.f32 %v74_v57, 0.0  ;;  %101 = vst [vmem:[%s257_s3 + $0x48] sm:$0xff] %v85_v58 }
  0x10   :  { %102 = vst [vmem:[%s257_s3 + $0x50] sm:$0xff] %v86_v59  ;;  %103 = vst [vmem:[%s257_s3 + $0x58] sm:$0xff] %v87_v60  ;;  %v91_v1 = vmax.f32 %v75_v61, 0.0 }
  0x11   :  { %104 = vst [vmem:[%s257_s3 + $0x60] sm:$0xff] %v88_v62  ;;  %105 = vst [vmem:[%s257_s3 + $0x68] sm:$0xff] %v89_v63 }
  0x12   :  { %106 = vst [vmem:[%s257_s3 + $0x70] sm:$0xff] %v90_v0  ;;  %107 = vst [vmem:[%s257_s3 + $0x78] sm:$0xff] %v91_v1 }

// kernel: double_conv_forward.3
= control target key start
LH: loop header
LB: loop body
LE: loop exit
PB: predicated region body
PF: predicated region fallthrough
CT: control target
= control target key end

     0   :  { %s3147_s18 = smov 0   ;;  %s4629_s0 = inlined_call_operand.vmem [shape: bf16[2,16,16,4], index: 0, kind: input, shape index: {}]   ;;  %s4630_s1 = inlined_call_operand.vmem [shape: bf16[36,32], index: 1, kind: input, shape index: {}]   ;;  %s4631_s2 = inlined_call_operand.vmem [shape: f32[1,32], index: 2, kind: input, shape index: {}]   ;;  %s4632_s3 = inlined_call_operand.vmem [shape: f32[2,16,16,32], index: 3, kind: output, shape index: {0}]   ;;  %s4633_s4 = inlined_call_operand.vmem [shape: f32[1,32], index: 4, kind: output, shape index: {1}]   ;;  %s4634_s5 = inlined_call_operand.vmem [shape: f32[1,32], index: 5, kind: output, shape index: {2}]  }
   0x1 LB: > { %s2236_s19 = sadd.s32 4294967295, %s3106_s18   ;;  %p2240_p0 = scmp.ge.s32.totalorder %s3106_s18, 1  ;;  %s3106_s18 = sphi %s3147_s18, %s16_s18  }
   0x2   : > { %p182_p1 = scmp.lt.s32.totalorder %s3106_s18, 3 }
   0x4   : > { %p183_p2 = pnand %p2240_p0, %p182_p1 }
   0x6   : > { %186 = sbr.rel (%p183_p2) target bundleno = 663 (0x297), region = 32 }
   0xb   : > { %p210_p3 = scmp.lt.s32.totalorder %s2236_s19, 1  ;;  %p2245_p4 = scmp.ne.s32.totalorder %s2236_s19, 0 }
   0xd   : > { %s211_s20 = scalar_select %p210_p3, %s2236_s19, 1 }
   0xe   : > { %224 = sbr.rel (%p2245_p4) target bundleno = 48 (0x30), region = 36 }
   0xf   : > { %s2268_s21 = sshll.u32 %s211_s20, 7  ;;  %s2269_s22 = sshll.u32 %s211_s20, 8 }
  0x10   : > { %s3158_s25 = scalar_lea.vmem %s4629_s0, %s2268_s21  ;;  %s3163_s28 = scalar_lea.vmem %s4632_s3, %s2269_s22 }
  0x13   : > { %vm225_vm0 = vcmask 31744   ;;  %vm228_vm1 = vcmask 25600   ;;  %vm281_vm2 = vcmask 253952   ;;  %v3108_v0 = vmov 0.0  }
  0x14   : > { %226 = vst.msk [vmem:[#allocation2] sm:$0xff] %vm225_vm0, %v3108_v0  ;;  %227 = vst.msk [vmem:[#allocation2 + $0x8] sm:$0xff] %vm225_vm0, %v3108_v0 }
  0x15   : > { %230 = vst.msk [vmem:[#allocation2 + $0x18] sm:$0xff] %vm225_vm0, %v3108_v0  ;;  %231 = vst.msk [vmem:[#allocation2 + $0x20] sm:$0xff] %vm225_vm0, %v3108_v0 }
  0x16   : > { %233 = vst.msk [vmem:[#allocation2 + $0x30] sm:$0xff] %vm225_vm0, %v3108_v0  ;;  %234 = vst.msk [vmem:[#allocation2 + $0x38] sm:$0xff] %vm225_vm0, %v3108_v0 }
  0x17   : > { %236 = vst.msk [vmem:[#allocation2 + $0x48] sm:$0xff] %vm225_vm0, %v3108_v0  ;;  %237 = vst.msk [vmem:[#allocation2 + $0x50] sm:$0xff] %vm225_vm0, %v3108_v0 }
  0x18   : > { %239 = vst.msk [vmem:[#allocation2 + $0x60] sm:$0xff] %vm225_vm0, %v3108_v0  ;;  %240 = vst.msk [vmem:[#allocation2 + $0x68] sm:$0xff] %vm225_vm0, %v3108_v0 }
  0x19   : > { %242 = vst.msk [vmem:[#allocation2 + $0x78] sm:$0xff] %vm225_vm0, %v3108_v0  ;;  %243 = vst.msk [vmem:[#allocation2 + $0x80] sm:$0xff] %vm225_vm0, %v3108_v0 }
  0x1a   : > { %245 = vst.msk [vmem:[#allocation2 + $0x90] sm:$0xff] %vm225_vm0, %v3108_v0  ;;  %246 = vst.msk [vmem:[#allocation2 + $0x98] sm:$0xff] %vm225_vm0, %v3108_v0 }
  0x1b   : > { %248 = vst.msk [vmem:[#allocation2 + $0xa8] sm:$0xff] %vm225_vm0, %v3108_v0  ;;  %249 = vst.msk [vmem:[#allocation2 + $0xb0] sm:$0xff] %vm225_vm0, %v3108_v0 }
  0x1c   : > { %251 = vst.msk [vmem:[#allocation2 + $0xc0] sm:$0xff] %vm225_vm0, %v3108_v0  ;;  %252 = vst.msk [vmem:[#allocation2 + $0xc8] sm:$0xff] %vm225_vm0, %v3108_v0 }
  0x1d   : > { %254 = vst.msk [vmem:[#allocation2 + $0xd8] sm:$0xff] %vm225_vm0, %v3108_v0  ;;  %255 = vst.msk [vmem:[#allocation2 + $0xe0] sm:$0xff] %vm225_vm0, %v3108_v0 }
  0x1e   : > { %257 = vst.msk [vmem:[#allocation2 + $0xf0] sm:$0xff] %vm225_vm0, %v3108_v0  ;;  %258 = vst.msk [vmem:[#allocation2 + $0xf8] sm:$0xff] %vm225_vm0, %v3108_v0 }
  0x1f   : > { %260 = vst.msk [vmem:[#allocation2 + $0x108] sm:$0xff] %vm225_vm0, %v3108_v0  ;;  %261 = vst.msk [vmem:[#allocation2 + $0x110] sm:$0xff] %vm225_vm0, %v3108_v0 }
  0x20   : > { %263 = vst.msk [vmem:[#allocation2 + $0x120] sm:$0xff] %vm225_vm0, %v3108_v0  ;;  %264 = vst.msk [vmem:[#allocation2 + $0x128] sm:$0xff] %vm225_vm0, %v3108_v0 }
  0x21   : > { %266 = vst.msk [vmem:[#allocation2 + $0x138] sm:$0xff] %vm225_vm0, %v3108_v0  ;;  %267 = vst.msk [vmem:[#allocation2 + $0x140] sm:$0xff] %vm225_vm0, %v3108_v0 }
  0x22   : > { %269 = vst.msk [vmem:[#allocation2 + $0x150] sm:$0xff] %vm225_vm0, %v3108_v0  ;;  %270 = vst.msk [vmem:[#allocation2 + $0x158] sm:$0xff] %vm225_vm0, %v3108_v0 }
  0x23   : > { %272 = vst.msk [vmem:[#allocation2 + $0x168] sm:$0xff] %vm225_vm0, %v3108_v0  ;;  %273 = vst.msk [vmem:[#allocation2 + $0x170] sm:$0xff] %vm225_vm0, %v3108_v0 }
  0x24   : > { %275 = vst.msk [vmem:[#allocation2 + $0x180] sm:$0xff] %vm225_vm0, %v3108_v0  ;;  %276 = vst.msk [vmem:[#allocation2 + $0x188] sm:$0xff] %vm225_vm0, %v3108_v0 }
  0x25   : > { %278 = vst.msk [vmem:[#allocation2 + $0x198] sm:$0xff] %vm225_vm0, %v3108_v0  ;;  %279 = vst.msk [vmem:[#allocation2 + $0x1a0] sm:$0xff] %vm225_vm0, %v3108_v0 }
  0x26   : > { %229 = vst.msk [vmem:[#allocation2 + $0x10] sm:$0x3] %vm228_vm1, %v3108_v0  ;;  %232 = vst.msk [vmem:[#allocation2 + $0x28] sm:$0x3] %vm228_vm1, %v3108_v0 }
  0x27   : > { %235 = vst.msk [vmem:[#allocation2 + $0x40] sm:$0x3] %vm228_vm1, %v3108_v0  ;;  %238 = vst.msk [vmem:[#allocation2 + $0x58] sm:$0x3] %vm228_vm1, %v3108_v0 }
  0x28   : > { %241 = vst.msk [vmem:[#allocation2 + $0x70] sm:$0x3] %vm228_vm1, %v3108_v0  ;;  %244 = vst.msk [vmem:[#allocation2 + $0x88] sm:$0x3] %vm228_vm1, %v3108_v0 }
  0x29   : > { %247 = vst.msk [vmem:[#allocation2 + $0xa0] sm:$0x3] %vm228_vm1, %v3108_v0  ;;  %250 = vst.msk [vmem:[#allocation2 + $0xb8] sm:$0x3] %vm228_vm1, %v3108_v0 }
  0x2a   : > { %253 = vst.msk [vmem:[#allocation2 + $0xd0] sm:$0x3] %vm228_vm1, %v3108_v0  ;;  %256 = vst.msk [vmem:[#allocation2 + $0xe8] sm:$0x3] %vm228_vm1, %v3108_v0 }
  0x2b   : > { %259 = vst.msk [vmem:[#allocation2 + $0x100] sm:$0x3] %vm228_vm1, %v3108_v0  ;;  %262 = vst.msk [vmem:[#allocation2 + $0x118] sm:$0x3] %vm228_vm1, %v3108_v0 }
  0x2c   : > { %265 = vst.msk [vmem:[#allocation2 + $0x130] sm:$0x3] %vm228_vm1, %v3108_v0  ;;  %268 = vst.msk [vmem:[#allocation2 + $0x148] sm:$0x3] %vm228_vm1, %v3108_v0 }
  0x2d   : > { %271 = vst.msk [vmem:[#allocation2 + $0x160] sm:$0x3] %vm228_vm1, %v3108_v0  ;;  %274 = vst.msk [vmem:[#allocation2 + $0x178] sm:$0x3] %vm228_vm1, %v3108_v0 }
  0x2e   : > { %277 = vst.msk [vmem:[#allocation2 + $0x190] sm:$0x3] %vm228_vm1, %v3108_v0  ;;  %280 = vst.msk [vmem:[#allocation2 + $0x1a8] sm:$0x3] %vm228_vm1, %v3108_v0 }
  0x2f   : > { %282 = vst.msk [vmem:[%s4633_s4] sm:$0x1] %vm281_vm2, %v3108_v0  ;;  %283 = vst.msk [vmem:[%s4634_s5] sm:$0x1] %vm281_vm2, %v3108_v0 }
  0x30 PF: > { %v3227_v1 = vld [vmem:[#allocation2] sm:$0xff]  ;;  %v3229_v2 = vld [vmem:[#allocation2 + $0x8] sm:$0xff]  ;;  %v3231_v3 = vld [vmem:[#allocation2 + $0x10] sm:$0x3]  ;;  %vm484_vm3 = vcmask 1046528   ;;  %vm349_vm4 = vcmask 31744  }
  0x31   : > { %v485_v4 = vrot.slane %v3227_v1, 1  ;;  %v486_v5 = vrot.slane %v3229_v2, 1  ;;  %v488_v6 = vrot.slane %v3231_v3, 1  ;;  %v2334_v7 = vld [vmem:[%s3158_s25 + $0x8] sm:$0xff]   ;;  %v2271_v8 = vld [vmem:[%s3158_s25] sm:$0xff]   ;;  %v2335_v12 = vld [vmem:[%s3158_s25 + $0x10] sm:$0xff]  }
  0x32   : > { %v2276_v9 = vunpack.c.l.bf16 %v2334_v7  ;;  %v2277_v10 = vunpack.c.h.bf16 %v2334_v7  ;;  %v2272_v11 = vunpack.c.l.bf16 %v2271_v8  ;;  %v2336_v13 = vld [vmem:[%s3158_s25 + $0x18] sm:$0xff]   ;;  %v2337_v14 = vld [vmem:[%s3158_s25 + $0x20] sm:$0xff]   ;;  %v2273_v17 = vunpack.c.h.bf16 %v2271_v8  ;;  %v2338_v19 = vld [vmem:[%s3158_s25 + $0x28] sm:$0xff]   ;;  %s3109_s8 = smov 4   ;;  %s3110_s9 = smov 8  }
  0x33   : > { %v487_v15 = vsel %vm484_vm3, %v485_v4, %v486_v5  ;;  %v489_v16 = vsel %vm484_vm3, %v486_v5, %v488_v6  ;;  %v2280_v18 = vunpack.c.l.bf16 %v2335_v12  ;;  %v2339_v20 = vld [vmem:[%s3158_s25 + $0x30] sm:$0xff]   ;;  %v2340_v21 = vld [vmem:[%s3158_s25 + $0x38] sm:$0xff]   ;;  %v2281_v23 = vunpack.c.h.bf16 %v2335_v12  ;;  %v2341_v26 = vld [vmem:[%s3158_s25 + $0x40] sm:$0xff]   ;;  %s3111_s10 = smov 12   ;;  %s3112_s13 = smov 16  }
  0x34   : > { %v2431_v22 = vpack.i.bf16 %v489_v16, %v487_v15  ;;  %352 = vst.msk [vmem:[#allocation2 + $0x31] sm:$0xff] %vm349_vm4, %v2276_v9  ;;  %353 = vst.msk [vmem:[#allocation2 + $0x39] sm:$0xff] %vm349_vm4, %v2277_v10  ;;  %v2284_v24 = vunpack.c.l.bf16 %v2336_v13  ;;  %v2285_v25 = vunpack.c.h.bf16 %v2336_v13  ;;  %v2342_v27 = vld [vmem:[%s3158_s25 + $0x48] sm:$0xff]   ;;  %v2343_v28 = vld [vmem:[%s3158_s25 + $0x50] sm:$0xff]   ;;  %v2288_v29 = vunpack.c.l.bf16 %v2337_v14  ;;  %s3113_s16 = smov 20   ;;  %s3114_s20 = smov 24  }
  0x35   : > { %350 = vst.msk [vmem:[#allocation2 + $0x19] sm:$0xff] %vm349_vm4, %v2272_v11  ;;  %351 = vst.msk [vmem:[#allocation2 + $0x21] sm:$0xff] %vm349_vm4, %v2273_v17  ;;  %v2289_v30 = vunpack.c.h.bf16 %v2337_v14  ;;  %v2292_v31 = vunpack.c.l.bf16 %v2338_v19  ;;  %v2293_v32 = vunpack.c.h.bf16 %v2338_v19  ;;  %v2344_v33 = vld [vmem:[%s3158_s25 + $0x58] sm:$0xff]   ;;  %v2345_v34 = vld [vmem:[%s3158_s25 + $0x60] sm:$0xff]   ;;  %v2296_v36 = vunpack.c.l.bf16 %v2339_v20  ;;  %s3115_s21 = smov 28   ;;  %s3116_s22 = smov 32  }
  0x36   : > { %354 = vst.msk [vmem:[#allocation2 + $0x49] sm:$0xff] %vm349_vm4, %v2280_v18  ;;  %v2346_v35 = vld [vmem:[%s3158_s25 + $0x68] sm:$0xff]   ;;  %2432 = vrot.lane.b32.xlu0 %v2431_v22, %s3109_s8  ;;  %355 = vst.msk [vmem:[#allocation2 + $0x51] sm:$0xff] %vm349_vm4, %v2281_v23  ;;  %v2297_v37 = vunpack.c.h.bf16 %v2339_v20  ;;  %v2300_v38 = vunpack.c.l.bf16 %v2340_v21  ;;  %v2301_v39 = vunpack.c.h.bf16 %v2340_v21  ;;  %v2347_v40 = vld [vmem:[%s3158_s25 + $0x70] sm:$0xff]   ;;  %v2304_v41 = vunpack.c.l.bf16 %v2341_v26 }
  0x37   : > { %356 = vst.msk [vmem:[#allocation2 + $0x61] sm:$0xff] %vm349_vm4, %v2284_v24  ;;  %357 = vst.msk [vmem:[#allocation2 + $0x69] sm:$0xff] %vm349_vm4, %v2285_v25  ;;  %v2305_v42 = vunpack.c.h.bf16 %v2341_v26  ;;  %v2308_v43 = vunpack.c.l.bf16 %v2342_v27  ;;  %v2309_v44 = vunpack.c.h.bf16 %v2342_v27  ;;  %v2312_v45 = vunpack.c.l.bf16 %v2343_v28 }
  0x38   : > { %358 = vst.msk [vmem:[#allocation2 + $0x79] sm:$0xff] %vm349_vm4, %v2288_v29  ;;  %359 = vst.msk [vmem:[#allocation2 + $0x81] sm:$0xff] %vm349_vm4, %v2289_v30  ;;  %v2313_v46 = vunpack.c.h.bf16 %v2343_v28  ;;  %v2316_v47 = vunpack.c.l.bf16 %v2344_v33  ;;  %v2317_v48 = vunpack.c.h.bf16 %v2344_v33  ;;  %v2320_v49 = vunpack.c.l.bf16 %v2345_v34 }
  0x39   : > { %360 = vst.msk [vmem:[#allocation2 + $0x91] sm:$0xff] %vm349_vm4, %v2292_v31  ;;  %361 = vst.msk [vmem:[#allocation2 + $0x99] sm:$0xff] %vm349_vm4, %v2293_v32  ;;  %v2321_v50 = vunpack.c.h.bf16 %v2345_v34  ;;  %v2324_v51 = vunpack.c.l.bf16 %v2346_v35  ;;  %v2325_v52 = vunpack.c.h.bf16 %v2346_v35  ;;  %v2328_v53 = vunpack.c.l.bf16 %v2347_v40 }
  0x3a   : > { %362 = vst.msk [vmem:[#allocation2 + $0xa9] sm:$0xff] %vm349_vm4, %v2296_v36  ;;  %363 = vst.msk [vmem:[#allocation2 + $0xb1] sm:$0xff] %vm349_vm4, %v2297_v37  ;;  %v2329_v54 = vunpack.c.h.bf16 %v2347_v40  ;;  %vm565_vm5 = vcmask 1045504   ;;  %vm1795_vm6 = vcmask 1041408   ;;  %vm1472_vm7 = vcmask 64512  }
  0x3b   : > { %364 = vst.msk [vmem:[#allocation2 + $0xc1] sm:$0xff] %vm349_vm4, %v2300_v38  ;;  %365 = vst.msk [vmem:[#allocation2 + $0xc9] sm:$0xff] %vm349_vm4, %v2301_v39  ;;  %v3278_v55 = vld [vmem:[#allocation2 + $0x30] sm:$0xff]  ;;  %v3280_v56 = vld [vmem:[#allocation2 + $0x38] sm:$0xff]  ;;  %vm1505_vm8 = vcmask 97280   ;;  %vm1538_vm9 = vcmask 130048  }
  0x3c   : > { %366 = vst.msk [vmem:[#allocation2 + $0xd9] sm:$0xff] %vm349_vm4, %v2304_v41  ;;  %367 = vst.msk [vmem:[#allocation2 + $0xe1] sm:$0xff] %vm349_vm4, %v2305_v42  ;;  %v3282_v57 = vld [vmem:[#allocation2 + $0x40] sm:$0x3]  ;;  %v495_v59 = vrot.slane %v3278_v55, 1  ;;  %v496_v60 = vrot.slane %v3280_v56, 1 }
  0x3d   : > { %368 = vst.msk [vmem:[#allocation2 + $0xf1] sm:$0xff] %vm349_vm4, %v2308_v43  ;;  %369 = vst.msk [vmem:[#allocation2 + $0xf9] sm:$0xff] %vm349_vm4, %v2309_v44  ;;  %v498_v61 = vrot.slane %v3282_v57, 1  ;;  %v3292_v62 = vld [vmem:[#allocation2 + $0x18] sm:$0xff]  ;;  %v3294_v63 = vld [vmem:[#allocation2 + $0x20] sm:$0xff]  ;;  %vm1571_vm10 = vcmask 162816  }
  0x3e   : > { %370 = vst.msk [vmem:[#allocation2 + $0x109] sm:$0xff] %vm349_vm4, %v2312_v45  ;;  %371 = vst.msk [vmem:[#allocation2 + $0x111] sm:$0xff] %vm349_vm4, %v2313_v46  ;;  %v3298_v0 = vld [vmem:[#allocation2 + $0x28] sm:$0x3]  ;;  %v490_v4 = vrot.slane %v3292_v62, 1  ;;  %v491_v5 = vrot.slane %v3294_v63, 1  ;;  %v497_v8 = vsel %vm484_vm3, %v495_v59, %v496_v60 }
  0x3f   : > { %372 = vst.msk [vmem:[#allocation2 + $0x121] sm:$0xff] %vm349_vm4, %v2316_v47  ;;  %373 = vst.msk [vmem:[#allocation2 + $0x129] sm:$0xff] %vm349_vm4, %v2317_v48  ;;  %v3302_v6 = vld [vmem:[#allocation2 + $0x48] sm:$0xff]  ;;  %v3304_v7 = vld [vmem:[#allocation2 + $0x50] sm:$0xff]  ;;  %v499_v9 = vsel %vm484_vm3, %v496_v60, %v498_v61  ;;  %v493_v10 = vrot.slane %v3298_v0, 1  ;;  %vm1604_vm11 = vcmask 195584  }
  0x40   : > { %374 = vst.msk [vmem:[#allocation2 + $0x139] sm:$0xff] %vm349_vm4, %v2320_v49  ;;  %375 = vst.msk [vmem:[#allocation2 + $0x141] sm:$0xff] %vm349_vm4, %v2321_v50  ;;  %v3309_v11 = vld [vmem:[#allocation2 + $0x58] sm:$0x3]  ;;  %v500_v12 = vrot.slane %v3302_v6, 1  ;;  %v3312_v13 = vld [vmem:[#allocation2 + $0x60] sm:$0xff]  ;;  %v3316_v15 = vpack.i.bf16 %v499_v9, %v497_v8  ;;  %v492_v16 = vsel %vm484_vm3, %v490_v4, %v491_v5 }
  0x41   : > { %376 = vst.msk [vmem:[#allocation2 + $0x151] sm:$0xff] %vm349_vm4, %v2324_v51  ;;  %377 = vst.msk [vmem:[#allocation2 + $0x159] sm:$0xff] %vm349_vm4, %v2325_v52  ;;  %v3314_v14 = vld [vmem:[#allocation2 + $0x68] sm:$0xff]  ;;  %v501_v17 = vrot.slane %v3304_v7, 1  ;;  %v503_v18 = vrot.slane %v3309_v11, 1  ;;  %v3323_v20 = vld [vmem:[#allocation2 + $0x78] sm:$0xff]  ;;  %v494_v22 = vsel %vm484_vm3, %v491_v5, %v493_v10 }
  0x42   : > { %378 = vst.msk [vmem:[#allocation2 + $0x169] sm:$0xff] %vm349_vm4, %v2328_v53  ;;  %379 = vst.msk [vmem:[#allocation2 + $0x171] sm:$0xff] %vm349_vm4, %v2329_v54  ;;  %v3321_v19 = vld [vmem:[#allocation2 + $0x70] sm:$0x3]  ;;  %v3325_v21 = vld [vmem:[#allocation2 + $0x80] sm:$0xff]  ;;  %v505_v23 = vrot.slane %v3312_v13, 1  ;;  %2442 = vrot.lane.b32.xlu1 %v3316_v15, %s3109_s8  ;;  %v3337_v28 = vpack.i.bf16 %v494_v22, %v492_v16 }
  0x43   : > { %4678 = vst [vmem:[#allocation3_spill] sm:$0xff] %v3316_v15  ;;  %v506_v24 = vrot.slane %v3314_v14, 1  ;;  %v508_v25 = vrot.slane %v3321_v19, 1  ;;  %v3331_v26 = vld [vmem:[#allocation2 + $0x88] sm:$0x3]  ;;  %v3333_v27 = vld [vmem:[#allocation2 + $0x90] sm:$0xff]  ;;  %v502_v29 = vsel %vm484_vm3, %v500_v12, %v501_v17  ;;  %v504_v30 = vsel %vm484_vm3, %v501_v17, %v503_v18 }
  0x44   : > { %4679 = vst [vmem:[#allocation4_spill] sm:$0xff] %v3337_v28  ;;  %v510_v31 = vrot.slane %v3323_v20, 1  ;;  %v3342_v32 = vld [vmem:[#allocation2 + $0x98] sm:$0xff]  ;;  %v3344_v33 = vld [vmem:[#allocation2 + $0xa0] sm:$0x3]  ;;  %v3346_v34 = vld [vmem:[#allocation2 + $0xa8] sm:$0xff]  ;;  %v3348_v35 = vpack.i.bf16 %v504_v30, %v502_v29  ;;  %2437 = vrot.lane.b32.xlu0 %v3337_v28, %s3109_s8 }
  0x45   : > { %v507_v36 = vsel %vm484_vm3, %v505_v23, %v506_v24  ;;  %v509_v37 = vsel %vm484_vm3, %v506_v24, %v508_v25  ;;  %v511_v38 = vrot.slane %v3325_v21, 1  ;;  %v3353_v39 = vld [vmem:[#allocation2 + $0xb0] sm:$0xff]  ;;  %v3355_v40 = vld [vmem:[#allocation2 + $0xb8] sm:$0x3]  ;;  %v3357_v41 = vld [vmem:[#allocation2 + $0xc0] sm:$0xff]  ;;  %v513_v43 = vrot.slane %v3331_v26, 1 }
  0x46   : > { %4680 = vst [vmem:[#allocation5_spill] sm:$0xff] %v3348_v35  ;;  %v3361_v42 = vpack.i.bf16 %v509_v37, %v507_v36  ;;  %v515_v44 = vrot.slane %v3333_v27, 1  ;;  %v516_v45 = vrot.slane %v3342_v32, 1  ;;  %v3366_v46 = vld [vmem:[#allocation2 + $0xc8] sm:$0xff]  ;;  %v518_v48 = vrot.slane %v3344_v33, 1  ;;  %v3374_v52 = vld [vmem:[#allocation2 + $0xd8] sm:$0xff]  ;;  %2447 = vrot.lane.b32.xlu1 %v3348_v35, %s3109_s8 }
  0x47   : > { %v512_v47 = vsel %vm484_vm3, %v510_v31, %v511_v38  ;;  %v520_v49 = vrot.slane %v3346_v34, 1  ;;  %v521_v50 = vrot.slane %v3353_v39, 1  ;;  %v3372_v51 = vld [vmem:[#allocation2 + $0xd0] sm:$0x3]  ;;  %v514_v53 = vsel %vm484_vm3, %v511_v38, %v513_v43  ;;  %v3382_v61 = vld [vmem:[#allocation2 + $0xe0] sm:$0xff]  ;;  %v3393_v16 = vld [vmem:[#allocation2 + $0xf8] sm:$0xff] }
  0x48   : > { %4681 = vst [vmem:[#allocation6_spill] sm:$0xff] %v3361_v42  ;;  %v517_v54 = vsel %vm484_vm3, %v515_v44, %v516_v45  ;;  %v523_v59 = vrot.slane %v3355_v40, 1  ;;  %v525_v60 = vrot.slane %v3357_v41, 1  ;;  %v3384_v4 = vld [vmem:[#allocation2 + $0xe8] sm:$0x3]  ;;  %v3386_v5 = vpack.i.bf16 %v514_v53, %v512_v47  ;;  %v3391_v12 = vld [vmem:[#allocation2 + $0xf0] sm:$0xff]  ;;  %2452 = vrot.lane.b32.xlu0 %v3361_v42, %s3109_s8 }
  0x49   : > { %v519_v8 = vsel %vm484_vm3, %v516_v45, %v518_v48  ;;  %v522_v9 = vsel %vm484_vm3, %v520_v49, %v521_v50  ;;  %v526_v10 = vrot.slane %v3366_v46, 1  ;;  %v3395_v17 = vld [vmem:[#allocation2 + $0x100] sm:$0x3]  ;;  %v528_v23 = vrot.slane %v3372_v51, 1  ;;  %v3404_v25 = vld [vmem:[#allocation2 + $0x108] sm:$0xff]  ;;  %v3411_v37 = vld [vmem:[#allocation2 + $0x110] sm:$0xff] }
  0x4a   : > { %4682 = vst [vmem:[#allocation7_spill] sm:$0xff] %v3386_v5  ;;  %v3399_v18 = vpack.i.bf16 %v519_v8, %v517_v54  ;;  %v524_v22 = vsel %vm484_vm3, %v521_v50, %v523_v59  ;;  %v530_v24 = vrot.slane %v3374_v52, 1  ;;  %v531_v31 = vrot.slane %v3382_v61, 1  ;;  %v3413_v38 = vld [vmem:[#allocation2 + $0x118] sm:$0x3]  ;;  %2457 = vrot.lane.b32.xlu1 %v3386_v5, %s3109_s8  ;;  %v3421_v48 = vld [vmem:[#allocation2 + $0x120] sm:$0xff] }
  0x4b   : > { %v3406_v29 = vpack.i.bf16 %v524_v22, %v522_v9  ;;  %v527_v30 = vsel %vm484_vm3, %v525_v60, %v526_v10  ;;  %v533_v36 = vrot.slane %v3384_v4, 1  ;;  %v529_v43 = vsel %vm484_vm3, %v526_v10, %v528_v23  ;;  %4685 = vst [vmem:[#allocation10_spill] sm:$0xff] %v3421_v48  ;;  %v3423_v49 = vld [vmem:[#allocation2 + $0x128] sm:$0xff]  ;;  %v3428_v59 = vld [vmem:[#allocation2 + $0x130] sm:$0x3]  ;;  %v3430_v60 = vld [vmem:[#allocation2 + $0x138] sm:$0xff] }
  0x4c   : > { %4683 = vst [vmem:[#allocation8_spill] sm:$0xff] %v3399_v18  ;;  %v535_v44 = vrot.slane %v3391_v12, 1  ;;  %v536_v45 = vrot.slane %v3393_v16, 1  ;;  %v538_v47 = vrot.slane %v3395_v17, 1  ;;  %4686 = vst [vmem:[#allocation11_spill] sm:$0xff] %v3423_v49  ;;  %v532_v50 = vsel %vm484_vm3, %v530_v24, %v531_v31  ;;  %v3432_v8 = vld [vmem:[#allocation2 + $0x140] sm:$0xff]  ;;  %2462 = vrot.lane.b32.xlu0 %v3399_v18, %s3109_s8 }
  0x4d   : > { %4684 = vst [vmem:[#allocation9_spill] sm:$0xff] %v3406_v29  ;;  %v534_v53 = vsel %vm484_vm3, %v531_v31, %v533_v36  ;;  %v540_v54 = vrot.slane %v3404_v25, 1  ;;  %4687 = vst [vmem:[#allocation12_spill] sm:$0xff] %v3428_v59  ;;  %v3436_v9 = vpack.i.bf16 %v529_v43, %v527_v30  ;;  %v541_v22 = vrot.slane %v3411_v37, 1  ;;  %v3440_v23 = vld [vmem:[#allocation2 + $0x148] sm:$0x3] }
  0x4e   : > { %4688 = vst [vmem:[#allocation13_spill] sm:$0xff] %v3430_v60  ;;  %4689 = vst [vmem:[#allocation14_spill] sm:$0xff] %v3432_v8  ;;  %v537_v10 = vsel %vm484_vm3, %v535_v44, %v536_v45  ;;  %v566_v24 = vrot.slane %v3227_v1, 2  ;;  %v539_v31 = vsel %vm484_vm3, %v536_v45, %v538_v47  ;;  %v543_v36 = vrot.slane %v3413_v38, 1  ;;  %v3447_v42 = vld [vmem:[#allocation2 + $0x150] sm:$0xff]  ;;  %2467 = vrot.lane.b32.xlu1 %v3406_v29, %s3109_s8  ;;  %v3456_v45 = vld [vmem:[#allocation2 + $0x158] sm:$0xff] }
  0x4f   : > { %4690 = vst [vmem:[#allocation15_spill] sm:$0xff] %v3436_v9  ;;  %4691 = vst [vmem:[#allocation16_spill] sm:$0xff] %v3440_v23  ;;  %v545_v58 = vrot.slane %v3421_v48, 1  ;;  %v546_v5 = vrot.slane %v3423_v49, 1  ;;  %v3451_v30 = vpack.i.bf16 %v534_v53, %v532_v50  ;;  %v548_v43 = vrot.slane %v3428_v59, 1  ;;  %v3463_v28 = vld [vmem:[#allocation2 + $0x168] sm:$0xff] }
  0x50   : > { %v550_v44 = vrot.slane %v3430_v60, 1  ;;  %v551_v1 = vrot.slane %v3432_v8, 1  ;;  %v3458_v47 = vld [vmem:[#allocation2 + $0x160] sm:$0x3]  ;;  %v542_v18 = vsel %vm484_vm3, %v540_v54, %v541_v22  ;;  %v544_v35 = vsel %vm484_vm3, %v541_v22, %v543_v36  ;;  %v3465_v50 = vld [vmem:[#allocation2 + $0x170] sm:$0xff]  ;;  %2472 = vrot.lane.b32.xlu0 %v3436_v9, %s3109_s8 }
  0x51   : > { %4692 = vst [vmem:[#allocation17_spill] sm:$0xff] %v3451_v30  ;;  %v553_v15 = vrot.slane %v3440_v23, 1  ;;  %v3467_v53 = vld [vmem:[#allocation2 + $0x178] sm:$0x3]  ;;  %v567_v29 = vrot.slane %v3229_v2, 2  ;;  %v3472_v8 = vpack.i.bf16 %v539_v31, %v537_v10  ;;  %v547_v60 = vsel %vm484_vm3, %v545_v58, %v546_v5 }
  0x52   : > { %v549_v54 = vsel %vm484_vm3, %v546_v5, %v548_v43  ;;  %v555_v22 = vrot.slane %v3447_v42, 1  ;;  %v552_v36 = vsel %vm484_vm3, %v550_v44, %v551_v1  ;;  %v556_v59 = vrot.slane %v3456_v45, 1  ;;  %2477 = vrot.lane.b32.xlu1 %v3451_v30, %s3109_s8 }
  0x53   : > { %v554_v23 = vsel %vm484_vm3, %v551_v1, %v553_v15  ;;  %v558_v49 = vrot.slane %v3458_v47, 1  ;;  %v3483_v2 = vpack.i.bf16 %v544_v35, %v542_v18  ;;  %v560_v10 = vrot.slane %v3463_v28, 1 }
  0x54   : > { %v561_v58 = vrot.slane %v3465_v50, 1  ;;  %v563_v5 = vrot.slane %v3467_v53, 1  ;;  %v579_v31 = vrot.slane %v3282_v57, 2  ;;  %2482 = vrot.lane.b32.xlu0 %v3472_v8, %s3109_s8  ;;  %v3491_v15 = vpack.i.bf16 %v549_v54, %v547_v60 }
  0x55   : > { %4693 = vst [vmem:[#allocation18_spill] sm:$0xff] %v3483_v2  ;;  %v3493_v43 = vpack.i.bf16 %v554_v23, %v552_v36  ;;  %v568_v44 = vsel %vm565_vm5, %v566_v24, %v567_v29  ;;  %v4696_v35 = vrot.slane %v3231_v3, 2  ;;  %v557_v1 = vsel %vm484_vm3, %v555_v22, %v556_v59 }
  0x56   : > { %4694 = vst [vmem:[#allocation19_spill] sm:$0xff] %v3491_v15  ;;  %v559_v30 = vsel %vm484_vm3, %v556_v59, %v558_v49  ;;  %v571_v9 = vrot.slane %v3292_v62, 2  ;;  %v572_v57 = vrot.slane %v3294_v63, 2  ;;  %2487 = vrot.lane.b32.xlu1 %v3483_v2, %s3109_s8  ;;  %v562_v60 = vsel %vm484_vm3, %v560_v10, %v561_v58 }
  0x57   : > { %4695 = vst [vmem:[#allocation20_spill] sm:$0xff] %v3493_v43  ;;  %v570_v18 = vsel %vm565_vm5, %v567_v29, %v4696_v35  ;;  %v564_v23 = vsel %vm484_vm3, %v561_v58, %v563_v5  ;;  %v574_v24 = vrot.slane %v3298_v0, 2  ;;  %v576_v3 = vrot.slane %v3278_v55, 2 }
  0x58   : > { %v577_v29 = vrot.slane %v3280_v56, 2  ;;  %v581_v54 = vrot.slane %v3302_v6, 2  ;;  %v582_v49 = vrot.slane %v3304_v7, 2  ;;  %v584_v59 = vrot.slane %v3309_v11, 2  ;;  %2492 = vrot.lane.b32.xlu0 %v3491_v15, %s3109_s8 }
  0x59   : > { %v3515_v22 = vpack.i.bf16 %v559_v30, %v557_v1  ;;  %v586_v36 = vrot.slane %v3312_v13, 2  ;;  %v587_v10 = vrot.slane %v3314_v14, 2  ;;  %v589_v0 = vrot.slane %v3321_v19, 2 }
  0x5a   : > { %2497 = vrot.lane.b32.xlu1 %v3493_v43, %s3109_s8  ;;  %v3522_v58 = vpack.i.bf16 %v564_v23, %v562_v60  ;;  %v2511_v5 = vpack.i.bf16 %v570_v18, %v568_v44  ;;  %v573_v35 = vsel %vm565_vm5, %v571_v9, %v572_v57  ;;  %v575_v11 = vsel %vm565_vm5, %v572_v57, %v574_v24 }
  0x5b   : > { %4697 = vst [vmem:[#allocation21_spill] sm:$0xff] %v3515_v22  ;;  %v578_v15 = vsel %vm565_vm5, %v576_v3, %v577_v29  ;;  %v580_v30 = vsel %vm565_vm5, %v577_v29, %v579_v31  ;;  %v583_v1 = vsel %vm565_vm5, %v581_v54, %v582_v49  ;;  %v585_v2 = vsel %vm565_vm5, %v582_v49, %v584_v59 }
  0x5c   : > { %4698 = vst [vmem:[#allocation22_spill] sm:$0xff] %v3522_v58  ;;  %2502 = vrot.lane.b32.xlu0 %v3515_v22, %s3109_s8  ;;  %v588_v19 = vsel %vm565_vm5, %v586_v36, %v587_v10  ;;  %v591_v60 = vrot.slane %v3323_v20, 2  ;;  %v592_v44 = vrot.slane %v3325_v21, 2  ;;  %v594_v9 = vrot.slane %v3331_v26, 2 }
  0x5d   : > { %v590_v18 = vsel %vm565_vm5, %v587_v10, %v589_v0  ;;  %v596_v57 = vrot.slane %v3333_v27, 2  ;;  %v597_v31 = vrot.slane %v3342_v32, 2  ;;  %v599_v23 = vrot.slane %v3344_v33, 2 }
  0x5e   : > { %2507 = vrot.lane.b32.xlu1 %v3522_v58, %s3109_s8  ;;  %v3542_v24 = vpack.i.bf16 %v575_v11, %v573_v35  ;;  %v3544_v3 = vpack.i.bf16 %v580_v30, %v578_v15  ;;  %v3547_v29 = vpack.i.bf16 %v585_v2, %v583_v1  ;;  %v3549_v26 = vpack.i.bf16 %v590_v18, %v588_v19  ;;  %v4699_v18 = vld [vmem:[#allocation11_spill] sm:$0xff] }
  0x5f   : > { %v593_v54 = vsel %vm565_vm5, %v591_v60, %v592_v44  ;;  %v601_v49 = vrot.slane %v3346_v34, 2  ;;  %v595_v33 = vsel %vm565_vm5, %v592_v44, %v594_v9  ;;  %v598_v59 = vsel %vm565_vm5, %v596_v57, %v597_v31 }
  0x60   : > { %2512 = vrot.lane.b32.xlu0 %v2511_v5, %s3110_s9  ;;  %v600_v36 = vsel %vm565_vm5, %v597_v31, %v599_v23  ;;  %v602_v15 = vrot.slane %v3353_v39, 2  ;;  %v604_v2 = vrot.slane %v3355_v40, 2  ;;  %v606_v10 = vrot.slane %v3357_v41, 2 }
  0x61   : > { %v607_v0 = vrot.slane %v3366_v46, 2  ;;  %v609_v5 = vrot.slane %v3372_v51, 2  ;;  %v611_v35 = vrot.slane %v3374_v52, 2  ;;  %v612_v11 = vrot.slane %v3382_v61, 2 }
  0x62   : > { %2517 = vrot.lane.b32.xlu1 %v3542_v24, %s3110_s9  ;;  %v614_v30 = vrot.slane %v3384_v4, 2  ;;  %v616_v1 = vrot.slane %v3391_v12, 2  ;;  %v617_v19 = vrot.slane %v3393_v16, 2  ;;  %v619_v40 = vrot.slane %v3395_v17, 2  ;;  %v4700_v4 = vld [vmem:[#allocation12_spill] sm:$0xff] }
  0x63   : > { %v621_v60 = vrot.slane %v3404_v25, 2  ;;  %v622_v44 = vrot.slane %v3411_v37, 2  ;;  %v624_v51 = vrot.slane %v3413_v38, 2  ;;  %v626_v9 = vrot.slane %v3421_v48, 2 }
  0x64   : > { %2522 = vrot.lane.b32.xlu0 %v3544_v3, %s3110_s9  ;;  %v627_v57 = vrot.slane %v4699_v18, 2  ;;  %v629_v31 = vrot.slane %v4700_v4, 2  ;;  %v3579_v23 = vpack.i.bf16 %v595_v33, %v593_v54  ;;  %v3581_v58 = vpack.i.bf16 %v600_v36, %v598_v59 }
  0x65   : > { %v603_v17 = vsel %vm565_vm5, %v601_v49, %v602_v15  ;;  %v605_v22 = vsel %vm565_vm5, %v602_v15, %v604_v2  ;;  %v608_v43 = vsel %vm565_vm5, %v606_v10, %v607_v0  ;;  %v610_v38 = vsel %vm565_vm5, %v607_v0, %v609_v5  ;;  %v4701_v49 = vld [vmem:[#allocation13_spill] sm:$0xff]  ;;  %v4702_v0 = vld [vmem:[#allocation14_spill] sm:$0xff] }
  0x66   : > { %2527 = vrot.lane.b32.xlu1 %v3547_v29, %s3110_s9  ;;  %v613_v48 = vsel %vm565_vm5, %v611_v35, %v612_v11  ;;  %v615_v18 = vsel %vm565_vm5, %v612_v11, %v614_v30  ;;  %v618_v54 = vsel %vm565_vm5, %v616_v1, %v617_v19  ;;  %v620_v33 = vsel %vm565_vm5, %v617_v19, %v619_v40  ;;  %v4703_v11 = vld [vmem:[#allocation16_spill] sm:$0xff] }
  0x67   : > { %v623_v59 = vsel %vm565_vm5, %v621_v60, %v622_v44  ;;  %v631_v36 = vrot.slane %v4701_v49, 2  ;;  %v625_v15 = vsel %vm565_vm5, %v622_v44, %v624_v51  ;;  %v628_v2 = vsel %vm565_vm5, %v626_v9, %v627_v57 }
  0x68   : > { %2532 = vrot.lane.b32.xlu0 %v3549_v26, %s3110_s9  ;;  %v630_v10 = vsel %vm565_vm5, %v627_v57, %v629_v31  ;;  %v632_v5 = vrot.slane %v4702_v0, 2  ;;  %v3601_v35 = vpack.i.bf16 %v605_v22, %v603_v17  ;;  %v634_v30 = vrot.slane %v4703_v11, 2  ;;  %v4708_v11 = vld [vmem:[#allocation7_spill] sm:$0xff] }
  0x69   : > { %v3604_v1 = vpack.i.bf16 %v610_v38, %v608_v43  ;;  %v3606_v19 = vpack.i.bf16 %v615_v18, %v613_v48  ;;  %v3610_v40 = vpack.i.bf16 %v620_v33, %v618_v54  ;;  %v3612_v60 = vpack.i.bf16 %v625_v15, %v623_v59 }
  0x6a   : > { %2537 = vrot.lane.b32.xlu1 %v3579_v23, %s3110_s9  ;;  %v3614_v44 = vpack.i.bf16 %v630_v10, %v628_v2  ;;  %v636_v51 = vrot.slane %v3447_v42, 2  ;;  %v633_v22 = vsel %vm565_vm5, %v631_v36, %v632_v5  ;;  %v637_v9 = vrot.slane %v3456_v45, 2 }
  0x6b   : > { %v635_v48 = vsel %vm565_vm5, %v632_v5, %v634_v30  ;;  %v639_v43 = vrot.slane %v3458_v47, 2  ;;  %v641_v18 = vrot.slane %v3463_v28, 2  ;;  %v642_v57 = vrot.slane %v3465_v50, 2 }
  0x6c   : > { %2542 = vrot.lane.b32.xlu0 %v3581_v58, %s3110_s9  ;;  %v644_v4 = vrot.slane %v3467_v53, 2  ;;  %v3630_v31 = vpack.i.bf16 %v635_v48, %v633_v22  ;;  %v638_v17 = vsel %vm565_vm5, %v636_v51, %v637_v9  ;;  %v2591_v59 = vpack.i.bf16 %v3294_v63, %v3292_v62 }
  0x6d   : > { %v640_v47 = vsel %vm565_vm5, %v637_v9, %v639_v43  ;;  %v643_v38 = vsel %vm565_vm5, %v641_v18, %v642_v57  ;;  %v2596_v36 = vpack.i.bf16 %v3280_v56, %v3278_v55  ;;  %v2601_v15 = vpack.i.bf16 %v3304_v7, %v3302_v6  ;;  %v4709_v9 = vld [vmem:[#allocation8_spill] sm:$0xff] }
  0x6e   : > { %2547 = vrot.lane.b32.xlu1 %v3601_v35, %s3110_s9  ;;  %v645_v54 = vsel %vm565_vm5, %v642_v57, %v644_v4  ;;  %v3642_v53 = vpack.i.bf16 %v640_v47, %v638_v17  ;;  %v2606_v2 = vpack.i.bf16 %v3314_v14, %v3312_v13  ;;  %v2611_v62 = vpack.i.bf16 %v3325_v21, %v3323_v20  ;;  %v3071_v13 = vld [vmem:[%s4630_s1 + $0x10] ss:$0 sps:$4 sm:$0x33]   ;;  %v4704_v14 = vld [vmem:[#allocation4_spill] sm:$0xff]  ;;  %v4712_v4 = vld [vmem:[#allocation9_spill] sm:$0xff] }
  0x6f   : > { %v3646_v33 = vpack.i.bf16 %v645_v54, %v643_v38  ;;  %v3668_v55 = vpack.i.bf16 %v3342_v32, %v3333_v27  ;;  %v3673_v56 = vpack.i.bf16 %v3353_v39, %v3346_v34  ;;  %v3679_v63 = vpack.i.bf16 %v3366_v46, %v3357_v41  ;;  %2412 = vmatprep.subr.msk.bf16.mxu0 %vm1795_vm6, %v3071_v13  ;;  %v4705_v21 = vld [vmem:[#allocation3_spill] sm:$0xff]  ;;  %v3072_v27 = vld [vmem:[%s4630_s1 + $0x8] sm:$0xff]   ;;  %v3073_v32 = vld [vmem:[%s4630_s1] sm:$0xff]  }
  0x70   : > { %2552 = vrot.lane.b32.xlu0 %v3604_v1, %s3110_s9  ;;  %v3685_v6 = vpack.i.bf16 %v3382_v61, %v3374_v52  ;;  %v3691_v7 = vpack.i.bf16 %v3393_v16, %v3391_v12  ;;  %v1797_v20 = vsel %vm1795_vm6, %v3071_v13, 0  ;;  %2413 = vmatprep.subr.msk.bf16.mxu1 %vm1795_vm6, %v3071_v13  ;;  %v2348_v34 = vld [vmem:[%s3158_s25 + $0x78] sm:$0xff]   ;;  %v4706_v16 = vld [vmem:[#allocation5_spill] sm:$0xff]  ;;  %vm1637_vm12 = vcmask 228352  }
  0x71   : > { %2369 = vmatpush3.bf16.msra.mxu0 %v1797_v20  ;;  %2409 = vmatpush3.bf16.msra.mxu1 %v1797_v20  ;;  %v2332_v39 = vunpack.c.l.bf16 %v2348_v34  ;;  %v2333_v12 = vunpack.c.h.bf16 %v2348_v34  ;;  %v2866_v20 = vpack.i.bf16 %v3411_v37, %v3404_v25  ;;  %vm1670_vm13 = vcmask 261120  }
  0x72   : > { %2557 = vrot.lane.b32.xlu1 %v3606_v19, %s3110_s9  ;;  %2370 = vmatprep.subr.bf16.mxu0 %v3072_v27  ;;  %vm1746_vm14 = vcmask 293888   ;;  %vm2063_vm15 = vcmask 253952  }
  0x73   : > { %2407 = vmatprep.subr.bf16.mxu1 %v3072_v27  ;;  %380 = vst.msk [vmem:[#allocation2 + $0x181] sm:$0xff] %vm349_vm4, %v2332_v39  ;;  %381 = vst.msk [vmem:[#allocation2 + $0x189] sm:$0xff] %vm349_vm4, %v2333_v12 }
  0x74   : > { %2562 = vrot.lane.b32.xlu0 %v3610_v40, %s3110_s9 }
  0x75   : > { %2371 = vmatpush3.bf16.msra.mxu0 %v3072_v27  ;;  %2410 = vmatpush3.bf16.msra.mxu1 %v3072_v27 }
  0x76   : > { %2567 = vrot.lane.b32.xlu1 %v3612_v60, %s3110_s9  ;;  %2372 = vmatprep.subr.bf16.mxu0 %v3073_v32 }
  0x77   : > { %2408 = vmatprep.subr.bf16.mxu1 %v3073_v32 }
  0x78   : > { %2572 = vrot.lane.b32.xlu0 %v3614_v44, %s3110_s9 }
  0x79   : > { %2373 = vmatpush3.bf16.msra.mxu0 %v3073_v32  ;;  %2411 = vmatpush3.bf16.msra.mxu1 %v3073_v32 }
  0x7a   : > { %2577 = vrot.lane.b32.xlu1 %v3630_v31, %s3110_s9 }
  0x7c   : > { %2582 = vrot.lane.b32.xlu0 %v3642_v53, %s3110_s9 }
  0x7e   : > { %2587 = vrot.lane.b32.xlu1 %v3646_v33, %s3110_s9 }
  0x80   : > { %2592 = vrot.lane.b32.xlu0 %v2591_v59, %s3111_s10  ;;  %v4714_v59 = vld [vmem:[#allocation15_spill] sm:$0xff] }
  0x82   : > { %2597 = vrot.lane.b32.xlu1 %v2596_v36, %s3111_s10 }
  0x84   : > { %2602 = vrot.lane.b32.xlu0 %v2601_v15, %s3111_s10 }
  0x86   : > { %2607 = vrot.lane.b32.xlu1 %v2606_v2, %s3111_s10 }
  0x88   : > { %2612 = vrot.lane.b32.xlu0 %v2611_v62, %s3111_s10 }
  0x8a   : > { %2617 = vrot.lane.b32.xlu1 %v3668_v55, %s3111_s10 }
  0x8c   : > { %2622 = vrot.lane.b32.xlu0 %v3673_v56, %s3111_s10 }
  0x8e   : > { %2627 = vrot.lane.b32.xlu1 %v3679_v63, %s3111_s10 }
  0x90   : > { %2632 = vrot.lane.b32.xlu0 %v3685_v6, %s3111_s10 }
  0x92   : > { %2637 = vrot.lane.b32.xlu1 %v3691_v7, %s3111_s10 }
  0x94   : > { %2642 = vrot.lane.b32.xlu0 %v4704_v14, %s3112_s13 }
  0x96   : > { %2647 = vrot.lane.b32.xlu1 %v4705_v21, %s3112_s13 }
  0x98   : > { %2652 = vrot.lane.b32.xlu0 %v3542_v24, %s3113_s16  ;;  %v4707_v24 = vld [vmem:[#allocation6_spill] sm:$0xff] }
  0x9a   : > { %2657 = vrot.lane.b32.xlu1 %v3544_v3, %s3113_s16 }
  0x9c   : > { %2662 = vrot.lane.b32.xlu0 %v2596_v36, %s3114_s20 }
  0x9e   : > { %2667 = vrot.lane.b32.xlu1 %v2601_v15, %s3114_s20 }
  0xa0   : > { %2672 = vrot.lane.b32.xlu0 %v4705_v21, %s3115_s21 }
  0xa2   : > { %2677 = vrot.lane.b32.xlu1 %v4706_v16, %s3115_s21 }
  0xa4   : > { %2682 = vrot.lane.b32.xlu0 %v3544_v3, %s3116_s22 }
  0xa6   : > { %2687 = vrot.lane.b32.xlu1 %v3547_v29, %s3116_s22 }
  0xa8   : > { %2692 = vrot.lane.b32.xlu0 %v4706_v16, %s3112_s13  ;;  %v3736_v10 = vpop.permute.xlu0 %2432 }
  0xaa   : > { %2697 = vrot.lane.b32.xlu1 %v4707_v24, %s3112_s13 }
  0xac   : > { %2702 = vrot.lane.b32.xlu0 %v3547_v29, %s3113_s16 }
  0xae   : > { %2707 = vrot.lane.b32.xlu1 %v3549_v26, %s3113_s16 }
  0xb0   : > { %2712 = vrot.lane.b32.xlu0 %v2606_v2, %s3114_s20 }
  0xb2   : > { %2717 = vrot.lane.b32.xlu1 %v2611_v62, %s3114_s20 }
  0xb4   : > { %2722 = vrot.lane.b32.xlu0 %v4707_v24, %s3115_s21  ;;  %v3741_v3 = vpop.permute.xlu1 %2442 }
  0xb6   : > { %v3743_v5 = vpop.permute.xlu0 %2437  ;;  %2727 = vrot.lane.b32.xlu1 %v4708_v11, %s3115_s21 }
  0xb8   : > { %2732 = vrot.lane.b32.xlu0 %v3549_v26, %s3116_s22  ;;  %v3749_v29 = vpop.permute.xlu1 %2447 }
  0xba   : > { %v3751_v30 = vpop.permute.xlu0 %2452  ;;  %2737 = vrot.lane.b32.xlu1 %v3579_v23, %s3116_s22 }
  0xbc   : > { %2742 = vrot.lane.b32.xlu0 %v4708_v11, %s3112_s13  ;;  %v3757_v51 = vpop.permute.xlu1 %2457 }
  0xbe   : > { %v3759_v22 = vpop.permute.xlu0 %2462  ;;  %2747 = vrot.lane.b32.xlu1 %v4709_v9, %s3112_s13 }
  0xc0   : > { %2752 = vrot.lane.b32.xlu0 %v3579_v23, %s3113_s16  ;;  %v3765_v26 = vpop.permute.xlu1 %2467 }
  0xc2   : > { %v3767_v48 = vpop.permute.xlu0 %2472  ;;  %2757 = vrot.lane.b32.xlu1 %v3581_v58, %s3113_s16 }
  0xc4   : > { %2762 = vrot.lane.b32.xlu0 %v3668_v55, %s3114_s20  ;;  %v3773_v43 = vpop.permute.xlu1 %2477  ;;  %v4715_v55 = vld [vmem:[#allocation17_spill] sm:$0xff] }
  0xc6   : > { %v3775_v18 = vpop.permute.xlu0 %2482  ;;  %2767 = vrot.lane.b32.xlu1 %v3673_v56, %s3114_s20 }
  0xc8   : > { %2772 = vrot.lane.b32.xlu0 %v4709_v9, %s3115_s21  ;;  %v3781_v23 = vpop.permute.xlu1 %2487 }
  0xc9   : > { %4710 = vst [vmem:[#allocation12_spill] sm:$0xff] %v3781_v23 }
  0xca   : > { %v3783_v57 = vpop.permute.xlu0 %2492  ;;  %2777 = vrot.lane.b32.xlu1 %v4712_v4, %s3115_s21 }
  0xcb   : > { %4711 = vst [vmem:[#allocation13_spill] sm:$0xff] %v3783_v57 }
  0xcc   : > { %2782 = vrot.lane.b32.xlu0 %v3581_v58, %s3116_s22  ;;  %v3789_v17 = vpop.permute.xlu1 %2497 }
  0xcd   : > { %4713 = vst [vmem:[#allocation14_spill] sm:$0xff] %v3789_v17 }
  0xce   : > { %v2503_v47 = vpop.permute.xlu0 %2502  ;;  %2787 = vrot.lane.b32.xlu1 %v3601_v35, %s3116_s22 }
  0xcf   : > { %v2505_v21 = vunpack.i.h.bf16 %v2503_v47  ;;  %v2504_v27 = vunpack.i.l.bf16 %v2503_v47 }
  0xd0   : > { %2792 = vrot.lane.b32.xlu0 %v4712_v4, %s3112_s13  ;;  %v2508_v38 = vpop.permute.xlu1 %2507 }
  0xd1   : > { %v2510_v34 = vunpack.i.h.bf16 %v2508_v38  ;;  %v2509_v39 = vunpack.i.l.bf16 %v2508_v38  ;;  %v1469_v24 = vsel %vm349_vm4, %v3456_v45, %v2505_v21  ;;  %v1468_v25 = vsel %vm349_vm4, %v3447_v42, %v2504_v27 }
  0xd2   : > { %v3795_v54 = vpop.permute.xlu0 %2512  ;;  %2797 = vrot.lane.b32.xlu1 %v4714_v59, %s3112_s13 }
  0xd3   : > { %v1471_v47 = vsel %vm349_vm4, %v3465_v50, %v2510_v34  ;;  %v1470_v38 = vsel %vm349_vm4, %v3463_v28, %v2509_v39  ;;  %v4725_v39 = vld [vmem:[#allocation10_spill] sm:$0xff] }
  0xd4   : > { %2802 = vrot.lane.b32.xlu0 %v3601_v35, %s3113_s16  ;;  %v3801_v36 = vpop.permute.xlu1 %2517 }
  0xd6   : > { %v3803_v58 = vpop.permute.xlu0 %2522  ;;  %2807 = vrot.lane.b32.xlu1 %v3604_v1, %s3113_s16 }
  0xd8   : > { %2812 = vrot.lane.b32.xlu0 %v3679_v63, %s3114_s20  ;;  %v3809_v15 = vpop.permute.xlu1 %2527 }
  0xda   : > { %v3811_v2 = vpop.permute.xlu0 %2532  ;;  %2817 = vrot.lane.b32.xlu1 %v3685_v6, %s3114_s20 }
  0xdc   : > { %2822 = vrot.lane.b32.xlu0 %v4714_v59, %s3115_s21  ;;  %v3817_v35 = vpop.permute.xlu1 %2537 }
  0xde   : > { %v3819_v62 = vpop.permute.xlu0 %2542  ;;  %2827 = vrot.lane.b32.xlu1 %v4715_v55, %s3115_s21 }
  0xe0   : > { %2832 = vrot.lane.b32.xlu0 %v3604_v1, %s3116_s22  ;;  %v3825_v56 = vpop.permute.xlu1 %2547 }
  0xe2   : > { %v3827_v63 = vpop.permute.xlu0 %2552  ;;  %2837 = vrot.lane.b32.xlu1 %v3606_v19, %s3116_s22 }
  0xe4   : > { %2842 = vrot.lane.b32.xlu0 %v4715_v55, %s3112_s13  ;;  %v3833_v6 = vpop.permute.xlu1 %2557  ;;  %v4722_v55 = vld [vmem:[#allocation18_spill] sm:$0xff] }
  0xe6   : > { %v3835_v13 = vpop.permute.xlu0 %2562  ;;  %2847 = vrot.lane.b32.xlu1 %v3472_v8, %s3112_s13 }
  0xe7   : > { %4716 = vst [vmem:[#allocation16_spill] sm:$0xff] %v3835_v13 }
  0xe8   : > { %2852 = vrot.lane.b32.xlu0 %v3606_v19, %s3113_s16  ;;  %v3841_v1 = vpop.permute.xlu1 %2567 }
  0xe9   : > { %4717 = vst [vmem:[#allocation4_spill] sm:$0xff] %v3841_v1 }
  0xea   : > { %v3843_v14 = vpop.permute.xlu0 %2572  ;;  %2857 = vrot.lane.b32.xlu1 %v3610_v40, %s3113_s16 }
  0xeb   : > { %4718 = vst [vmem:[#allocation3_spill] sm:$0xff] %v3843_v14 }
  0xec   : > { %2862 = vrot.lane.b32.xlu0 %v3691_v7, %s3114_s20  ;;  %v3851_v32 = vpop.permute.xlu1 %2577 }
  0xed   : > { %4719 = vst [vmem:[#allocation5_spill] sm:$0xff] %v3851_v32 }
  0xee   : > { %v2583_v19 = vpop.permute.xlu0 %2582  ;;  %2867 = vrot.lane.b32.xlu1 %v2866_v20, %s3114_s20 }
  0xef   : > { %v2585_v12 = vunpack.i.h.bf16 %v2583_v19  ;;  %v2584_v16 = vunpack.i.l.bf16 %v2583_v19  ;;  %v4726_v19 = vld [vmem:[#allocation11_spill] sm:$0xff] }
  0xf0   : > { %2872 = vrot.lane.b32.xlu0 %v3472_v8, %s3115_s21  ;;  %v2588_v37 = vpop.permute.xlu1 %2587 }
  0xf1   : > { %v3861_v7 = vsel %vm1472_vm7, %v1468_v25, %v2584_v16  ;;  %v3864_v11 = vsel %vm1472_vm7, %v1469_v24, %v2585_v12  ;;  %v2590_v9 = vunpack.i.h.bf16 %v2588_v37  ;;  %v2589_v4 = vunpack.i.l.bf16 %v2588_v37  ;;  %v4727_v37 = vld [vmem:[#allocation19_spill] sm:$0xff] }
  0xf2   : > { %4720 = vst [vmem:[#allocation6_spill] sm:$0xff] %v3861_v7  ;;  %4721 = vst [vmem:[#allocation7_spill] sm:$0xff] %v3864_v11  ;;  %v3870_v59 = vpop.permute.xlu0 %2592  ;;  %2877 = vrot.lane.b32.xlu1 %v4722_v55, %s3115_s21  ;;  %v2896_v12 = vpack.i.bf16 %v4726_v19, %v4725_v39  ;;  %v2554_v39 = vunpack.i.l.bf16 %v3827_v63  ;;  %v2560_v19 = vunpack.i.h.bf16 %v3833_v6 }
  0xf3   : > { %v3875_v8 = vsel %vm1472_vm7, %v1471_v47, %v2590_v9  ;;  %v3878_v21 = vsel %vm1472_vm7, %v1470_v38, %v2589_v4  ;;  %v2475_v9 = vunpack.i.h.bf16 %v3767_v48  ;;  %v2480_v4 = vunpack.i.h.bf16 %v3773_v43 }
  0xf4   : > { %4723 = vst [vmem:[#allocation8_spill] sm:$0xff] %v3875_v8  ;;  %4724 = vst [vmem:[#allocation9_spill] sm:$0xff] %v3878_v21  ;;  %2882 = vrot.lane.b32.xlu0 %v3610_v40, %s3116_s22  ;;  %v3882_v27 = vpop.permute.xlu1 %2597  ;;  %v2479_v47 = vunpack.i.l.bf16 %v3773_v43  ;;  %v2555_v38 = vunpack.i.h.bf16 %v3827_v63  ;;  %v2559_v8 = vunpack.i.l.bf16 %v3833_v6  ;;  %v2594_v17 = vunpack.i.l.bf16 %v3870_v59 }
  0xf5   : > { %v1457_v43 = vsel %vm349_vm4, %v3366_v46, %v2475_v9  ;;  %v1459_v6 = vsel %vm349_vm4, %v3382_v61, %v2480_v4  ;;  %v3939_v9 = vld [vmem:[#allocation2 + $0x180] sm:$0xff]  ;;  %v2434_v4 = vunpack.i.l.bf16 %v3736_v10  ;;  %v2600_v13 = vunpack.i.h.bf16 %v3882_v27 }
  0xf6   : > { %v3884_v34 = vpop.permute.xlu0 %2602  ;;  %2887 = vrot.lane.b32.xlu1 %v3612_v60, %s3116_s22  ;;  %v1458_v7 = vsel %vm349_vm4, %v3374_v52, %v2479_v47  ;;  %v1490_v14 = vsel %vm1472_vm7, %v1457_v43, %v2555_v38  ;;  %v1492_v61 = vsel %vm1472_vm7, %v1459_v6, %v2560_v19  ;;  %v2440_v43 = vunpack.i.h.bf16 %v3743_v5  ;;  %v3074_v6 = vld [vmem:[#allocation2] sm:$0xff] }
  0xf7   : > { %v1491_v52 = vsel %vm1472_vm7, %v1458_v7, %v2559_v8  ;;  %v649_v8 = vrot.slane %v3939_v9, 1  ;;  %v2595_v19 = vunpack.i.h.bf16 %v3870_v59  ;;  %v3076_v59 = vld [vmem:[#allocation2 + $0x20] sm:$0xff] }
  0xf8   : > { %2892 = vrot.lane.b32.xlu0 %v2866_v20, %s3111_s10  ;;  %v3891_v16 = vpop.permute.xlu1 %2607  ;;  %v2474_v20 = vunpack.i.l.bf16 %v3767_v48  ;;  %v3920_v48 = vpack.i.bf16 %v4702_v0, %v4701_v49 }
  0xfa   : > { %v3893_v24 = vpop.permute.xlu0 %2612  ;;  %2897 = vrot.lane.b32.xlu1 %v2896_v12, %s3111_s10 }
  0xfc   : > { %2902 = vrot.lane.b32.xlu0 %v4722_v55, %s3112_s13  ;;  %v3898_v40 = vpop.permute.xlu1 %2617 }
  0xfe   : > { %v3900_v25 = vpop.permute.xlu0 %2622  ;;  %2907 = vrot.lane.b32.xlu1 %v4727_v37, %s3112_s13 }
 0x100   : > { %2912 = vrot.lane.b32.xlu0 %v3612_v60, %s3113_s16  ;;  %v3912_v55 = vpop.permute.xlu1 %2627  ;;  %v1456_v60 = vsel %vm349_vm4, %v3357_v41, %v2474_v20 }
 0x101   : > { %v1489_v32 = vsel %vm1472_vm7, %v1456_v60, %v2554_v39  ;;  %v654_v39 = vrot.slane %v3939_v9, 2  ;;  %v2439_v60 = vunpack.i.l.bf16 %v3743_v5  ;;  %v2519_v5 = vunpack.i.l.bf16 %v3801_v36 }
 0x102   : > { %v2633_v21 = vpop.permute.xlu0 %2632  ;;  %2917 = vrot.lane.b32.xlu1 %v3614_v44, %s3113_s16 }
 0x103   : > { %v2635_v63 = vunpack.i.h.bf16 %v2633_v21  ;;  %v2634_v11 = vunpack.i.l.bf16 %v2633_v21 }
 0x104   : > { %2922 = vrot.lane.b32.xlu0 %v2896_v12, %s3114_s20  ;;  %v2638_v49 = vpop.permute.xlu1 %2637  ;;  %v2435_v12 = vunpack.i.h.bf16 %v3736_v10 }
 0x105   : > { %v3934_v46 = vsel %vm1505_vm8, %v1489_v32, %v2634_v11  ;;  %v3937_v41 = vsel %vm1505_vm8, %v1490_v14, %v2635_v63  ;;  %v2640_v0 = vunpack.i.h.bf16 %v2638_v49  ;;  %v2639_v21 = vunpack.i.l.bf16 %v2638_v49  ;;  %v3951_v11 = vld [vmem:[#allocation2 + $0x188] sm:$0xff]  ;;  %v3953_v14 = vld [vmem:[#allocation2 + $0x190] sm:$0x3]  ;;  %v4728_v63 = vld [vmem:[#allocation20_spill] sm:$0xff] }
 0x106   : > { %v3943_v20 = vpop.permute.xlu0 %2642  ;;  %2927 = vrot.lane.b32.xlu1 %v3920_v48, %s3114_s20  ;;  %v3949_v32 = vpack.i.bf16 %v3456_v45, %v3447_v42  ;;  %v650_v38 = vrot.slane %v3951_v11, 1  ;;  %v652_v10 = vrot.slane %v3953_v14, 1  ;;  %v1440_v49 = vsel %vm349_vm4, %v3074_v6, %v2434_v4 }
 0x107   : > { %v3958_v47 = vsel %vm1505_vm8, %v1491_v52, %v2639_v21  ;;  %v3961_v7 = vsel %vm1505_vm8, %v1492_v61, %v2640_v0  ;;  %v3075_v0 = vld [vmem:[#allocation2 + $0x8] sm:$0xff]  ;;  %v2515_v61 = vunpack.i.h.bf16 %v3795_v54  ;;  %v2514_v52 = vunpack.i.l.bf16 %v3795_v54 }
 0x108   : > { %2932 = vrot.lane.b32.xlu0 %v4727_v37, %s3115_s21  ;;  %v3965_v42 = vpop.permute.xlu1 %2647  ;;  %v1441_v21 = vsel %vm349_vm4, %v3075_v0, %v2435_v12  ;;  %v2520_v45 = vunpack.i.h.bf16 %v3801_v36  ;;  %v3991_v12 = vsel %vm484_vm3, %v649_v8, %v650_v38  ;;  %v3994_v4 = vsel %vm484_vm3, %v650_v38, %v652_v10 }
 0x109   : > { %v4729_v54 = vrot.slane %v3951_v11, 2  ;;  %v1443_v0 = vsel %vm349_vm4, %v3076_v59, %v2440_v43  ;;  %v2599_v8 = vunpack.i.l.bf16 %v3882_v27  ;;  %v1474_v38 = vsel %vm1472_vm7, %v1441_v21, %v2515_v61 }
 0x10a   : > { %v3976_v37 = vpop.permute.xlu0 %2652  ;;  %2937 = vrot.lane.b32.xlu1 %v4728_v63, %s3115_s21  ;;  %v1473_v10 = vsel %vm1472_vm7, %v1440_v49, %v2514_v52  ;;  %v2644_v43 = vunpack.i.l.bf16 %v3943_v20  ;;  %v1507_v27 = vsel %vm1505_vm8, %v1474_v38, %v2595_v19  ;;  %v2650_v21 = vunpack.i.h.bf16 %v3965_v42 }
 0x10b   : > { %v3999_v36 = vsel %vm565_vm5, %v654_v39, %v4729_v54  ;;  %v2645_v39 = vunpack.i.h.bf16 %v3943_v20  ;;  %v1506_v59 = vsel %vm1505_vm8, %v1473_v10, %v2594_v17  ;;  %v2649_v49 = vunpack.i.l.bf16 %v3965_v42 }
 0x10c   : > { %2942 = vrot.lane.b32.xlu0 %v3614_v44, %s3116_s22  ;;  %v2658_v57 = vpop.permute.xlu1 %2657  ;;  %v3077_v44 = vld [vmem:[#allocation2 + $0x18] sm:$0xff]  ;;  %v2655_v61 = vunpack.i.h.bf16 %v3976_v37  ;;  %v2654_v20 = vunpack.i.l.bf16 %v3976_v37 }
 0x10d   : > { %v1442_v1 = vsel %vm349_vm4, %v3077_v44, %v2439_v60  ;;  %v1476_v60 = vsel %vm1472_vm7, %v1443_v0, %v2520_v45  ;;  %v2660_v17 = vunpack.i.h.bf16 %v2658_v57  ;;  %v2659_v52 = vunpack.i.l.bf16 %v2658_v57 }
 0x10e   : > { %v2663_v23 = vpop.permute.xlu0 %2662  ;;  %2947 = vrot.lane.b32.xlu1 %v3630_v31, %s3116_s22  ;;  %v1475_v54 = vsel %vm1472_vm7, %v1442_v1, %v2519_v5  ;;  %v1509_v45 = vsel %vm1505_vm8, %v1476_v60, %v2600_v13  ;;  %v1540_v5 = vsel %vm1538_vm9, %v1507_v27, %v2645_v39 }
 0x10f   : > { %v1508_v1 = vsel %vm1505_vm8, %v1475_v54, %v2599_v8  ;;  %v2665_v42 = vunpack.i.h.bf16 %v2663_v23  ;;  %v2664_v0 = vunpack.i.l.bf16 %v2663_v23  ;;  %v1542_v8 = vsel %vm1538_vm9, %v1509_v45, %v2650_v21 }
 0x110   : > { %2952 = vrot.lane.b32.xlu0 %v3920_v48, %s3111_s10  ;;  %v2668_v44 = vpop.permute.xlu1 %2667  ;;  %v1539_v48 = vsel %vm1538_vm9, %v1506_v59, %v2644_v43  ;;  %v1541_v57 = vsel %vm1538_vm9, %v1508_v1, %v2649_v49  ;;  %v1573_v43 = vsel %vm1571_vm10, %v1540_v5, %v2655_v61  ;;  %v1575_v23 = vsel %vm1571_vm10, %v1542_v8, %v2660_v17 }
 0x111   : > { %v2670_v38 = vunpack.i.h.bf16 %v2668_v44  ;;  %v2669_v10 = vunpack.i.l.bf16 %v2668_v44  ;;  %v1572_v54 = vsel %vm1571_vm10, %v1539_v48, %v2654_v20  ;;  %v1574_v39 = vsel %vm1571_vm10, %v1541_v57, %v2659_v52  ;;  %v4730_v44 = vld [vmem:[#allocation21_spill] sm:$0xff] }
 0x112   : > { %v2673_v19 = vpop.permute.xlu0 %2672  ;;  %2957 = vrot.lane.b32.xlu1 %v3949_v32, %s3111_s10  ;;  %v1606_v49 = vsel %vm1604_vm11, %v1573_v43, %v2665_v42  ;;  %v4731_v8 = vrot.slane %v3953_v14, 2  ;;  %v4074_v14 = vld [vmem:[#allocation2 + $0x1a0] sm:$0xff] }
 0x113   : > { %v2675_v37 = vunpack.i.h.bf16 %v2673_v19  ;;  %v2674_v6 = vunpack.i.l.bf16 %v2673_v19  ;;  %v1607_v20 = vsel %vm1604_vm11, %v1574_v39, %v2669_v10  ;;  %v1608_v61 = vsel %vm1604_vm11, %v1575_v23, %v2670_v38 }
 0x114   : > { %2962 = vrot.lane.b32.xlu0 %v4728_v63, %s3112_s13  ;;  %v2678_v13 = vpop.permute.xlu1 %2677  ;;  %v1605_v63 = vsel %vm1604_vm11, %v1572_v54, %v2664_v0  ;;  %v2445_v0 = vunpack.i.h.bf16 %v3741_v3  ;;  %v4732_v54 = vrot.slane %v3951_v11, 2 }
 0x115   : > { %v2680_v60 = vunpack.i.h.bf16 %v2678_v13  ;;  %v2679_v59 = vunpack.i.l.bf16 %v2678_v13  ;;  %v1638_v17 = vsel %vm1637_vm12, %v1605_v63, %v2674_v6  ;;  %v1639_v52 = vsel %vm1637_vm12, %v1606_v49, %v2675_v37  ;;  %v3080_v63 = vld [vmem:[#allocation2 + $0x38] sm:$0xff] }
 0x116   : > { %v2683_v27 = vpop.permute.xlu0 %2682  ;;  %2967 = vrot.lane.b32.xlu1 %v4730_v44, %s3112_s13  ;;  %v2444_v6 = vunpack.i.l.bf16 %v3741_v3  ;;  %v658_v43 = vsel %vm565_vm5, %v4732_v54, %v4731_v8  ;;  %v4070_v3 = vld [vmem:[#allocation2 + $0x170] sm:$0xff]  ;;  %v1445_v49 = vsel %vm349_vm4, %v3080_v63, %v2445_v0 }
 0x117   : > { %v2685_v1 = vunpack.i.h.bf16 %v2683_v27  ;;  %v2684_v21 = vunpack.i.l.bf16 %v2683_v27  ;;  %v1640_v10 = vsel %vm1637_vm12, %v1607_v20, %v2679_v59  ;;  %v1641_v38 = vsel %vm1637_vm12, %v1608_v61, %v2680_v60  ;;  %v4068_v60 = vld [vmem:[#allocation2 + $0x168] sm:$0xff] }
 0x118   : > { %2972 = vrot.lane.b32.xlu0 %v3630_v31, %s3113_s16  ;;  %v2688_v45 = vpop.permute.xlu1 %2687  ;;  %v3011_v59 = vpack.i.bf16 %v4070_v3, %v4068_v60  ;;  %v4078_v27 = vpack.i.bf16 %v3951_v11, %v3939_v9  ;;  %v4733_v61 = vpack.i.bf16 %v3465_v50, %v3463_v28  ;;  %v4095_v9 = vpack.i.bf16 %v658_v43, %v3999_v36  ;;  %v4097_v11 = vld [vmem:[#allocation2 + $0x198] sm:$0xff] }
 0x119   : > { %v2690_v19 = vunpack.i.h.bf16 %v2688_v45  ;;  %v2689_v48 = vunpack.i.l.bf16 %v2688_v45  ;;  %v1671_v5 = vsel %vm1670_vm13, %v1638_v17, %v2684_v21  ;;  %v1672_v42 = vsel %vm1670_vm13, %v1639_v52, %v2685_v1 }
 0x11a   : > { %v4051_v13 = vpop.permute.xlu0 %2692  ;;  %2977 = vrot.lane.b32.xlu1 %v3642_v53, %s3113_s16  ;;  %v1703_v31 = vpack.c.bf16 %v1672_v42, %v1671_v5  ;;  %v2450_v1 = vunpack.i.h.bf16 %v3749_v29  ;;  %v2449_v21 = vunpack.i.l.bf16 %v3749_v29  ;;  %v2525_v29 = vunpack.i.h.bf16 %v3803_v58 }
 0x11b   : > { %v1673_v37 = vsel %vm1670_vm13, %v1640_v10, %v2689_v48  ;;  %v1674_v57 = vsel %vm1670_vm13, %v1641_v38, %v2690_v19  ;;  %v2524_v17 = vunpack.i.l.bf16 %v3803_v58  ;;  %v663_v52 = vrot.slane %v4074_v14, 1  ;;  %v3082_v10 = vld [vmem:[#allocation2 + $0x50] sm:$0xff] }
 0x11c   : > { %v1704_v39 = vpack.c.bf16 %v1674_v57, %v1673_v37  ;;  %2982 = vrot.lane.b32.xlu0 %v3949_v32, %s3114_s20  ;;  %2374 = vmatprep.mubr.msk.bf16.mxu0 %vm1746_vm14, %v1703_v31  ;;  %v4066_v23 = vpop.permute.xlu1 %2697  ;;  %v4082_v32 = vpack.i.bf16 %v3994_v4, %v3991_v12  ;;  %v4099_v12 = vld [vmem:[#allocation2 + $0x1a8] sm:$0x3]  ;;  %v3081_v4 = vld [vmem:[#allocation2 + $0x30] sm:$0xff]  ;;  %v2530_v28 = vunpack.i.h.bf16 %v3809_v15  ;;  %v2529_v50 = vunpack.i.l.bf16 %v3809_v15 }
 0x11d   : > { %v1444_v45 = vsel %vm349_vm4, %v3081_v4, %v2444_v6  ;;  %v2605_v36 = vunpack.i.h.bf16 %v3884_v34  ;;  %v2604_v19 = vunpack.i.l.bf16 %v3884_v34  ;;  %v668_v5 = vrot.slane %v4074_v14, 2  ;;  %v3083_v15 = vld [vmem:[#allocation2 + $0x48] sm:$0xff] }
 0x11e   : > { %v4087_v20 = vpop.permute.xlu0 %2702  ;;  %2987 = vrot.lane.b32.xlu1 %v4733_v61, %s3114_s20  ;;  %2375 = vmatmul.mubr.msk.bf16.vlgmr.msra.gmra.mxu0 %vm1746_vm14, %v1704_v39  ;;  %v662_v42 = vrot.slane %v4097_v11, 1  ;;  %v667_v58 = vrot.slane %v4097_v11, 2  ;;  %v665_v0 = vrot.slane %v4099_v12, 1  ;;  %v1447_v38 = vsel %vm349_vm4, %v3082_v10, %v2450_v1  ;;  %v4734_v37 = vld [vmem:[#allocation22_spill] sm:$0xff] }
 0x11f   : > { %v1446_v31 = vsel %vm349_vm4, %v3083_v15, %v2449_v21  ;;  %v2610_v34 = vunpack.i.h.bf16 %v3891_v16  ;;  %v2609_v6 = vunpack.i.l.bf16 %v3891_v16  ;;  %v1478_v57 = vsel %vm1472_vm7, %v1445_v49, %v2525_v29 }
 0x120   : > { %2992 = vrot.lane.b32.xlu0 %v4730_v44, %s3115_s21  ;;  %v2708_v48 = vpop.permute.xlu1 %2707  ;;  %v1477_v8 = vsel %vm1472_vm7, %v1444_v45, %v2524_v17  ;;  %v2695_v54 = vunpack.i.h.bf16 %v4051_v13  ;;  %v2694_v43 = vunpack.i.l.bf16 %v4051_v13  ;;  %v1480_v39 = vsel %vm1472_vm7, %v1447_v38, %v2530_v28 }
 0x121   : > { %v1479_v63 = vsel %vm1472_vm7, %v1446_v31, %v2529_v50  ;;  %v1510_v1 = vsel %vm1505_vm8, %v1477_v8, %v2604_v19  ;;  %v1511_v16 = vsel %vm1505_vm8, %v1478_v57, %v2605_v36  ;;  %v2700_v49 = vunpack.i.h.bf16 %v4066_v23 }
 0x122   : > { %v2713_v44 = vpop.permute.xlu0 %2712  ;;  %2997 = vrot.lane.b32.xlu1 %v4734_v37, %s3115_s21  ;;  %v2699_v61 = vunpack.i.l.bf16 %v4066_v23  ;;  %v2705_v4 = vunpack.i.h.bf16 %v4087_v20  ;;  %v2704_v13 = vunpack.i.l.bf16 %v4087_v20  ;;  %v1512_v45 = vsel %vm1505_vm8, %v1479_v63, %v2609_v6 }
 0x123   : > { %v1513_v29 = vsel %vm1505_vm8, %v1480_v39, %v2610_v34  ;;  %v2710_v17 = vunpack.i.h.bf16 %v2708_v48  ;;  %v2709_v28 = vunpack.i.l.bf16 %v2708_v48  ;;  %v1544_v36 = vsel %vm1538_vm9, %v1511_v16, %v2695_v54 }
 0x124   : > { %3002 = vrot.lane.b32.xlu0 %v3642_v53, %s3116_s22  ;;  %v2718_v21 = vpop.permute.xlu1 %2717  ;;  %v1543_v53 = vsel %vm1538_vm9, %v1510_v1, %v2694_v43  ;;  %v2715_v19 = vunpack.i.h.bf16 %v2713_v44  ;;  %v2714_v23 = vunpack.i.l.bf16 %v2713_v44  ;;  %v1545_v31 = vsel %vm1538_vm9, %v1512_v45, %v2699_v61 }
 0x125   : > { %v2720_v10 = vunpack.i.h.bf16 %v2718_v21  ;;  %v2719_v38 = vunpack.i.l.bf16 %v2718_v21  ;;  %v1546_v34 = vsel %vm1538_vm9, %v1513_v29, %v2700_v49  ;;  %v1576_v6 = vsel %vm1571_vm10, %v1543_v53, %v2704_v13 }
 0x126   : > { %v2723_v50 = vpop.permute.xlu0 %2722  ;;  %3007 = vrot.lane.b32.xlu1 %v3646_v33, %s3116_s22  ;;  %v1577_v57 = vsel %vm1571_vm10, %v1544_v36, %v2705_v4  ;;  %v1578_v44 = vsel %vm1571_vm10, %v1545_v31, %v2709_v28  ;;  %v1579_v8 = vsel %vm1571_vm10, %v1546_v34, %v2710_v17  ;;  %v1609_v60 = vsel %vm1604_vm11, %v1576_v6, %v2714_v23 }
 0x127   : > { %v2725_v15 = vunpack.i.h.bf16 %v2723_v50  ;;  %v2724_v20 = vunpack.i.l.bf16 %v2723_v50  ;;  %v1610_v3 = vsel %vm1604_vm11, %v1577_v57, %v2715_v19  ;;  %v1611_v1 = vsel %vm1604_vm11, %v1578_v44, %v2719_v38 }
 0x128   : > { %3012 = vrot.lane.b32.xlu0 %v3011_v59, %s3111_s10  ;;  %v2728_v48 = vpop.permute.xlu1 %2727  ;;  %v1612_v16 = vsel %vm1604_vm11, %v1579_v8, %v2720_v10  ;;  %v666_v23 = vsel %vm484_vm3, %v663_v52, %v665_v0  ;;  %v670_v10 = vrot.slane %v4099_v12, 2  ;;  %v2459_v31 = vunpack.i.l.bf16 %v3757_v51 }
 0x129   : > { %v2730_v54 = vunpack.i.h.bf16 %v2728_v48  ;;  %v2729_v43 = vunpack.i.l.bf16 %v2728_v48  ;;  %v1642_v21 = vsel %vm1637_vm12, %v1609_v60, %v2724_v20  ;;  %v1643_v49 = vsel %vm1637_vm12, %v1610_v3, %v2725_v15 }
 0x12a   : > { %v2733_v39 = vpop.permute.xlu0 %2732  ;;  %3017 = vrot.lane.b32.xlu1 %v4078_v27, %s3111_s10  ;;  %v2454_v20 = vunpack.i.l.bf16 %v3751_v30  ;;  %v2460_v48 = vunpack.i.h.bf16 %v3757_v51  ;;  %v2534_v0 = vunpack.i.l.bf16 %v3811_v2  ;;  %v671_v51 = vsel %vm565_vm5, %v668_v5, %v670_v10 }
 0x12b   : > { %v2735_v59 = vunpack.i.h.bf16 %v2733_v39  ;;  %v2734_v63 = vunpack.i.l.bf16 %v2733_v39  ;;  %v1644_v17 = vsel %vm1637_vm12, %v1611_v1, %v2729_v43  ;;  %v1645_v28 = vsel %vm1637_vm12, %v1612_v16, %v2730_v54  ;;  %v3084_v54 = vld [vmem:[#allocation2 + $0x68] sm:$0xff]  ;;  %v3086_v43 = vld [vmem:[#allocation2 + $0x80] sm:$0xff]  ;;  %v3087_v39 = vld [vmem:[#allocation2 + $0x78] sm:$0xff] }
 0x12c   : > { %3022 = vrot.lane.b32.xlu0 %v4734_v37, %s3112_s13  ;;  %v2738_v61 = vpop.permute.xlu1 %2737  ;;  %v664_v37 = vsel %vm484_vm3, %v662_v42, %v663_v52  ;;  %v2455_v42 = vunpack.i.h.bf16 %v3751_v30  ;;  %v2535_v52 = vunpack.i.h.bf16 %v3811_v2  ;;  %v669_v30 = vsel %vm565_vm5, %v667_v58, %v668_v5  ;;  %v3085_v58 = vld [vmem:[#allocation2 + $0x60] sm:$0xff] }
 0x12d   : > { %v1675_v4 = vsel %vm1670_vm13, %v1642_v21, %v2734_v63  ;;  %v1676_v13 = vsel %vm1670_vm13, %v1643_v49, %v2735_v59  ;;  %v2740_v45 = vunpack.i.h.bf16 %v2738_v61  ;;  %v2739_v29 = vunpack.i.l.bf16 %v2738_v61 }
 0x12e   : > { %v1705_v50 = vpack.c.bf16 %v1676_v13, %v1675_v4  ;;  %v4165_v53 = vpop.permute.xlu0 %2742  ;;  %3027 = vrot.lane.b32.xlu1 %v4082_v32, %s3112_s13  ;;  %v3056_v12 = vpack.i.bf16 %v666_v23, %v664_v37  ;;  %v2540_v6 = vunpack.i.h.bf16 %v3817_v35  ;;  %v2539_v57 = vunpack.i.l.bf16 %v3817_v35 }
 0x12f   : > { %v1677_v36 = vsel %vm1670_vm13, %v1644_v17, %v2739_v29  ;;  %v1678_v19 = vsel %vm1670_vm13, %v1645_v28, %v2740_v45  ;;  %v2615_v44 = vunpack.i.h.bf16 %v3893_v24  ;;  %v2614_v8 = vunpack.i.l.bf16 %v3893_v24 }
 0x130   : > { %v1706_v38 = vpack.c.bf16 %v1678_v19, %v1677_v36  ;;  %3032 = vrot.lane.b32.xlu0 %v3646_v33, %s3113_s16  ;;  %2378 = vmatprep.mubr.msk.bf16.mxu0 %vm1746_vm14, %v1705_v50  ;;  %v4185_v15 = vpop.permute.xlu1 %2747  ;;  %v3046_v33 = vpack.i.bf16 %v4074_v14, %v4097_v11  ;;  %v1449_v11 = vsel %vm349_vm4, %v3084_v54, %v2455_v42  ;;  %v2620_v60 = vunpack.i.h.bf16 %v3898_v40 }
 0x131   : > { %v1448_v14 = vsel %vm349_vm4, %v3085_v58, %v2454_v20  ;;  %v1451_v5 = vsel %vm349_vm4, %v3086_v43, %v2460_v48  ;;  %v1450_v35 = vsel %vm349_vm4, %v3087_v39, %v2459_v31  ;;  %v2619_v24 = vunpack.i.l.bf16 %v3898_v40 }
 0x132   : > { %v4191_v34 = vpop.permute.xlu0 %2752  ;;  %3037 = vrot.lane.b32.xlu1 %v4095_v9, %s3113_s16  ;;  %2379 = vmatmul.mubr.msk.bf16.gmra.mxu0 %vm1746_vm14, %v1706_v38  ;;  %v1481_v59 = vsel %vm1472_vm7, %v1448_v14, %v2534_v0  ;;  %v1482_v63 = vsel %vm1472_vm7, %v1449_v11, %v2535_v52  ;;  %v2745_v1 = vunpack.i.h.bf16 %v4165_v53  ;;  %v2744_v16 = vunpack.i.l.bf16 %v4165_v53 }
 0x133   : > { %v1484_v21 = vsel %vm1472_vm7, %v1451_v5, %v2540_v6  ;;  %v1483_v49 = vsel %vm1472_vm7, %v1450_v35, %v2539_v57  ;;  %v1514_v61 = vsel %vm1505_vm8, %v1481_v59, %v2614_v8  ;;  %v1515_v40 = vsel %vm1505_vm8, %v1482_v63, %v2615_v44 }
 0x134   : > { %3042 = vrot.lane.b32.xlu0 %v4078_v27, %s3114_s20  ;;  %v2758_v2 = vpop.permute.xlu1 %2757  ;;  %v3066_v27 = vpack.i.bf16 %v671_v51, %v669_v30  ;;  %v2750_v13 = vunpack.i.h.bf16 %v4185_v15  ;;  %v2749_v45 = vunpack.i.l.bf16 %v4185_v15  ;;  %v2755_v29 = vunpack.i.h.bf16 %v4191_v34 }
 0x135   : > { %v2754_v17 = vunpack.i.l.bf16 %v4191_v34  ;;  %v1516_v28 = vsel %vm1505_vm8, %v1483_v49, %v2619_v24  ;;  %v1517_v50 = vsel %vm1505_vm8, %v1484_v21, %v2620_v60  ;;  %v2760_v53 = vunpack.i.h.bf16 %v2758_v2 }
 0x136   : > { %v2763_v3 = vpop.permute.xlu0 %2762  ;;  %3047 = vrot.lane.b32.xlu1 %v3046_v33, %s3114_s20  ;;  %v2759_v37 = vunpack.i.l.bf16 %v2758_v2  ;;  %v1548_v19 = vsel %vm1538_vm9, %v1515_v40, %v2745_v1  ;;  %v1549_v31 = vsel %vm1538_vm9, %v1516_v28, %v2749_v45  ;;  %v1550_v34 = vsel %vm1538_vm9, %v1517_v50, %v2750_v13 }
 0x137   : > { %v2765_v23 = vunpack.i.h.bf16 %v2763_v3  ;;  %v2764_v10 = vunpack.i.l.bf16 %v2763_v3  ;;  %v1583_v0 = vsel %vm1571_vm10, %v1550_v34, %v2760_v53  ;;  %v2465_v21 = vunpack.i.h.bf16 %v3759_v22  ;;  %v3088_v53 = vld [vmem:[#allocation2 + $0x98] sm:$0xff] }
 0x138   : > { %3052 = vrot.lane.b32.xlu0 %v4082_v32, %s3115_s21  ;;  %v2768_v4 = vpop.permute.xlu1 %2767  ;;  %v1547_v32 = vsel %vm1538_vm9, %v1514_v61, %v2744_v16  ;;  %v1582_v52 = vsel %vm1571_vm10, %v1549_v31, %v2759_v37  ;;  %v2464_v49 = vunpack.i.l.bf16 %v3759_v22  ;;  %v2470_v61 = vunpack.i.h.bf16 %v3765_v26 }
 0x139   : > { %v2770_v38 = vunpack.i.h.bf16 %v2768_v4  ;;  %v2769_v15 = vunpack.i.l.bf16 %v2768_v4  ;;  %v1580_v33 = vsel %vm1571_vm10, %v1547_v32, %v2754_v17  ;;  %v2469_v40 = vunpack.i.l.bf16 %v3765_v26  ;;  %v3089_v26 = vld [vmem:[#allocation2 + $0x90] sm:$0xff] }
 0x13a   : > { %v2773_v36 = vpop.permute.xlu0 %2772  ;;  %3057 = vrot.lane.b32.xlu1 %v3056_v12, %s3115_s21  ;;  %v1581_v12 = vsel %vm1571_vm10, %v1548_v19, %v2755_v29  ;;  %v2545_v13 = vunpack.i.h.bf16 %v3819_v62  ;;  %v2544_v45 = vunpack.i.l.bf16 %v3819_v62  ;;  %v2550_v29 = vunpack.i.h.bf16 %v3825_v56  ;;  %v3090_v32 = vld [vmem:[#allocation2 + $0xb0] sm:$0xff] }
 0x13b   : > { %v2775_v42 = vunpack.i.h.bf16 %v2773_v36  ;;  %v2774_v20 = vunpack.i.l.bf16 %v2773_v36  ;;  %v1614_v57 = vsel %vm1604_vm11, %v1581_v12, %v2765_v23  ;;  %v1615_v2 = vsel %vm1604_vm11, %v1582_v52, %v2769_v15  ;;  %v3091_v23 = vld [vmem:[#allocation2 + $0xa8] sm:$0xff] }
 0x13c   : > { %3062 = vrot.lane.b32.xlu0 %v4095_v9, %s3116_s22  ;;  %v2778_v48 = vpop.permute.xlu1 %2777  ;;  %v1613_v9 = vsel %vm1604_vm11, %v1580_v33, %v2764_v10  ;;  %v1616_v54 = vsel %vm1604_vm11, %v1583_v0, %v2770_v38  ;;  %v2549_v17 = vunpack.i.l.bf16 %v3825_v56  ;;  %v2625_v28 = vunpack.i.h.bf16 %v3900_v25 }
 0x13d   : > { %v2780_v30 = vunpack.i.h.bf16 %v2778_v48  ;;  %v2779_v51 = vunpack.i.l.bf16 %v2778_v48  ;;  %v1646_v11 = vsel %vm1637_vm12, %v1613_v9, %v2774_v20  ;;  %v1647_v58 = vsel %vm1637_vm12, %v1614_v57, %v2775_v42 }
 0x13e   : > { %v2783_v6 = vpop.permute.xlu0 %2782  ;;  %3067 = vrot.lane.b32.xlu1 %v3066_v27, %s3116_s22  ;;  %v2624_v50 = vunpack.i.l.bf16 %v3900_v25  ;;  %v1453_v37 = vsel %vm349_vm4, %v3088_v53, %v2465_v21  ;;  %v1452_v36 = vsel %vm349_vm4, %v3089_v26, %v2464_v49  ;;  %v1455_v19 = vsel %vm349_vm4, %v3090_v32, %v2470_v61 }
 0x13f   : > { %v2785_v44 = vunpack.i.h.bf16 %v2783_v6  ;;  %v2784_v8 = vunpack.i.l.bf16 %v2783_v6  ;;  %v1648_v60 = vsel %vm1637_vm12, %v1615_v2, %v2779_v51  ;;  %v1649_v24 = vsel %vm1637_vm12, %v1616_v54, %v2780_v30 }
 0x140   : > { %v2788_v14 = vpop.permute.xlu1 %2787  ;;  %v1454_v62 = vsel %vm349_vm4, %v3091_v23, %v2469_v40  ;;  %v2630_v10 = vunpack.i.h.bf16 %v3912_v55  ;;  %v2629_v56 = vunpack.i.l.bf16 %v3912_v55  ;;  %v1485_v25 = vsel %vm1472_vm7, %v1452_v36, %v2544_v45 }
 0x141   : > { %v1679_v43 = vsel %vm1670_vm13, %v1646_v11, %v2784_v8  ;;  %v1680_v5 = vsel %vm1670_vm13, %v1647_v58, %v2785_v44  ;;  %v2790_v39 = vunpack.i.h.bf16 %v2788_v14  ;;  %v2789_v35 = vunpack.i.l.bf16 %v2788_v14 }
 0x142   : > { %v1707_v3 = vpack.c.bf16 %v1680_v5, %v1679_v43  ;;  %v2793_v27 = vpop.permute.xlu0 %2792  ;;  %v1486_v15 = vsel %vm1472_vm7, %v1453_v37, %v2545_v13  ;;  %v1488_v48 = vsel %vm1472_vm7, %v1455_v19, %v2550_v29  ;;  %v1487_v31 = vsel %vm1472_vm7, %v1454_v62, %v2549_v17 }
 0x143   : > { %v1681_v59 = vsel %vm1670_vm13, %v1648_v60, %v2789_v35  ;;  %v1682_v63 = vsel %vm1670_vm13, %v1649_v24, %v2790_v39  ;;  %v2795_v42 = vunpack.i.h.bf16 %v2793_v27  ;;  %v2794_v20 = vunpack.i.l.bf16 %v2793_v27 }
 0x144   : > { %v1708_v1 = vpack.c.bf16 %v1682_v63, %v1681_v59  ;;  %2382 = vmatprep.mubr.msk.bf16.mxu0 %vm1746_vm14, %v1707_v3  ;;  %v2798_v16 = vpop.permute.xlu1 %2797  ;;  %v1518_v34 = vsel %vm1505_vm8, %v1485_v25, %v2624_v50  ;;  %v1519_v33 = vsel %vm1505_vm8, %v1486_v15, %v2625_v28  ;;  %v1520_v51 = vsel %vm1505_vm8, %v1487_v31, %v2629_v56 }
 0x145   : > { %v2800_v52 = vunpack.i.h.bf16 %v2798_v16  ;;  %v2799_v0 = vunpack.i.l.bf16 %v2798_v16  ;;  %v1521_v6 = vsel %vm1505_vm8, %v1488_v48, %v2630_v10  ;;  %v1551_v8 = vsel %vm1538_vm9, %v1518_v34, %v2794_v20 }
 0x146   : > { %v2803_v4 = vpop.permute.xlu0 %2802  ;;  %2383 = vmatmul.mubr.msk.bf16.gmra.mxu0 %vm1746_vm14, %v1708_v1  ;;  %v1552_v2 = vsel %vm1538_vm9, %v1519_v33, %v2795_v42 }
 0x147   : > { %v2805_v30 = vunpack.i.h.bf16 %v2803_v4  ;;  %v2804_v55 = vunpack.i.l.bf16 %v2803_v4  ;;  %v1553_v35 = vsel %vm1538_vm9, %v1520_v51, %v2799_v0  ;;  %v1554_v60 = vsel %vm1538_vm9, %v1521_v6, %v2800_v52 }
 0x148   : > { %v2808_v22 = vpop.permute.xlu1 %2807 }
 0x149   : > { %v2810_v9 = vunpack.i.h.bf16 %v2808_v22  ;;  %v2809_v57 = vunpack.i.l.bf16 %v2808_v22  ;;  %v1584_v24 = vsel %vm1571_vm10, %v1551_v8, %v2804_v55  ;;  %v1585_v3 = vsel %vm1571_vm10, %v1552_v2, %v2805_v30 }
 0x14a   : > { %v2813_v38 = vpop.permute.xlu0 %2812 }
 0x14b   : > { %v2815_v54 = vunpack.i.h.bf16 %v2813_v38  ;;  %v2814_v11 = vunpack.i.l.bf16 %v2813_v38  ;;  %v1586_v27 = vsel %vm1571_vm10, %v1553_v35, %v2809_v57  ;;  %v1587_v59 = vsel %vm1571_vm10, %v1554_v60, %v2810_v9 }
 0x14c   : > { %v2818_v12 = vpop.permute.xlu1 %2817 }
 0x14d   : > { %v2820_v58 = vunpack.i.h.bf16 %v2818_v12  ;;  %v2819_v14 = vunpack.i.l.bf16 %v2818_v12  ;;  %v1617_v21 = vsel %vm1604_vm11, %v1584_v24, %v2814_v11  ;;  %v1618_v49 = vsel %vm1604_vm11, %v1585_v3, %v2815_v54 }
 0x14e   : > { %v2823_v44 = vpop.permute.xlu0 %2822 }
 0x14f   : > { %v2825_v43 = vunpack.i.h.bf16 %v2823_v44  ;;  %v2824_v5 = vunpack.i.l.bf16 %v2823_v44  ;;  %v1619_v4 = vsel %vm1604_vm11, %v1586_v27, %v2819_v14  ;;  %v1620_v13 = vsel %vm1604_vm11, %v1587_v59, %v2820_v58 }
 0x150   : > { %v2828_v39 = vpop.permute.xlu1 %2827 }
 0x151   : > { %v2830_v63 = vunpack.i.h.bf16 %v2828_v39  ;;  %v2829_v1 = vunpack.i.l.bf16 %v2828_v39  ;;  %v1650_v45 = vsel %vm1637_vm12, %v1617_v21, %v2824_v5  ;;  %v1651_v29 = vsel %vm1637_vm12, %v1618_v49, %v2825_v43 }
 0x152   : > { %v2833_v16 = vpop.permute.xlu0 %2832 }
 0x153   : > { %v2835_v61 = vunpack.i.h.bf16 %v2833_v16  ;;  %v2834_v40 = vunpack.i.l.bf16 %v2833_v16  ;;  %v1652_v37 = vsel %vm1637_vm12, %v1619_v4, %v2829_v1  ;;  %v1653_v26 = vsel %vm1637_vm12, %v1620_v13, %v2830_v63 }
 0x154   : > { %v2838_v17 = vpop.permute.xlu1 %2837 }
 0x155   : > { %v1683_v28 = vsel %vm1670_vm13, %v1650_v45, %v2834_v40  ;;  %v1684_v50 = vsel %vm1670_vm13, %v1651_v29, %v2835_v61  ;;  %v2840_v22 = vunpack.i.h.bf16 %v2838_v17  ;;  %v2839_v53 = vunpack.i.l.bf16 %v2838_v17 }
 0x156   : > { %v1709_v36 = vpack.c.bf16 %v1684_v50, %v1683_v28  ;;  %v2843_v32 = vpop.permute.xlu0 %2842 }
 0x157   : > { %v1685_v19 = vsel %vm1670_vm13, %v1652_v37, %v2839_v53  ;;  %v1686_v23 = vsel %vm1670_vm13, %v1653_v26, %v2840_v22  ;;  %v2845_v15 = vunpack.i.h.bf16 %v2843_v32  ;;  %v2844_v42 = vunpack.i.l.bf16 %v2843_v32  ;;  %v4735_v26 = vld [vmem:[#allocation12_spill] sm:$0xff] }
 0x158   : > { %v1710_v62 = vpack.c.bf16 %v1686_v23, %v1685_v19  ;;  %2386 = vmatprep.mubr.msk.bf16.mxu0 %vm1746_vm14, %v1709_v36  ;;  %v2848_v10 = vpop.permute.xlu1 %2847  ;;  %v2485_v53 = vunpack.i.h.bf16 %v3775_v18  ;;  %v2484_v37 = vunpack.i.l.bf16 %v3775_v18  ;;  %v2490_v36 = vunpack.i.h.bf16 %v4735_v26  ;;  %v4736_v23 = vld [vmem:[#allocation16_spill] sm:$0xff]  ;;  %v3093_v18 = vld [vmem:[#allocation2 + $0xf0] sm:$0xff] }
 0x159   : > { %v2850_v48 = vunpack.i.h.bf16 %v2848_v10  ;;  %v2849_v31 = vunpack.i.l.bf16 %v2848_v10  ;;  %v1555_v30 = vsel %vm1538_vm9, %v3934_v46, %v2844_v42  ;;  %v1556_v55 = vsel %vm1538_vm9, %v3937_v41, %v2845_v15 }
 0x15a   : > { %v2853_v56 = vpop.permute.xlu0 %2852  ;;  %2387 = vmatmul.mubr.msk.bf16.gmra.mxu0 %vm1746_vm14, %v1710_v62  ;;  %v2489_v32 = vunpack.i.l.bf16 %v4735_v26  ;;  %v2565_v62 = vunpack.i.h.bf16 %v4736_v23  ;;  %v2564_v10 = vunpack.i.l.bf16 %v4736_v23 }
 0x15b   : > { %v2855_v34 = vunpack.i.h.bf16 %v2853_v56  ;;  %v2854_v33 = vunpack.i.l.bf16 %v2853_v56  ;;  %v1557_v54 = vsel %vm1538_vm9, %v3958_v47, %v2849_v31  ;;  %v1558_v11 = vsel %vm1538_vm9, %v3961_v7, %v2850_v48  ;;  %v4737_v56 = vld [vmem:[#allocation4_spill] sm:$0xff] }
 0x15c   : > { %v2858_v38 = vpop.permute.xlu1 %2857  ;;  %v3092_v48 = vld [vmem:[#allocation2 + $0xf8] sm:$0xff] }
 0x15d   : > { %v2860_v12 = vunpack.i.h.bf16 %v2858_v38  ;;  %v2859_v52 = vunpack.i.l.bf16 %v2858_v38  ;;  %v1588_v58 = vsel %vm1571_vm10, %v1555_v30, %v2854_v33  ;;  %v1589_v46 = vsel %vm1571_vm10, %v1556_v55, %v2855_v34  ;;  %v3094_v33 = vld [vmem:[#allocation2 + $0x110] sm:$0xff] }
 0x15e   : > { %v2863_v25 = vpop.permute.xlu0 %2862  ;;  %v2570_v38 = vunpack.i.h.bf16 %v4737_v56  ;;  %v1461_v31 = vsel %vm349_vm4, %v3092_v48, %v2485_v53  ;;  %v1460_v34 = vsel %vm349_vm4, %v3093_v18, %v2484_v37 }
 0x15f   : > { %v2865_v51 = vunpack.i.h.bf16 %v2863_v25  ;;  %v2864_v6 = vunpack.i.l.bf16 %v2863_v25  ;;  %v1590_v14 = vsel %vm1571_vm10, %v1557_v54, %v2859_v52  ;;  %v1591_v41 = vsel %vm1571_vm10, %v1558_v11, %v2860_v12  ;;  %v3095_v52 = vld [vmem:[#allocation2 + $0x108] sm:$0xff] }
 0x160   : > { %v2868_v20 = vpop.permute.xlu1 %2867  ;;  %v2569_v25 = vunpack.i.l.bf16 %v4737_v56  ;;  %v1463_v12 = vsel %vm349_vm4, %v3094_v33, %v2490_v36 }
 0x161   : > { %v2870_v9 = vunpack.i.h.bf16 %v2868_v20  ;;  %v2869_v57 = vunpack.i.l.bf16 %v2868_v20  ;;  %v1621_v35 = vsel %vm1604_vm11, %v1588_v58, %v2864_v6  ;;  %v1622_v60 = vsel %vm1604_vm11, %v1589_v46, %v2865_v51 }
 0x162   : > { %v2873_v0 = vpop.permute.xlu0 %2872  ;;  %v1493_v6 = vsel %vm1472_vm7, %v1460_v34, %v2564_v10 }
 0x163   : > { %v2875_v44 = vunpack.i.h.bf16 %v2873_v0  ;;  %v2874_v8 = vunpack.i.l.bf16 %v2873_v0  ;;  %v1623_v3 = vsel %vm1604_vm11, %v1590_v14, %v2869_v57  ;;  %v1624_v7 = vsel %vm1604_vm11, %v1591_v41, %v2870_v9 }
 0x164   : > { %v2878_v2 = vpop.permute.xlu1 %2877  ;;  %v1462_v0 = vsel %vm349_vm4, %v3095_v52, %v2489_v32  ;;  %v1494_v9 = vsel %vm1472_vm7, %v1461_v31, %v2565_v62  ;;  %v4738_v52 = vld [vmem:[#allocation13_spill] sm:$0xff] }
 0x165   : > { %v2880_v43 = vunpack.i.h.bf16 %v2878_v2  ;;  %v2879_v5 = vunpack.i.l.bf16 %v2878_v2  ;;  %v1654_v59 = vsel %vm1637_vm12, %v1621_v35, %v2874_v8  ;;  %v1655_v63 = vsel %vm1637_vm12, %v1622_v60, %v2875_v44 }
 0x166   : > { %v2883_v39 = vpop.permute.xlu0 %2882  ;;  %v1496_v8 = vsel %vm1472_vm7, %v1463_v12, %v2570_v38  ;;  %v1495_v2 = vsel %vm1472_vm7, %v1462_v0, %v2569_v25  ;;  %v2495_v0 = vunpack.i.h.bf16 %v4738_v52 }
 0x167   : > { %v2885_v24 = vunpack.i.h.bf16 %v2883_v39  ;;  %v2884_v47 = vunpack.i.l.bf16 %v2883_v39  ;;  %v1656_v61 = vsel %vm1637_vm12, %v1623_v3, %v2879_v5  ;;  %v1657_v40 = vsel %vm1637_vm12, %v1624_v7, %v2880_v43 }
 0x168   : > { %v2888_v27 = vpop.permute.xlu1 %2887 }
 0x169   : > { %v2890_v1 = vunpack.i.h.bf16 %v2888_v27  ;;  %v2889_v16 = vunpack.i.l.bf16 %v2888_v27  ;;  %v1687_v21 = vsel %vm1670_vm13, %v1654_v59, %v2884_v47  ;;  %v1688_v49 = vsel %vm1670_vm13, %v1655_v63, %v2885_v24 }
 0x16a   : > { %v2893_v4 = vpop.permute.xlu0 %2892  ;;  %v1711_v13 = vpack.c.bf16 %v1688_v49, %v1687_v21 }
 0x16b   : > { %v1689_v45 = vsel %vm1670_vm13, %v1656_v61, %v2889_v16  ;;  %v1690_v29 = vsel %vm1670_vm13, %v1657_v40, %v2890_v1  ;;  %v2895_v15 = vunpack.i.h.bf16 %v2893_v4  ;;  %v2894_v42 = vunpack.i.l.bf16 %v2893_v4 }
 0x16c   : > { %v1712_v17 = vpack.c.bf16 %v1690_v29, %v1689_v45  ;;  %2390 = vmatprep.mubr.msk.bf16.mxu1 %vm1746_vm14, %v1711_v13  ;;  %v2898_v28 = vpop.permute.xlu1 %2897 }
 0x16d   : > { %v2900_v30 = vunpack.i.h.bf16 %v2898_v28  ;;  %v2899_v55 = vunpack.i.l.bf16 %v2898_v28  ;;  %v1526_v54 = vsel %vm1505_vm8, %v1493_v6, %v2894_v42  ;;  %v1527_v11 = vsel %vm1505_vm8, %v1494_v9, %v2895_v15 }
 0x16e   : > { %v2903_v50 = vpop.permute.xlu0 %2902  ;;  %2391 = vmatmul.mubr.msk.bf16.vlgmr.msra.gmra.mxu1 %vm1746_vm14, %v1712_v17 }
 0x16f   : > { %v2905_v57 = vunpack.i.h.bf16 %v2903_v50  ;;  %v2904_v44 = vunpack.i.l.bf16 %v2903_v50  ;;  %v1528_v5 = vsel %vm1505_vm8, %v1495_v2, %v2899_v55  ;;  %v1529_v39 = vsel %vm1505_vm8, %v1496_v8, %v2900_v30  ;;  %v4739_v55 = vld [vmem:[#allocation14_spill] sm:$0xff]  ;;  %v4741_v2 = vld [vmem:[#allocation5_spill] sm:$0xff] }
 0x170   : > { %v2908_v22 = vpop.permute.xlu1 %2907  ;;  %v2494_v30 = vunpack.i.l.bf16 %v4738_v52  ;;  %v2499_v6 = vunpack.i.l.bf16 %v4739_v55 }
 0x171   : > { %v2910_v46 = vunpack.i.h.bf16 %v2908_v22  ;;  %v2909_v14 = vunpack.i.l.bf16 %v2908_v22  ;;  %v1559_v47 = vsel %vm1538_vm9, %v1526_v54, %v2904_v44  ;;  %v1560_v3 = vsel %vm1538_vm9, %v1527_v11, %v2905_v57  ;;  %v4740_v57 = vld [vmem:[#allocation3_spill] sm:$0xff] }
 0x172   : > { %v2913_v19 = vpop.permute.xlu0 %2912  ;;  %v2575_v44 = vunpack.i.h.bf16 %v4740_v57  ;;  %v2574_v8 = vunpack.i.l.bf16 %v4740_v57  ;;  %v2580_v54 = vunpack.i.h.bf16 %v4741_v2  ;;  %v2579_v11 = vunpack.i.l.bf16 %v4741_v2 }
 0x173   : > { %v2915_v41 = vunpack.i.h.bf16 %v2913_v19  ;;  %v2914_v43 = vunpack.i.l.bf16 %v2913_v19  ;;  %v1561_v49 = vsel %vm1538_vm9, %v1528_v5, %v2909_v14  ;;  %v1562_v61 = vsel %vm1538_vm9, %v1529_v39, %v2910_v46  ;;  %v3097_v5 = vld [vmem:[#allocation2 + $0x120] sm:$0xff] }
 0x174   : > { %v2918_v20 = vpop.permute.xlu1 %2917  ;;  %v1464_v39 = vsel %vm349_vm4, %v3097_v5, %v2494_v30 }
 0x175   : > { %v2920_v35 = vunpack.i.h.bf16 %v2918_v20  ;;  %v2919_v60 = vunpack.i.l.bf16 %v2918_v20  ;;  %v1592_v40 = vsel %vm1571_vm10, %v1559_v47, %v2914_v43  ;;  %v1593_v4 = vsel %vm1571_vm10, %v1560_v3, %v2915_v41  ;;  %v3096_v41 = vld [vmem:[#allocation2 + $0x128] sm:$0xff] }
 0x176   : > { %v2923_v51 = vpop.permute.xlu0 %2922  ;;  %v1465_v43 = vsel %vm349_vm4, %v3096_v41, %v2495_v0 }
 0x177   : > { %v2925_v7 = vunpack.i.h.bf16 %v2923_v51  ;;  %v2924_v27 = vunpack.i.l.bf16 %v2923_v51  ;;  %v1594_v13 = vsel %vm1571_vm10, %v1561_v49, %v2919_v60  ;;  %v1595_v45 = vsel %vm1571_vm10, %v1562_v61, %v2920_v35  ;;  %v3098_v35 = vld [vmem:[#allocation2 + $0x140] sm:$0xff] }
 0x178   : > { %v2928_v58 = vpop.permute.xlu1 %2927  ;;  %v2500_v51 = vunpack.i.h.bf16 %v4739_v55 }
 0x179   : > { %v2930_v59 = vunpack.i.h.bf16 %v2928_v58  ;;  %v2929_v63 = vunpack.i.l.bf16 %v2928_v58  ;;  %v1625_v50 = vsel %vm1604_vm11, %v1592_v40, %v2924_v27  ;;  %v1626_v22 = vsel %vm1604_vm11, %v1593_v4, %v2925_v7 }
 0x17a   : > { %v2933_v24 = vpop.permute.xlu0 %2932  ;;  %v1467_v60 = vsel %vm349_vm4, %v3098_v35, %v2500_v51 }
 0x17b   : > { %v2935_v1 = vunpack.i.h.bf16 %v2933_v24  ;;  %v2934_v16 = vunpack.i.l.bf16 %v2933_v24  ;;  %v1627_v26 = vsel %vm1604_vm11, %v1594_v13, %v2929_v63  ;;  %v1628_v36 = vsel %vm1604_vm11, %v1595_v45, %v2930_v59  ;;  %v3099_v24 = vld [vmem:[#allocation2 + $0x138] sm:$0xff] }
 0x17c   : > { %v2938_v21 = vpop.permute.xlu1 %2937  ;;  %v1466_v47 = vsel %vm349_vm4, %v3099_v24, %v2499_v6  ;;  %v1497_v59 = vsel %vm1472_vm7, %v1464_v39, %v2574_v8  ;;  %v1498_v63 = vsel %vm1472_vm7, %v1465_v43, %v2575_v44 }
 0x17d   : > { %v2940_v29 = vunpack.i.h.bf16 %v2938_v21  ;;  %v2939_v17 = vunpack.i.l.bf16 %v2938_v21  ;;  %v1658_v32 = vsel %vm1637_vm12, %v1625_v50, %v2934_v16  ;;  %v1659_v19 = vsel %vm1637_vm12, %v1626_v22, %v2935_v1 }
 0x17e   : > { %v2943_v28 = vpop.permute.xlu0 %2942  ;;  %v1500_v21 = vsel %vm1472_vm7, %v1467_v60, %v2580_v54  ;;  %v1499_v49 = vsel %vm1472_vm7, %v1466_v47, %v2579_v11 }
 0x17f   : > { %v2945_v53 = vunpack.i.h.bf16 %v2943_v28  ;;  %v2944_v37 = vunpack.i.l.bf16 %v2943_v28  ;;  %v1660_v25 = vsel %vm1637_vm12, %v1627_v26, %v2939_v17  ;;  %v1661_v15 = vsel %vm1637_vm12, %v1628_v36, %v2940_v29 }
 0x180   : > { %v2948_v23 = vpop.permute.xlu1 %2947 }
 0x181   : > { %v1691_v62 = vsel %vm1670_vm13, %v1658_v32, %v2944_v37  ;;  %v1692_v10 = vsel %vm1670_vm13, %v1659_v19, %v2945_v53  ;;  %v2950_v56 = vunpack.i.h.bf16 %v2948_v23  ;;  %v2949_v38 = vunpack.i.l.bf16 %v2948_v23 }
 0x182   : > { %v1713_v42 = vpack.c.bf16 %v1692_v10, %v1691_v62  ;;  %v2953_v20 = vpop.permute.xlu0 %2952 }
 0x183   : > { %v1693_v48 = vsel %vm1670_vm13, %v1660_v25, %v2949_v38  ;;  %v1694_v31 = vsel %vm1670_vm13, %v1661_v15, %v2950_v56  ;;  %v2955_v58 = vunpack.i.h.bf16 %v2953_v20  ;;  %v2954_v46 = vunpack.i.l.bf16 %v2953_v20 }
 0x184   : > { %v1714_v18 = vpack.c.bf16 %v1694_v31, %v1693_v48  ;;  %2394 = vmatprep.mubr.msk.bf16.mxu1 %vm1746_vm14, %v1713_v42  ;;  %v2958_v34 = vpop.permute.xlu1 %2957 }
 0x185   : > { %v2960_v3 = vunpack.i.h.bf16 %v2958_v34  ;;  %v2959_v7 = vunpack.i.l.bf16 %v2958_v34  ;;  %v1530_v61 = vsel %vm1505_vm8, %v1497_v59, %v2954_v46  ;;  %v1531_v40 = vsel %vm1505_vm8, %v1498_v63, %v2955_v58 }
 0x186   : > { %v2963_v33 = vpop.permute.xlu0 %2962  ;;  %2395 = vmatmul.mubr.msk.bf16.gmra.mxu1 %vm1746_vm14, %v1714_v18 }
 0x187   : > { %v2965_v1 = vunpack.i.h.bf16 %v2963_v33  ;;  %v2964_v16 = vunpack.i.l.bf16 %v2963_v33  ;;  %v1532_v28 = vsel %vm1505_vm8, %v1499_v49, %v2959_v7  ;;  %v1533_v50 = vsel %vm1505_vm8, %v1500_v21, %v2960_v3  ;;  %v4742_v21 = vld [vmem:[#allocation6_spill] sm:$0xff] }
 0x188   : > { %v2968_v12 = vpop.permute.xlu1 %2967 }
 0x189   : > { %v2970_v13 = vunpack.i.h.bf16 %v2968_v12  ;;  %v2969_v45 = vunpack.i.l.bf16 %v2968_v12  ;;  %v1563_v26 = vsel %vm1538_vm9, %v1530_v61, %v2964_v16  ;;  %v1564_v36 = vsel %vm1538_vm9, %v1531_v40, %v2965_v1  ;;  %v4743_v61 = vld [vmem:[#allocation7_spill] sm:$0xff] }
 0x18a   : > { %v2973_v9 = vpop.permute.xlu0 %2972 }
 0x18b   : > { %v2975_v29 = vunpack.i.h.bf16 %v2973_v9  ;;  %v2974_v17 = vunpack.i.l.bf16 %v2973_v9  ;;  %v1565_v25 = vsel %vm1538_vm9, %v1532_v28, %v2969_v45  ;;  %v1566_v15 = vsel %vm1538_vm9, %v1533_v50, %v2970_v13  ;;  %v4744_v28 = vld [vmem:[#allocation9_spill] sm:$0xff] }
 0x18c   : > { %v2978_v14 = vpop.permute.xlu1 %2977 }
 0x18d   : > { %v2980_v22 = vunpack.i.h.bf16 %v2978_v14  ;;  %v2979_v53 = vunpack.i.l.bf16 %v2978_v14  ;;  %v1596_v42 = vsel %vm1571_vm10, %v1563_v26, %v2974_v17  ;;  %v1597_v20 = vsel %vm1571_vm10, %v1564_v36, %v2975_v29 }
 0x18e   : > { %v2983_v27 = vpop.permute.xlu0 %2982 }
 0x18f   : > { %v2985_v32 = vunpack.i.h.bf16 %v2983_v27  ;;  %v2984_v19 = vunpack.i.l.bf16 %v2983_v27  ;;  %v1598_v48 = vsel %vm1571_vm10, %v1565_v25, %v2979_v53  ;;  %v1599_v31 = vsel %vm1571_vm10, %v1566_v15, %v2980_v22  ;;  %v4745_v22 = vld [vmem:[#allocation8_spill] sm:$0xff] }
 0x190   : > { %v2988_v4 = vpop.permute.xlu1 %2987 }
 0x191   : > { %v2990_v23 = vunpack.i.h.bf16 %v2988_v4  ;;  %v2989_v62 = vunpack.i.l.bf16 %v2988_v4  ;;  %v1629_v12 = vsel %vm1604_vm11, %v1596_v42, %v2984_v19  ;;  %v1630_v52 = vsel %vm1604_vm11, %v1597_v20, %v2985_v32 }
 0x192   : > { %v2993_v37 = vpop.permute.xlu0 %2992 }
 0x193   : > { %v2995_v10 = vunpack.i.h.bf16 %v2993_v37  ;;  %v2994_v56 = vunpack.i.l.bf16 %v2993_v37  ;;  %v1631_v55 = vsel %vm1604_vm11, %v1598_v48, %v2989_v62  ;;  %v1632_v51 = vsel %vm1604_vm11, %v1599_v31, %v2990_v23 }
 0x194   : > { %v2998_v38 = vpop.permute.xlu1 %2997 }
 0x195   : > { %v3000_v18 = vunpack.i.h.bf16 %v2998_v38  ;;  %v2999_v34 = vunpack.i.l.bf16 %v2998_v38  ;;  %v1662_v6 = vsel %vm1637_vm12, %v1629_v12, %v2994_v56  ;;  %v1663_v9 = vsel %vm1637_vm12, %v1630_v52, %v2995_v10 }
 0x196   : > { %v3003_v33 = vpop.permute.xlu0 %3002 }
 0x197   : > { %v3005_v0 = vunpack.i.h.bf16 %v3003_v33  ;;  %v3004_v30 = vunpack.i.l.bf16 %v3003_v33  ;;  %v1664_v11 = vsel %vm1637_vm12, %v1631_v55, %v2999_v34  ;;  %v1665_v58 = vsel %vm1637_vm12, %v1632_v51, %v3000_v18 }
 0x198   : > { %v3008_v57 = vpop.permute.xlu1 %3007 }
 0x199   : > { %v1695_v44 = vsel %vm1670_vm13, %v1662_v6, %v3004_v30  ;;  %v1696_v8 = vsel %vm1670_vm13, %v1663_v9, %v3005_v0  ;;  %v3010_v2 = vunpack.i.h.bf16 %v3008_v57  ;;  %v3009_v54 = vunpack.i.l.bf16 %v3008_v57 }
 0x19a   : > { %v1715_v46 = vpack.c.bf16 %v1696_v8, %v1695_v44  ;;  %v3013_v14 = vpop.permute.xlu0 %3012 }
 0x19b   : > { %v1697_v41 = vsel %vm1670_vm13, %v1664_v11, %v3009_v54  ;;  %v1698_v43 = vsel %vm1670_vm13, %v1665_v58, %v3010_v2  ;;  %v3015_v47 = vunpack.i.h.bf16 %v3013_v14  ;;  %v3014_v3 = vunpack.i.l.bf16 %v3013_v14 }
 0x19c   : > { %v1716_v5 = vpack.c.bf16 %v1698_v43, %v1697_v41  ;;  %2398 = vmatprep.mubr.msk.bf16.mxu1 %vm1746_vm14, %v1715_v46  ;;  %v3018_v39 = vpop.permute.xlu1 %3017 }
 0x19d   : > { %v3020_v27 = vunpack.i.h.bf16 %v3018_v39  ;;  %v3019_v59 = vunpack.i.l.bf16 %v3018_v39  ;;  %v1534_v49 = vsel %vm1505_vm8, %v4742_v21, %v3014_v3  ;;  %v1535_v40 = vsel %vm1505_vm8, %v4743_v61, %v3015_v47 }
 0x19e   : > { %v3023_v35 = vpop.permute.xlu0 %3022  ;;  %2399 = vmatmul.mubr.msk.bf16.gmra.mxu1 %vm1746_vm14, %v1716_v5 }
 0x19f   : > { %v3025_v1 = vunpack.i.h.bf16 %v3023_v35  ;;  %v3024_v16 = vunpack.i.l.bf16 %v3023_v35  ;;  %v1536_v50 = vsel %vm1505_vm8, %v4744_v28, %v3019_v59  ;;  %v1537_v53 = vsel %vm1505_vm8, %v4745_v22, %v3020_v27  ;;  %v4452_v35 = vld [vmem:[%s4631_s2] ss:$0 sm:$0xff] }
 0x1a0   : > { %v3028_v60 = vpop.permute.xlu1 %3027 }
 0x1a1   : > { %v3030_v13 = vunpack.i.h.bf16 %v3028_v60  ;;  %v3029_v45 = vunpack.i.l.bf16 %v3028_v60  ;;  %v1567_v32 = vsel %vm1538_vm9, %v1534_v49, %v3024_v16  ;;  %v1568_v19 = vsel %vm1538_vm9, %v1535_v40, %v3025_v1 }
 0x1a2   : > { %v3033_v24 = vpop.permute.xlu0 %3032 }
 0x1a3   : > { %v3035_v29 = vunpack.i.h.bf16 %v3033_v24  ;;  %v3034_v17 = vunpack.i.l.bf16 %v3033_v24  ;;  %v1569_v42 = vsel %vm1538_vm9, %v1536_v50, %v3029_v45  ;;  %v1570_v20 = vsel %vm1538_vm9, %v1537_v53, %v3030_v13 }
 0x1a4   : > { %v3038_v7 = vpop.permute.xlu1 %3037 }
 0x1a5   : > { %v3040_v37 = vunpack.i.h.bf16 %v3038_v7  ;;  %v3039_v26 = vunpack.i.l.bf16 %v3038_v7  ;;  %v1600_v48 = vsel %vm1571_vm10, %v1567_v32, %v3034_v17  ;;  %v1601_v31 = vsel %vm1571_vm10, %v1568_v19, %v3035_v29 }
 0x1a6   : > { %v3043_v63 = vpop.permute.xlu0 %3042 }
 0x1a7   : > { %v3045_v23 = vunpack.i.h.bf16 %v3043_v63  ;;  %v3044_v62 = vunpack.i.l.bf16 %v3043_v63  ;;  %v1602_v18 = vsel %vm1571_vm10, %v1569_v42, %v3039_v26  ;;  %v1603_v34 = vsel %vm1571_vm10, %v1570_v20, %v3040_v37 }
 0x1a8   : > { %v3048_v4 = vpop.permute.xlu1 %3047 }
 0x1a9   : > { %v3050_v10 = vunpack.i.h.bf16 %v3048_v4  ;;  %v3049_v56 = vunpack.i.l.bf16 %v3048_v4  ;;  %v1633_v0 = vsel %vm1604_vm11, %v1600_v48, %v3044_v62  ;;  %v1634_v30 = vsel %vm1604_vm11, %v1601_v31, %v3045_v23 }
 0x1aa   : > { %v3053_v36 = vpop.permute.xlu0 %3052 }
 0x1ab   : > { %v3055_v38 = vunpack.i.h.bf16 %v3053_v36  ;;  %v3054_v25 = vunpack.i.l.bf16 %v3053_v36  ;;  %v1635_v6 = vsel %vm1604_vm11, %v1602_v18, %v3049_v56  ;;  %v1636_v9 = vsel %vm1604_vm11, %v1603_v34, %v3050_v10 }
 0x1ac   : > { %v3058_v15 = vpop.permute.xlu1 %3057 }
 0x1ad   : > { %v3060_v33 = vunpack.i.h.bf16 %v3058_v15  ;;  %v3059_v12 = vunpack.i.l.bf16 %v3058_v15  ;;  %v1666_v57 = vsel %vm1637_vm12, %v1633_v0, %v3054_v25  ;;  %v1667_v44 = vsel %vm1637_vm12, %v1634_v30, %v3055_v38 }
 0x1ae   : > { %v3063_v52 = vpop.permute.xlu0 %3062 }
 0x1af   : > { %v3065_v55 = vunpack.i.h.bf16 %v3063_v52  ;;  %v3064_v51 = vunpack.i.l.bf16 %v3063_v52  ;;  %v1668_v46 = vsel %vm1637_vm12, %v1635_v6, %v3059_v12  ;;  %v1669_v14 = vsel %vm1637_vm12, %v1636_v9, %v3060_v33 }
 0x1b0   : > { %v3068_v8 = vpop.permute.xlu1 %3067 }
 0x1b1   : > { %v1699_v2 = vsel %vm1670_vm13, %v1666_v57, %v3064_v51  ;;  %v1700_v54 = vsel %vm1670_vm13, %v1667_v44, %v3065_v55  ;;  %v3070_v11 = vunpack.i.h.bf16 %v3068_v8  ;;  %v3069_v58 = vunpack.i.l.bf16 %v3068_v8 }
 0x1b2   : > { %v1717_v41 = vpack.c.bf16 %v1700_v54, %v1699_v2 }
 0x1b3   : > { %v1701_v43 = vsel %vm1670_vm13, %v1668_v46, %v3069_v58  ;;  %v1702_v5 = vsel %vm1670_vm13, %v1669_v14, %v3070_v11 }
 0x1b4   : > { %v1718_v39 = vpack.c.bf16 %v1702_v5, %v1701_v43  ;;  %2402 = vmatprep.mubr.msk.bf16.mxu1 %vm1746_vm14, %v1717_v41 }
 0x1b6   : > { %2403 = vmatmul.mubr.msk.bf16.gmra.mxu1 %vm1746_vm14, %v1718_v39 }
 0x1de   : > { %v2376_v60 = vpop.f32.mrf.mxu0 }
 0x1df   : > { %v1842_v24 = vadd.f32 %v2376_v60, %v4452_v35 }
 0x1e0   : > { %v1833_v47 = vpop.f32.mrf.mxu0 }
 0x1e1   : > { %1962 = vst.msk [vmem:[%s3163_s28 + $0x10] sm:$0xff] %vm1670_vm13, %v1842_v24  ;;  %v1834_v3 = vadd.f32 %v4452_v35, %v1833_v47  ;;  %v2068_v16 = vmul.f32 %v1842_v24, %v1842_v24  ;;  %v1996_v4 = vsel %vm1670_vm13, %v1842_v24, 0.0 }
 0x1e2   : > { %v2377_v7 = vpop.f32.mrf.mxu0 }
 0x1e3   : > { %1960 = vst.msk [vmem:[%s3163_s28] sm:$0xff] %vm1670_vm13, %v1834_v3  ;;  %v1845_v27 = vadd.f32 %v2377_v7, %v4452_v35  ;;  %v2066_v63 = vmul.f32 %v1834_v3, %v1834_v3  ;;  %v1993_v21 = vsel %vm1670_vm13, %v1834_v3, 0.0  ;;  %v2101_v50 = vsel %vm1670_vm13, %v2068_v16, 0.0 }
 0x1e4   : > { %v1836_v59 = vpop.f32.mrf.mxu0 }
 0x1e5   : > { %1963 = vst.msk [vmem:[%s3163_s28 + $0x18] sm:$0xff] %vm1670_vm13, %v1845_v27  ;;  %v1837_v1 = vadd.f32 %v4452_v35, %v1836_v59  ;;  %v2098_v13 = vsel %vm1670_vm13, %v2066_v63, 0.0  ;;  %v2069_v45 = vmul.f32 %v1845_v27, %v1845_v27  ;;  %v1998_v22 = vsel %vm1670_vm13, %v1845_v27, 0.0 }
 0x1e7   : > { %1961 = vst.msk [vmem:[%s3163_s28 + $0x8] sm:$0xff] %vm1670_vm13, %v1837_v1  ;;  %v1994_v49 = vsel %vm1670_vm13, %v1837_v1, 0.0  ;;  %v2067_v61 = vmul.f32 %v1837_v1, %v1837_v1  ;;  %v2103_v26 = vsel %vm1670_vm13, %v2069_v45, 0.0 }
 0x1e8   : > { %v1995_v40 = vadd.f32 %v1994_v49, %v1993_v21 }
 0x1e9   : > { %v2099_v29 = vsel %vm1670_vm13, %v2067_v61, 0.0 }
 0x1ea   : > { %v1997_v17 = vadd.f32 %v1996_v4, %v1995_v40  ;;  %v2100_v28 = vadd.f32 %v2099_v29, %v2098_v13 }
 0x1ec   : > { %v2102_v53 = vadd.f32 %v2101_v50, %v2100_v28  ;;  %v1999_v37 = vadd.f32 %v1998_v22, %v1997_v17 }
 0x1ee   : > { %v2104_v36 = vadd.f32 %v2103_v26, %v2102_v53 }
 0x1f2   : > { %v2380_v32 = vpop.f32.mrf.mxu0 }
 0x1f3   : > { %v1858_v19 = vadd.f32 %v2380_v32, %v4452_v35 }
 0x1f4   : > { %v1849_v23 = vpop.f32.mrf.mxu0 }
 0x1f5   : > { %1966 = vst.msk [vmem:[%s3163_s28 + $0x30] sm:$0xff] %vm1670_vm13, %v1858_v19  ;;  %v1850_v62 = vadd.f32 %v4452_v35, %v1849_v23  ;;  %v2072_v18 = vmul.f32 %v1858_v19, %v1858_v19  ;;  %v2004_v52 = vsel %vm1670_vm13, %v1858_v19, 0.0 }
 0x1f6   : > { %v2381_v10 = vpop.f32.mrf.mxu0 }
 0x1f7   : > { %1964 = vst.msk [vmem:[%s3163_s28 + $0x20] sm:$0xff] %vm1670_vm13, %v1850_v62  ;;  %v2000_v56 = vsel %vm1670_vm13, %v1850_v62, 0.0  ;;  %v2070_v38 = vmul.f32 %v1850_v62, %v1850_v62  ;;  %v1861_v25 = vadd.f32 %v2381_v10, %v4452_v35  ;;  %v2109_v6 = vsel %vm1670_vm13, %v2072_v18, 0.0 }
 0x1f8   : > { %v2001_v15 = vadd.f32 %v2000_v56, %v1999_v37  ;;  %v1852_v42 = vpop.f32.mrf.mxu0 }
 0x1f9   : > { %v2105_v20 = vsel %vm1670_vm13, %v2070_v38, 0.0  ;;  %1967 = vst.msk [vmem:[%s3163_s28 + $0x38] sm:$0xff] %vm1670_vm13, %v1861_v25  ;;  %v1853_v48 = vadd.f32 %v4452_v35, %v1852_v42  ;;  %v2073_v0 = vmul.f32 %v1861_v25, %v1861_v25  ;;  %v2006_v9 = vsel %vm1670_vm13, %v1861_v25, 0.0 }
 0x1fa   : > { %v2106_v31 = vadd.f32 %v2105_v20, %v2104_v36 }
 0x1fb   : > { %1965 = vst.msk [vmem:[%s3163_s28 + $0x28] sm:$0xff] %vm1670_vm13, %v1853_v48  ;;  %v2002_v34 = vsel %vm1670_vm13, %v1853_v48, 0.0  ;;  %v2071_v33 = vmul.f32 %v1853_v48, %v1853_v48  ;;  %v2111_v8 = vsel %vm1670_vm13, %v2073_v0, 0.0 }
 0x1fc   : > { %v2003_v12 = vadd.f32 %v2002_v34, %v2001_v15 }
 0x1fd   : > { %v2107_v30 = vsel %vm1670_vm13, %v2071_v33, 0.0 }
 0x1fe   : > { %v2005_v55 = vadd.f32 %v2004_v52, %v2003_v12  ;;  %v2108_v51 = vadd.f32 %v2107_v30, %v2106_v31 }
 0x200   : > { %v2110_v57 = vadd.f32 %v2109_v6, %v2108_v51  ;;  %v2007_v44 = vadd.f32 %v2006_v9, %v2005_v55 }
 0x202   : > { %v2112_v2 = vadd.f32 %v2111_v8, %v2110_v57 }
 0x206   : > { %v2384_v54 = vpop.f32.mrf.mxu0 }
 0x207   : > { %v1874_v11 = vadd.f32 %v2384_v54, %v4452_v35 }
 0x208   : > { %v1865_v58 = vpop.f32.mrf.mxu0 }
 0x209   : > { %1970 = vst.msk [vmem:[%s3163_s28 + $0x50] sm:$0xff] %vm1670_vm13, %v1874_v11  ;;  %v1866_v46 = vadd.f32 %v4452_v35, %v1865_v58  ;;  %v2076_v7 = vmul.f32 %v1874_v11, %v1874_v11  ;;  %v2012_v1 = vsel %vm1670_vm13, %v1874_v11, 0.0 }
 0x20a   : > { %v2385_v14 = vpop.f32.mrf.mxu0 }
 0x20b   : > { %1968 = vst.msk [vmem:[%s3163_s28 + $0x40] sm:$0xff] %vm1670_vm13, %v1866_v46  ;;  %v2008_v41 = vsel %vm1670_vm13, %v1866_v46, 0.0  ;;  %v2074_v43 = vmul.f32 %v1866_v46, %v1866_v46  ;;  %v1877_v5 = vadd.f32 %v2385_v14, %v4452_v35  ;;  %v2117_v40 = vsel %vm1670_vm13, %v2076_v7, 0.0 }
 0x20c   : > { %v2009_v39 = vadd.f32 %v2008_v41, %v2007_v44  ;;  %v1868_v60 = vpop.f32.mrf.mxu0 }
 0x20d   : > { %v2113_v24 = vsel %vm1670_vm13, %v2074_v43, 0.0  ;;  %1971 = vst.msk [vmem:[%s3163_s28 + $0x58] sm:$0xff] %vm1670_vm13, %v1877_v5  ;;  %v1869_v47 = vadd.f32 %v4452_v35, %v1868_v60  ;;  %v2077_v16 = vmul.f32 %v1877_v5, %v1877_v5  ;;  %v2014_v4 = vsel %vm1670_vm13, %v1877_v5, 0.0 }
 0x20e   : > { %v2114_v3 = vadd.f32 %v2113_v24, %v2112_v2 }
 0x20f   : > { %1969 = vst.msk [vmem:[%s3163_s28 + $0x48] sm:$0xff] %vm1670_vm13, %v1869_v47  ;;  %v2010_v27 = vsel %vm1670_vm13, %v1869_v47, 0.0  ;;  %v2075_v59 = vmul.f32 %v1869_v47, %v1869_v47  ;;  %v2119_v29 = vsel %vm1670_vm13, %v2077_v16, 0.0 }
 0x210   : > { %v2011_v63 = vadd.f32 %v2010_v27, %v2009_v39 }
 0x211   : > { %v2115_v21 = vsel %vm1670_vm13, %v2075_v59, 0.0 }
 0x212   : > { %v2013_v49 = vadd.f32 %v2012_v1, %v2011_v63  ;;  %v2116_v61 = vadd.f32 %v2115_v21, %v2114_v3 }
 0x214   : > { %v2118_v13 = vadd.f32 %v2117_v40, %v2116_v61  ;;  %v2015_v45 = vadd.f32 %v2014_v4, %v2013_v49 }
 0x216   : > { %v2120_v17 = vadd.f32 %v2119_v29, %v2118_v13 }
 0x21a   : > { %v2388_v28 = vpop.f32.mrf.mxu0 }
 0x21b   : > { %v1890_v50 = vadd.f32 %v2388_v28, %v4452_v35 }
 0x21c   : > { %v1881_v22 = vpop.f32.mrf.mxu0 }
 0x21d   : > { %1974 = vst.msk [vmem:[%s3163_s28 + $0x70] sm:$0xff] %vm1670_vm13, %v1890_v50  ;;  %v1882_v53 = vadd.f32 %v4452_v35, %v1881_v22  ;;  %v2080_v56 = vmul.f32 %v1890_v50, %v1890_v50  ;;  %v2020_v20 = vsel %vm1670_vm13, %v1890_v50, 0.0 }
 0x21e   : > { %v2389_v37 = vpop.f32.mrf.mxu0 }
 0x21f   : > { %1972 = vst.msk [vmem:[%s3163_s28 + $0x60] sm:$0xff] %vm1670_vm13, %v1882_v53  ;;  %v2016_v26 = vsel %vm1670_vm13, %v1882_v53, 0.0  ;;  %v2078_v36 = vmul.f32 %v1882_v53, %v1882_v53  ;;  %v1893_v32 = vadd.f32 %v2389_v37, %v4452_v35  ;;  %v2125_v33 = vsel %vm1670_vm13, %v2080_v56, 0.0 }
 0x220   : > { %v1884_v19 = vpop.f32.mrf.mxu0  ;;  %v2017_v10 = vadd.f32 %v2016_v26, %v2015_v45 }
 0x221   : > { %v2121_v23 = vsel %vm1670_vm13, %v2078_v36, 0.0  ;;  %1975 = vst.msk [vmem:[%s3163_s28 + $0x78] sm:$0xff] %vm1670_vm13, %v1893_v32  ;;  %v1885_v62 = vadd.f32 %v4452_v35, %v1884_v19  ;;  %v2081_v48 = vmul.f32 %v1893_v32, %v1893_v32  ;;  %v2022_v12 = vsel %vm1670_vm13, %v1893_v32, 0.0 }
 0x222   : > { %v2122_v15 = vadd.f32 %v2121_v23, %v2120_v17 }
 0x223   : > { %1973 = vst.msk [vmem:[%s3163_s28 + $0x68] sm:$0xff] %vm1670_vm13, %v1885_v62  ;;  %v2018_v38 = vsel %vm1670_vm13, %v1885_v62, 0.0  ;;  %v2079_v25 = vmul.f32 %v1885_v62, %v1885_v62  ;;  %v2127_v30 = vsel %vm1670_vm13, %v2081_v48, 0.0 }
 0x224   : > { %v2019_v42 = vadd.f32 %v2018_v38, %v2017_v10 }
 0x225   : > { %v2123_v31 = vsel %vm1670_vm13, %v2079_v25, 0.0 }
 0x226   : > { %v2021_v18 = vadd.f32 %v2020_v20, %v2019_v42  ;;  %v2124_v34 = vadd.f32 %v2123_v31, %v2122_v15 }
 0x228   : > { %v2126_v52 = vadd.f32 %v2125_v33, %v2124_v34  ;;  %v2023_v0 = vadd.f32 %v2022_v12, %v2021_v18 }
 0x22a   : > { %v2128_v55 = vadd.f32 %v2127_v30, %v2126_v52 }
 0x22e   : > { %v2392_v51 = vpop.f32.mrf.mxu1 }
 0x22f   : > { %v1906_v6 = vadd.f32 %v2392_v51, %v4452_v35 }
 0x230   : > { %v1897_v9 = vpop.f32.mrf.mxu1 }
 0x231   : > { %1978 = vst.msk [vmem:[%s3163_s28 + $0x90] sm:$0xff] %vm1670_vm13, %v1906_v6  ;;  %v1898_v57 = vadd.f32 %v4452_v35, %v1897_v9  ;;  %v2084_v16 = vmul.f32 %v1906_v6, %v1906_v6  ;;  %v2028_v61 = vsel %vm1670_vm13, %v1906_v6, 0.0 }
 0x232   : > { %v2393_v44 = vpop.f32.mrf.mxu1 }
 0x233   : > { %1976 = vst.msk [vmem:[%s3163_s28 + $0x80] sm:$0xff] %vm1670_vm13, %v1898_v57  ;;  %v1909_v8 = vadd.f32 %v2393_v44, %v4452_v35  ;;  %v2082_v60 = vmul.f32 %v1898_v57, %v1898_v57  ;;  %v2024_v24 = vsel %vm1670_vm13, %v1898_v57, 0.0  ;;  %v2133_v45 = vsel %vm1670_vm13, %v2084_v16, 0.0 }
 0x234   : > { %v1900_v2 = vpop.f32.mrf.mxu1  ;;  %v2025_v27 = vadd.f32 %v2024_v24, %v2023_v0 }
 0x235   : > { %1979 = vst.msk [vmem:[%s3163_s28 + $0x98] sm:$0xff] %vm1670_vm13, %v1909_v8  ;;  %v1901_v54 = vadd.f32 %v4452_v35, %v1900_v2  ;;  %v2129_v3 = vsel %vm1670_vm13, %v2082_v60, 0.0  ;;  %v2085_v29 = vmul.f32 %v1909_v8, %v1909_v8  ;;  %v2030_v53 = vsel %vm1670_vm13, %v1909_v8, 0.0 }
 0x236   : > { %v2130_v63 = vadd.f32 %v2129_v3, %v2128_v55 }
 0x237   : > { %1977 = vst.msk [vmem:[%s3163_s28 + $0x88] sm:$0xff] %vm1670_vm13, %v1901_v54  ;;  %v2083_v47 = vmul.f32 %v1901_v54, %v1901_v54  ;;  %v2026_v7 = vsel %vm1670_vm13, %v1901_v54, 0.0  ;;  %v2135_v23 = vsel %vm1670_vm13, %v2085_v29, 0.0 }
 0x238   : > { %v2027_v1 = vadd.f32 %v2026_v7, %v2025_v27 }
 0x239   : > { %v2131_v59 = vsel %vm1670_vm13, %v2083_v47, 0.0 }
 0x23a   : > { %v2132_v21 = vadd.f32 %v2131_v59, %v2130_v63  ;;  %v2029_v4 = vadd.f32 %v2028_v61, %v2027_v1 }
 0x23c   : > { %v2134_v50 = vadd.f32 %v2133_v45, %v2132_v21  ;;  %v2031_v32 = vadd.f32 %v2030_v53, %v2029_v4 }
 0x23e   : > { %v2136_v25 = vadd.f32 %v2135_v23, %v2134_v50 }
 0x246   : > { %v2396_v11 = vpop.f32.mrf.mxu1 }
 0x247   : > { %v1922_v58 = vadd.f32 %v2396_v11, %v4452_v35 }
 0x248   : > { %v1913_v46 = vpop.f32.mrf.mxu1 }
 0x249   : > { %1982 = vst.msk [vmem:[%s3163_s28 + $0xb0] sm:$0xff] %vm1670_vm13, %v1922_v58  ;;  %v1914_v14 = vadd.f32 %v4452_v35, %v1913_v46  ;;  %v2088_v48 = vmul.f32 %v1922_v58, %v1922_v58  ;;  %v2036_v18 = vsel %vm1670_vm13, %v1922_v58, 0.0 }
 0x24a   : > { %v2397_v41 = vpop.f32.mrf.mxu1 }
 0x24b   : > { %1980 = vst.msk [vmem:[%s3163_s28 + $0xa0] sm:$0xff] %vm1670_vm13, %v1914_v14  ;;  %v1925_v43 = vadd.f32 %v2397_v41, %v4452_v35  ;;  %v2086_v17 = vmul.f32 %v1914_v14, %v1914_v14  ;;  %v2032_v37 = vsel %vm1670_vm13, %v1914_v14, 0.0  ;;  %v2141_v33 = vsel %vm1670_vm13, %v2088_v48, 0.0 }
 0x24c   : > { %v1916_v5 = vpop.f32.mrf.mxu1  ;;  %v2033_v38 = vadd.f32 %v2032_v37, %v2031_v32 }
 0x24d   : > { %1983 = vst.msk [vmem:[%s3163_s28 + $0xb8] sm:$0xff] %vm1670_vm13, %v1925_v43  ;;  %v1917_v39 = vadd.f32 %v4452_v35, %v1916_v5  ;;  %v2137_v62 = vsel %vm1670_vm13, %v2086_v17, 0.0  ;;  %v2089_v12 = vmul.f32 %v1925_v43, %v1925_v43  ;;  %v2038_v30 = vsel %vm1670_vm13, %v1925_v43, 0.0 }
 0x24e   : > { %v2138_v42 = vadd.f32 %v2137_v62, %v2136_v25 }
 0x24f   : > { %1981 = vst.msk [vmem:[%s3163_s28 + $0xa8] sm:$0xff] %vm1670_vm13, %v1917_v39  ;;  %v2087_v26 = vmul.f32 %v1917_v39, %v1917_v39  ;;  %v2034_v10 = vsel %vm1670_vm13, %v1917_v39, 0.0  ;;  %v2143_v9 = vsel %vm1670_vm13, %v2089_v12, 0.0 }
 0x250   : > { %v2035_v20 = vadd.f32 %v2034_v10, %v2033_v38 }
 0x251   : > { %v2139_v15 = vsel %vm1670_vm13, %v2087_v26, 0.0 }
 0x252   : > { %v2140_v31 = vadd.f32 %v2139_v15, %v2138_v42  ;;  %v2037_v34 = vadd.f32 %v2036_v18, %v2035_v20 }
 0x254   : > { %v2142_v0 = vadd.f32 %v2141_v33, %v2140_v31  ;;  %v2039_v6 = vadd.f32 %v2038_v30, %v2037_v34  ;;  %v1992_v33 = vld [vmem:[%s4633_s4] sm:$0x1] }
 0x256   : > { %v2144_v2 = vadd.f32 %v2143_v9, %v2142_v0  ;;  %v2065_v0 = vld [vmem:[%s4634_s5] sm:$0x1] }
 0x25e   : > { %v2400_v49 = vpop.f32.mrf.mxu1 }
 0x25f   : > { %v1938_v40 = vadd.f32 %v2400_v49, %v4452_v35 }
 0x260   : > { %v1929_v13 = vpop.f32.mrf.mxu1 }
 0x261   : > { %1986 = vst.msk [vmem:[%s3163_s28 + $0xd0] sm:$0xff] %vm1670_vm13, %v1938_v40  ;;  %v1930_v28 = vadd.f32 %v4452_v35, %v1929_v13  ;;  %v2092_v46 = vmul.f32 %v1938_v40, %v1938_v40  ;;  %v2044_v43 = vsel %vm1670_vm13, %v1938_v40, 0.0 }
 0x262   : > { %v2401_v22 = vpop.f32.mrf.mxu1 }
 0x263   : > { %1984 = vst.msk [vmem:[%s3163_s28 + $0xc0] sm:$0xff] %vm1670_vm13, %v1930_v28  ;;  %v1941_v36 = vadd.f32 %v2401_v22, %v4452_v35  ;;  %v2090_v52 = vmul.f32 %v1930_v28, %v1930_v28  ;;  %v2040_v55 = vsel %vm1670_vm13, %v1930_v28, 0.0  ;;  %v2149_v24 = vsel %vm1670_vm13, %v2092_v46, 0.0 }
 0x264   : > { %v1932_v19 = vpop.f32.mrf.mxu1  ;;  %v2041_v8 = vadd.f32 %v2040_v55, %v2039_v6 }
 0x265   : > { %1987 = vst.msk [vmem:[%s3163_s28 + $0xd8] sm:$0xff] %vm1670_vm13, %v1941_v36  ;;  %v1933_v56 = vadd.f32 %v4452_v35, %v1932_v19  ;;  %v2145_v57 = vsel %vm1670_vm13, %v2090_v52, 0.0  ;;  %v2093_v47 = vmul.f32 %v1941_v36, %v1941_v36  ;;  %v2046_v59 = vsel %vm1670_vm13, %v1941_v36, 0.0 }
 0x266   : > { %v2146_v11 = vadd.f32 %v2145_v57, %v2144_v2 }
 0x267   : > { %1985 = vst.msk [vmem:[%s3163_s28 + $0xc8] sm:$0xff] %vm1670_vm13, %v1933_v56  ;;  %v2091_v51 = vmul.f32 %v1933_v56, %v1933_v56  ;;  %v2042_v44 = vsel %vm1670_vm13, %v1933_v56, 0.0  ;;  %v2151_v61 = vsel %vm1670_vm13, %v2093_v47, 0.0 }
 0x268   : > { %v2043_v58 = vadd.f32 %v2042_v44, %v2041_v8 }
 0x269   : > { %v2147_v54 = vsel %vm1670_vm13, %v2091_v51, 0.0 }
 0x26a   : > { %v2148_v14 = vadd.f32 %v2147_v54, %v2146_v11  ;;  %v2045_v39 = vadd.f32 %v2044_v43, %v2043_v58 }
 0x26c   : > { %v2150_v7 = vadd.f32 %v2149_v24, %v2148_v14  ;;  %v2047_v21 = vadd.f32 %v2046_v59, %v2045_v39 }
 0x26e   : > { %v2152_v45 = vadd.f32 %v2151_v61, %v2150_v7 }
 0x276   : > { %v2404_v41 = vpop.f32.mrf.mxu1 }
 0x277   : > { %v1954_v5 = vadd.f32 %v2404_v41, %v4452_v35 }
 0x278   : > { %v1945_v60 = vpop.f32.mrf.mxu1 }
 0x279   : > { %1990 = vst.msk [vmem:[%s3163_s28 + $0xf0] sm:$0xff] %vm1670_vm13, %v1954_v5  ;;  %v1946_v3 = vadd.f32 %v4452_v35, %v1945_v60  ;;  %v2096_v29 = vmul.f32 %v1954_v5, %v1954_v5  ;;  %v2052_v53 = vsel %vm1670_vm13, %v1954_v5, 0.0 }
 0x27a   : > { %v2405_v27 = vpop.f32.mrf.mxu1 }
 0x27b   : > { %1988 = vst.msk [vmem:[%s3163_s28 + $0xe0] sm:$0xff] %vm1670_vm13, %v1946_v3  ;;  %v2048_v63 = vsel %vm1670_vm13, %v1946_v3, 0.0  ;;  %v2094_v1 = vmul.f32 %v1946_v3, %v1946_v3  ;;  %v1957_v16 = vadd.f32 %v2405_v27, %v4452_v35  ;;  %v2157_v19 = vsel %vm1670_vm13, %v2096_v29, 0.0 }
 0x27c   : > { %v1948_v49 = vpop.f32.mrf.mxu1  ;;  %v2049_v13 = vadd.f32 %v2048_v63, %v2047_v21 }
 0x27d   : > { %v2153_v40 = vsel %vm1670_vm13, %v2094_v1, 0.0  ;;  %1991 = vst.msk [vmem:[%s3163_s28 + $0xf8] sm:$0xff] %vm1670_vm13, %v1957_v16  ;;  %v1949_v4 = vadd.f32 %v4452_v35, %v1948_v49  ;;  %v2097_v37 = vmul.f32 %v1957_v16, %v1957_v16  ;;  %v2054_v35 = vsel %vm1670_vm13, %v1957_v16, 0.0 }
 0x27e   : > { %v2154_v50 = vadd.f32 %v2153_v40, %v2152_v45 }
 0x27f   : > { %1989 = vst.msk [vmem:[%s3163_s28 + $0xe8] sm:$0xff] %vm1670_vm13, %v1949_v4  ;;  %v2050_v17 = vsel %vm1670_vm13, %v1949_v4, 0.0  ;;  %v2095_v28 = vmul.f32 %v1949_v4, %v1949_v4  ;;  %v2159_v10 = vsel %vm1670_vm13, %v2097_v37, 0.0 }
 0x280   : > { %v2051_v22 = vadd.f32 %v2050_v17, %v2049_v13 }
 0x281   : > { %v2155_v26 = vsel %vm1670_vm13, %v2095_v28, 0.0 }
 0x282   : > { %v2053_v36 = vadd.f32 %v2052_v53, %v2051_v22  ;;  %v2156_v32 = vadd.f32 %v2155_v26, %v2154_v50 }
 0x284   : > { %v2055_v23 = vadd.f32 %v2054_v35, %v2053_v36  ;;  %v2158_v62 = vadd.f32 %v2157_v19, %v2156_v32 }
 0x286   : > { %v2056_v56 = vrot.slane %v2055_v23, 4  ;;  %v2160_v38 = vadd.f32 %v2159_v10, %v2158_v62 }
 0x288   : > { %v2057_v25 = vadd.f32 %v2056_v56, %v2055_v23  ;;  %v2161_v15 = vrot.slane %v2160_v38, 4 }
 0x28a   : > { %v2058_v42 = vrot.slane %v2057_v25, 2  ;;  %v2162_v20 = vadd.f32 %v2161_v15, %v2160_v38 }
 0x28c   : > { %v2059_v48 = vadd.f32 %v2058_v42, %v2057_v25  ;;  %v2163_v31 = vrot.slane %v2162_v20, 2 }
 0x28e   : > { %v2060_v18 = vrot.slane %v2059_v48, 1  ;;  %v2164_v34 = vadd.f32 %v2163_v31, %v2162_v20 }
 0x290   : > { %v2061_v12 = vadd.f32 %v2060_v18, %v2059_v48  ;;  %v2165_v52 = vrot.slane %v2164_v34, 1 }
 0x292   : > { %v2062_v30 = vadd.f32 %v2061_v12, %v1992_v33  ;;  %v2166_v55 = vadd.f32 %v2165_v52, %v2164_v34 }
 0x294   : > { %2064 = vst.msk [vmem:[%s4633_s4] sm:$0x1] %vm2063_vm15, %v2062_v30  ;;  %v2167_v51 = vadd.f32 %v2166_v55, %v2065_v0 }
 0x296   : > { %2168 = vst.msk [vmem:[%s4634_s5] sm:$0x1] %vm2063_vm15, %v2167_v51 }
 0x297 PF: > { %s16_s18 = sadd.s32 1, %s3106_s18  }
 0x298   : > { %p13_p5 = scmp.ge.s32.totalorder %s16_s18, 4  }
 0x29a   :  { %15 = sbr.rel (!%p13_p5) target bundleno = 1 (0x1), region = 83 }

// kernel: double_conv_forward.4
= control target key start
LH: loop header
LB: loop body
LE: loop exit
PB: predicated region body
PF: predicated region fallthrough
CT: control target
= control target key end

     0   :  { %s3310_s24 = smov 0   ;;  %s4889_s0 = inlined_call_operand.vmem [shape: f32[2,16,16,32], index: 0, kind: input, shape index: {}]   ;;  %s4890_s1 = inlined_call_operand.vmem [shape: f32[1,32], index: 1, kind: input, shape index: {}]   ;;  %s4891_s2 = inlined_call_operand.vmem [shape: f32[1,32], index: 2, kind: input, shape index: {}]   ;;  %s4892_s3 = inlined_call_operand.vmem [shape: bf16[288,32], index: 3, kind: input, shape index: {}]   ;;  %s4893_s4 = inlined_call_operand.vmem [shape: f32[1,32], index: 4, kind: input, shape index: {}]   ;;  %s4894_s5 = inlined_call_operand.vmem [shape: f32[2,16,16,32], index: 5, kind: output, shape index: {0}]   ;;  %s4895_s6 = inlined_call_operand.vmem [shape: f32[1,32], index: 6, kind: output, shape index: {1}]   ;;  %s4896_s7 = inlined_call_operand.vmem [shape: f32[1,32], index: 7, kind: output, shape index: {2}]  }
   0x1 LB: > { %s2483_s25 = sadd.s32 4294967295, %s3264_s24   ;;  %p2487_p0 = scmp.ge.s32.totalorder %s3264_s24, 1  ;;  %s3264_s24 = sphi %s3310_s24, %s18_s24  }
   0x2   : > { %p232_p1 = scmp.lt.s32.totalorder %s3264_s24, 3 }
   0x4   : > { %p233_p2 = pnand %p2487_p0, %p232_p1 }
   0x6   : > { %236 = sbr.rel (%p233_p2) target bundleno = 616 (0x268), region = 40 }
   0xb   : > { %p264_p3 = scmp.lt.s32.totalorder %s2483_s25, 1  ;;  %p2492_p4 = scmp.ne.s32.totalorder %s2483_s25, 0 }
   0xd   : > { %s265_s26 = scalar_select %p264_p3, %s2483_s25, 1 }
   0xe   : > { %278 = sbr.rel (%p2492_p4) target bundleno = 48 (0x30), region = 44 }
   0xf   : > { %s2532_s27 = sshll.u32 %s265_s26, 8 }
  0x10   : > { %s3321_s30 = scalar_lea.vmem %s4889_s0, %s2532_s27  ;;  %s3326_s10 = scalar_lea.vmem %s4894_s5, %s2532_s27 }
  0x13   : > { %vm279_vm0 = vcmask 261120   ;;  %vm282_vm1 = vcmask 254976   ;;  %vm335_vm2 = vcmask 253952   ;;  %v3266_v0 = vmov 0.0  }
  0x14   : > { %280 = vst.msk [vmem:[#allocation2] sm:$0xff] %vm279_vm0, %v3266_v0  ;;  %281 = vst.msk [vmem:[#allocation2 + $0x8] sm:$0xff] %vm279_vm0, %v3266_v0 }
  0x15   : > { %284 = vst.msk [vmem:[#allocation2 + $0x18] sm:$0xff] %vm279_vm0, %v3266_v0  ;;  %285 = vst.msk [vmem:[#allocation2 + $0x20] sm:$0xff] %vm279_vm0, %v3266_v0 }
  0x16   : > { %287 = vst.msk [vmem:[#allocation2 + $0x30] sm:$0xff] %vm279_vm0, %v3266_v0  ;;  %288 = vst.msk [vmem:[#allocation2 + $0x38] sm:$0xff] %vm279_vm0, %v3266_v0 }
  0x17   : > { %290 = vst.msk [vmem:[#allocation2 + $0x48] sm:$0xff] %vm279_vm0, %v3266_v0  ;;  %291 = vst.msk [vmem:[#allocation2 + $0x50] sm:$0xff] %vm279_vm0, %v3266_v0 }
  0x18   : > { %293 = vst.msk [vmem:[#allocation2 + $0x60] sm:$0xff] %vm279_vm0, %v3266_v0  ;;  %294 = vst.msk [vmem:[#allocation2 + $0x68] sm:$0xff] %vm279_vm0, %v3266_v0 }
  0x19   : > { %296 = vst.msk [vmem:[#allocation2 + $0x78] sm:$0xff] %vm279_vm0, %v3266_v0  ;;  %297 = vst.msk [vmem:[#allocation2 + $0x80] sm:$0xff] %vm279_vm0, %v3266_v0 }
  0x1a   : > { %299 = vst.msk [vmem:[#allocation2 + $0x90] sm:$0xff] %vm279_vm0, %v3266_v0  ;;  %300 = vst.msk [vmem:[#allocation2 + $0x98] sm:$0xff] %vm279_vm0, %v3266_v0 }
  0x1b   : > { %302 = vst.msk [vmem:[#allocation2 + $0xa8] sm:$0xff] %vm279_vm0, %v3266_v0  ;;  %303 = vst.msk [vmem:[#allocation2 + $0xb0] sm:$0xff] %vm279_vm0, %v3266_v0 }
  0x1c   : > { %305 = vst.msk [vmem:[#allocation2 + $0xc0] sm:$0xff] %vm279_vm0, %v3266_v0  ;;  %306 = vst.msk [vmem:[#allocation2 + $0xc8] sm:$0xff] %vm279_vm0, %v3266_v0 }
  0x1d   : > { %308 = vst.msk [vmem:[#allocation2 + $0xd8] sm:$0xff] %vm279_vm0, %v3266_v0  ;;  %309 = vst.msk [vmem:[#allocation2 + $0xe0] sm:$0xff] %vm279_vm0, %v3266_v0 }
  0x1e   : > { %311 = vst.msk [vmem:[#allocation2 + $0xf0] sm:$0xff] %vm279_vm0, %v3266_v0  ;;  %312 = vst.msk [vmem:[#allocation2 + $0xf8] sm:$0xff] %vm279_vm0, %v3266_v0 }
  0x1f   : > { %314 = vst.msk [vmem:[#allocation2 + $0x108] sm:$0xff] %vm279_vm0, %v3266_v0  ;;  %315 = vst.msk [vmem:[#allocation2 + $0x110] sm:$0xff] %vm279_vm0, %v3266_v0 }
  0x20   : > { %317 = vst.msk [vmem:[#allocation2 + $0x120] sm:$0xff] %vm279_vm0, %v3266_v0  ;;  %318 = vst.msk [vmem:[#allocation2 + $0x128] sm:$0xff] %vm279_vm0, %v3266_v0 }
  0x21   : > { %320 = vst.msk [vmem:[#allocation2 + $0x138] sm:$0xff] %vm279_vm0, %v3266_v0  ;;  %321 = vst.msk [vmem:[#allocation2 + $0x140] sm:$0xff] %vm279_vm0, %v3266_v0 }
  0x22   : > { %323 = vst.msk [vmem:[#allocation2 + $0x150] sm:$0xff] %vm279_vm0, %v3266_v0  ;;  %324 = vst.msk [vmem:[#allocation2 + $0x158] sm:$0xff] %vm279_vm0, %v3266_v0 }
  0x23   : > { %326 = vst.msk [vmem:[#allocation2 + $0x168] sm:$0xff] %vm279_vm0, %v3266_v0  ;;  %327 = vst.msk [vmem:[#allocation2 + $0x170] sm:$0xff] %vm279_vm0, %v3266_v0 }
  0x24   : > { %329 = vst.msk [vmem:[#allocation2 + $0x180] sm:$0xff] %vm279_vm0, %v3266_v0  ;;  %330 = vst.msk [vmem:[#allocation2 + $0x188] sm:$0xff] %vm279_vm0, %v3266_v0 }
  0x25   : > { %332 = vst.msk [vmem:[#allocation2 + $0x198] sm:$0xff] %vm279_vm0, %v3266_v0  ;;  %333 = vst.msk [vmem:[#allocation2 + $0x1a0] sm:$0xff] %vm279_vm0, %v3266_v0 }
  0x26   : > { %283 = vst.msk [vmem:[#allocation2 + $0x10] sm:$0x3] %vm282_vm1, %v3266_v0  ;;  %286 = vst.msk [vmem:[#allocation2 + $0x28] sm:$0x3] %vm282_vm1, %v3266_v0 }
  0x27   : > { %289 = vst.msk [vmem:[#allocation2 + $0x40] sm:$0x3] %vm282_vm1, %v3266_v0  ;;  %292 = vst.msk [vmem:[#allocation2 + $0x58] sm:$0x3] %vm282_vm1, %v3266_v0 }
  0x28   : > { %295 = vst.msk [vmem:[#allocation2 + $0x70] sm:$0x3] %vm282_vm1, %v3266_v0  ;;  %298 = vst.msk [vmem:[#allocation2 + $0x88] sm:$0x3] %vm282_vm1, %v3266_v0 }
  0x29   : > { %301 = vst.msk [vmem:[#allocation2 + $0xa0] sm:$0x3] %vm282_vm1, %v3266_v0  ;;  %304 = vst.msk [vmem:[#allocation2 + $0xb8] sm:$0x3] %vm282_vm1, %v3266_v0 }
  0x2a   : > { %307 = vst.msk [vmem:[#allocation2 + $0xd0] sm:$0x3] %vm282_vm1, %v3266_v0  ;;  %310 = vst.msk [vmem:[#allocation2 + $0xe8] sm:$0x3] %vm282_vm1, %v3266_v0 }
  0x2b   : > { %313 = vst.msk [vmem:[#allocation2 + $0x100] sm:$0x3] %vm282_vm1, %v3266_v0  ;;  %316 = vst.msk [vmem:[#allocation2 + $0x118] sm:$0x3] %vm282_vm1, %v3266_v0 }
  0x2c   : > { %319 = vst.msk [vmem:[#allocation2 + $0x130] sm:$0x3] %vm282_vm1, %v3266_v0  ;;  %322 = vst.msk [vmem:[#allocation2 + $0x148] sm:$0x3] %vm282_vm1, %v3266_v0 }
  0x2d   : > { %325 = vst.msk [vmem:[#allocation2 + $0x160] sm:$0x3] %vm282_vm1, %v3266_v0  ;;  %328 = vst.msk [vmem:[#allocation2 + $0x178] sm:$0x3] %vm282_vm1, %v3266_v0 }
  0x2e   : > { %331 = vst.msk [vmem:[#allocation2 + $0x190] sm:$0x3] %vm282_vm1, %v3266_v0  ;;  %334 = vst.msk [vmem:[#allocation2 + $0x1a8] sm:$0x3] %vm282_vm1, %v3266_v0 }
  0x2f   : > { %336 = vst.msk [vmem:[%s4895_s6] sm:$0x1] %vm335_vm2, %v3266_v0  ;;  %337 = vst.msk [vmem:[%s4896_s7] sm:$0x1] %vm335_vm2, %v3266_v0 }
  0x30 PF: > { %v514_v1 = vld [vmem:[#allocation2] sm:$0xff]  ;;  %v515_v2 = vld [vmem:[#allocation2 + $0x8] sm:$0xff]  ;;  %v516_v3 = vld [vmem:[#allocation2 + $0x10] sm:$0x3]  ;;  %vm697_vm3 = vcmask 1045504   ;;  %vm616_vm4 = vcmask 1046528  }
  0x31   : > { %v698_v4 = vrot.slane %v514_v1, 2  ;;  %v699_v5 = vrot.slane %v515_v2, 2  ;;  %v701_v6 = vrot.slane %v516_v3, 2  ;;  %v342_v7 = vld [vmem:[%s3321_s30 + $0x20] sm:$0xff]  ;;  %v617_v8 = vrot.slane %v514_v1, 1  ;;  %v343_v11 = vld [vmem:[%s3321_s30 + $0x28] sm:$0xff] }
  0x32   : > { %v618_v9 = vrot.slane %v515_v2, 1  ;;  %v620_v10 = vrot.slane %v516_v3, 1  ;;  %v3395_v12 = vld [vmem:[%s4890_s1] ss:$0 sm:$0xff]  ;;  %v340_v18 = vld [vmem:[%s3321_s30 + $0x10] sm:$0xff]  ;;  %v341_v19 = vld [vmem:[%s3321_s30 + $0x18] sm:$0xff] }
  0x33   : > { %v700_v13 = vsel %vm697_vm3, %v698_v4, %v699_v5  ;;  %v702_v14 = vsel %vm697_vm3, %v699_v5, %v701_v6  ;;  %v381_v15 = vmul.f32 %v3395_v12, %v342_v7  ;;  %v382_v16 = vmul.f32 %v3395_v12, %v343_v11  ;;  %v3404_v17 = vld [vmem:[%s4891_s2] ss:$0 sm:$0xff]  ;;  %v339_v24 = vld [vmem:[%s3321_s30 + $0x8] sm:$0xff]  ;;  %s3267_s19 = smov 64   ;;  %v360_v35 = vld [vmem:[%s3321_s30 + $0xb0] sm:$0xff]  ;;  %s3268_s20 = smov 32  }
  0x34   : > { %v2733_v20 = vpack.i.bf16 %v702_v14, %v700_v13  ;;  %v619_v21 = vsel %vm616_vm4, %v617_v8, %v618_v9  ;;  %v621_v22 = vsel %vm616_vm4, %v618_v9, %v620_v10  ;;  %vm481_vm5 = vcmask 261120   ;;  %v338_v23 = vld [vmem:[%s3321_s30] sm:$0xff]  ;;  %v363_v30 = vld [vmem:[%s3321_s30 + $0xc8] sm:$0xff]  ;;  %v361_v36 = vld [vmem:[%s3321_s30 + $0xb8] sm:$0xff]  ;;  %s3269_s13 = smov 96  }
  0x35   : > { %v362_v25 = vld [vmem:[%s3321_s30 + $0xc0] sm:$0xff]  ;;  %v2728_v26 = vpack.i.bf16 %v621_v22, %v619_v21  ;;  %v420_v27 = vadd.f32 %v3404_v17, %v381_v15  ;;  %v421_v28 = vadd.f32 %v3404_v17, %v382_v16  ;;  %v379_v29 = vmul.f32 %v3395_v12, %v340_v18  ;;  %v344_v45 = vld [vmem:[%s3321_s30 + $0x30] sm:$0xff]  ;;  %v345_v50 = vld [vmem:[%s3321_s30 + $0x38] sm:$0xff] }
  0x36   : > { %2734 = vrot.lane.b32.xlu1 %v2733_v20, %s3267_s19  ;;  %v380_v31 = vmul.f32 %v3395_v12, %v341_v19  ;;  %v377_v32 = vmul.f32 %v3395_v12, %v338_v23  ;;  %v378_v33 = vmul.f32 %v3395_v12, %v339_v24  ;;  %v401_v34 = vmul.f32 %v3395_v12, %v362_v25  ;;  %v364_v51 = vld [vmem:[%s3321_s30 + $0xd0] sm:$0xff]  ;;  %v365_v52 = vld [vmem:[%s3321_s30 + $0xd8] sm:$0xff]  ;;  %v3212_v19 = vld [vmem:[%s4892_s3 + $0x68] sm:$0xff]  }
  0x37   : > { %2729 = vrot.lane.b32.xlu0 %v2728_v26, %s3268_s20  ;;  %v452_v37 = vmax.f32 %v420_v27, 0.0  ;;  %v453_v38 = vmax.f32 %v421_v28, 0.0  ;;  %v418_v39 = vadd.f32 %v3404_v17, %v379_v29  ;;  %v402_v40 = vmul.f32 %v3395_v12, %v363_v30  ;;  %v3208_v61 = vld [vmem:[%s4892_s3 + $0x78] sm:$0xff]   ;;  %v3210_v8 = vld [vmem:[%s4892_s3 + $0x70] sm:$0xff]   ;;  %v3213_v24 = vld [vmem:[%s4892_s3 + $0x28] sm:$0xff]  }
  0x38   : > { %v419_v41 = vadd.f32 %v3404_v17, %v380_v31  ;;  %v416_v42 = vadd.f32 %v3404_v17, %v377_v32  ;;  %v417_v43 = vadd.f32 %v3404_v17, %v378_v33  ;;  %v440_v44 = vadd.f32 %v3404_v17, %v401_v34  ;;  %v3209_v1 = vld [vmem:[%s4892_s3 + $0x38] sm:$0xff]   ;;  %2534 = vmatprep.subr.bf16.mxu0 %v3208_v61  ;;  %v3211_v10 = vld [vmem:[%s4892_s3 + $0x30] sm:$0xff]  }
  0x39   : > { %486 = vst.msk [vmem:[#allocation2 + $0x49] sm:$0xff] %vm481_vm5, %v452_v37  ;;  %487 = vst.msk [vmem:[#allocation2 + $0x51] sm:$0xff] %vm481_vm5, %v453_v38  ;;  %v450_v46 = vmax.f32 %v418_v39, 0.0  ;;  %v441_v47 = vadd.f32 %v3404_v17, %v402_v40  ;;  %v399_v48 = vmul.f32 %v3395_v12, %v360_v35  ;;  %v400_v49 = vmul.f32 %v3395_v12, %v361_v36 }
  0x3a   : > { %v451_v53 = vmax.f32 %v419_v41, 0.0  ;;  %v448_v54 = vmax.f32 %v416_v42, 0.0  ;;  %v449_v55 = vmax.f32 %v417_v43, 0.0  ;;  %v472_v56 = vmax.f32 %v440_v44, 0.0  ;;  %2700 = vmatprep.subr.bf16.mxu1 %v3208_v61  ;;  %2535 = vmatpush3.bf16.msra.mxu0 %v3209_v1 }
  0x3b   : > { %484 = vst.msk [vmem:[#allocation2 + $0x31] sm:$0xff] %vm481_vm5, %v450_v46  ;;  %v473_v57 = vmax.f32 %v441_v47, 0.0  ;;  %v438_v58 = vadd.f32 %v3404_v17, %v399_v48  ;;  %v439_v59 = vadd.f32 %v3404_v17, %v400_v49  ;;  %v383_v60 = vmul.f32 %v3395_v12, %v344_v45  ;;  %2708 = vmatpush3.bf16.msra.mxu1 %v3209_v1  ;;  %v346_v1 = vld [vmem:[%s3321_s30 + $0x40] sm:$0xff] }
  0x3c   : > { %485 = vst.msk [vmem:[#allocation2 + $0x39] sm:$0xff] %vm481_vm5, %v451_v53  ;;  %482 = vst.msk [vmem:[#allocation2 + $0x19] sm:$0xff] %vm481_vm5, %v448_v54  ;;  %v384_v62 = vmul.f32 %v3395_v12, %v345_v50  ;;  %v403_v63 = vmul.f32 %v3395_v12, %v364_v51  ;;  %v404_v0 = vmul.f32 %v3395_v12, %v365_v52  ;;  %2536 = vmatprep.subr.bf16.mxu0 %v3210_v8  ;;  %vm1476_vm6 = vcmask 523264  }
  0x3d   : > { %483 = vst.msk [vmem:[#allocation2 + $0x21] sm:$0xff] %vm481_vm5, %v449_v55  ;;  %506 = vst.msk [vmem:[#allocation2 + $0x139] sm:$0xff] %vm481_vm5, %v472_v56  ;;  %v470_v2 = vmax.f32 %v438_v58, 0.0  ;;  %v471_v3 = vmax.f32 %v439_v59, 0.0  ;;  %v422_v4 = vadd.f32 %v3404_v17, %v383_v60  ;;  %2701 = vmatprep.subr.bf16.mxu1 %v3210_v8  ;;  %v3214_v58 = vld [vmem:[%s4892_s3 + $0x60] sm:$0xff]   ;;  %vm1509_vm7 = vcmask 785408  }
  0x3e   : > { %507 = vst.msk [vmem:[#allocation2 + $0x141] sm:$0xff] %vm481_vm5, %v473_v57  ;;  %v423_v5 = vadd.f32 %v3404_v17, %v384_v62  ;;  %v442_v6 = vadd.f32 %v3404_v17, %v403_v63  ;;  %v443_v7 = vadd.f32 %v3404_v17, %v404_v0  ;;  %2537 = vmatpush3.bf16.msra.mxu0 %v3211_v10  ;;  %vm2310_vm8 = vcmask 253952  }
  0x3f   : > { %504 = vst.msk [vmem:[#allocation2 + $0x121] sm:$0xff] %vm481_vm5, %v470_v2  ;;  %505 = vst.msk [vmem:[#allocation2 + $0x129] sm:$0xff] %vm481_vm5, %v471_v3  ;;  %v454_v9 = vmax.f32 %v422_v4, 0.0  ;;  %2538 = vmatprep.subr.bf16.mxu0 %v3212_v19  ;;  %2709 = vmatpush3.bf16.msra.mxu1 %v3211_v10  ;;  %v347_v2 = vld [vmem:[%s3321_s30 + $0x48] sm:$0xff]  ;;  %v3215_v3 = vld [vmem:[%s4892_s3 + $0x20] sm:$0xff]  }
  0x40   : > { %v3470_v11 = vld [vmem:[#allocation2 + $0x48] sm:$0xff]  ;;  %v3472_v13 = vld [vmem:[#allocation2 + $0x50] sm:$0xff]  ;;  %v455_v14 = vmax.f32 %v423_v5, 0.0  ;;  %v474_v15 = vmax.f32 %v442_v6, 0.0  ;;  %v3478_v18 = vld [vmem:[#allocation2 + $0x58] sm:$0x3]  ;;  %2702 = vmatprep.subr.bf16.mxu1 %v3212_v19  ;;  %v385_v19 = vmul.f32 %v3395_v12, %v346_v1 }
  0x41   : > { %v3476_v16 = vpack.i.bf16 %v3472_v13, %v3470_v11  ;;  %488 = vst.msk [vmem:[#allocation2 + $0x61] sm:$0xff] %vm481_vm5, %v454_v9  ;;  %v713_v21 = vrot.slane %v3470_v11, 2  ;;  %v714_v22 = vrot.slane %v3472_v13, 2  ;;  %v475_v23 = vmax.f32 %v443_v7, 0.0  ;;  %v3216_v5 = vld [vmem:[%s4892_s3 + $0x58] sm:$0xff]   ;;  %v368_v1 = vld [vmem:[%s3321_s30 + $0xf0] sm:$0xff] }
  0x42   : > { %v520_v20 = vld [vmem:[#allocation2 + $0x30] sm:$0xff]  ;;  %489 = vst.msk [vmem:[#allocation2 + $0x69] sm:$0xff] %vm481_vm5, %v455_v14  ;;  %508 = vst.msk [vmem:[#allocation2 + $0x151] sm:$0xff] %vm481_vm5, %v474_v15  ;;  %v716_v30 = vrot.slane %v3478_v18, 2  ;;  %2539 = vmatpush3.bf16.msra.mxu0 %v3213_v24  ;;  %v632_v52 = vrot.slane %v3470_v11, 1  ;;  %v633_v55 = vrot.slane %v3472_v13, 1 }
  0x43   : > { %2749 = vrot.lane.b32.xlu0 %v3476_v16, %s3267_s19  ;;  %v521_v25 = vld [vmem:[#allocation2 + $0x38] sm:$0xff]  ;;  %v627_v28 = vrot.slane %v520_v20, 1  ;;  %v708_v29 = vrot.slane %v520_v20, 2  ;;  %v522_v36 = vld [vmem:[#allocation2 + $0x40] sm:$0x3]  ;;  %509 = vst.msk [vmem:[#allocation2 + $0x159] sm:$0xff] %vm481_vm5, %v475_v23  ;;  %2710 = vmatpush3.bf16.msra.mxu1 %v3213_v24  ;;  %v3536_v61 = vsel %vm697_vm3, %v713_v21, %v714_v22 }
  0x44   : > { %v517_v26 = vld [vmem:[#allocation2 + $0x18] sm:$0xff]  ;;  %v518_v27 = vld [vmem:[#allocation2 + $0x20] sm:$0xff]  ;;  %v3494_v31 = vpack.i.bf16 %v521_v25, %v520_v20  ;;  %v519_v33 = vld [vmem:[#allocation2 + $0x28] sm:$0x3]  ;;  %v628_v38 = vrot.slane %v521_v25, 1  ;;  %v630_v39 = vrot.slane %v522_v36, 1  ;;  %v3539_v62 = vsel %vm697_vm3, %v714_v22, %v716_v30  ;;  %2540 = vmatprep.subr.bf16.mxu0 %v3214_v58  ;;  %2703 = vmatprep.subr.bf16.mxu1 %v3214_v58 }
  0x45   : > { %v2743_v32 = vpack.i.bf16 %v518_v27, %v517_v26  ;;  %v703_v34 = vrot.slane %v517_v26, 2  ;;  %v704_v35 = vrot.slane %v518_v27, 2  ;;  %v706_v37 = vrot.slane %v519_v33, 2  ;;  %v3524_v57 = vld [vmem:[#allocation2 + $0x138] sm:$0xff]  ;;  %4932 = vst [vmem:[#allocation3_spill] sm:$0xff] %v3536_v61  ;;  %4933 = vst [vmem:[#allocation4_spill] sm:$0xff] %v3539_v62 }
  0x46   : > { %v622_v40 = vrot.slane %v517_v26, 1  ;;  %2739 = vrot.lane.b32.xlu1 %v3494_v31, %s3267_s19  ;;  %v623_v42 = vrot.slane %v518_v27, 1  ;;  %v625_v43 = vrot.slane %v519_v33, 1  ;;  %v709_v44 = vrot.slane %v521_v25, 2  ;;  %v3541_v63 = vld [vmem:[#allocation2 + $0x140] sm:$0xff]  ;;  %2541 = vmatpush3.bf16.msra.mxu0 %v3215_v3  ;;  %v3566_v10 = vld [vmem:[#allocation2 + $0x128] sm:$0xff] }
  0x47   : > { %v705_v41 = vsel %vm697_vm3, %v703_v34, %v704_v35  ;;  %v707_v45 = vsel %vm697_vm3, %v704_v35, %v706_v37  ;;  %v3502_v46 = vsel %vm616_vm4, %v627_v28, %v628_v38  ;;  %v3505_v47 = vsel %vm616_vm4, %v628_v38, %v630_v39  ;;  %v3543_v0 = vld [vmem:[#allocation2 + $0x148] sm:$0x3]  ;;  %v3555_v6 = vld [vmem:[#allocation2 + $0x120] sm:$0xff]  ;;  %2711 = vmatpush3.bf16.msra.mxu1 %v3215_v3  ;;  %v3217_v15 = vld [vmem:[%s4892_s3 + $0x18] sm:$0xff]  }
  0x48   : > { %v711_v48 = vrot.slane %v522_v36, 2  ;;  %v2753_v49 = vpack.i.bf16 %v707_v45, %v705_v41  ;;  %v3508_v50 = vsel %vm616_vm4, %v622_v40, %v623_v42  ;;  %v3511_v51 = vsel %vm616_vm4, %v623_v42, %v625_v43  ;;  %2542 = vmatprep.subr.bf16.mxu0 %v3216_v5  ;;  %2704 = vmatprep.subr.bf16.mxu1 %v3216_v5  ;;  %v3218_v21 = vld [vmem:[%s4892_s3 + $0x50] sm:$0xff]   ;;  %v366_v22 = vld [vmem:[%s3321_s30 + $0xe0] sm:$0xff]  ;;  %v367_v26 = vld [vmem:[%s3321_s30 + $0xe8] sm:$0xff] }
  0x49   : > { %v3518_v53 = vpack.i.bf16 %v3505_v47, %v3502_v46  ;;  %v2768_v54 = vpack.i.bf16 %v3511_v51, %v3508_v50  ;;  %v635_v56 = vrot.slane %v3478_v18, 1  ;;  %v3530_v59 = vsel %vm697_vm3, %v708_v29, %v709_v44  ;;  %v3578_v18 = vld [vmem:[#allocation2 + $0x130] sm:$0x3]  ;;  %v349_v35 = vld [vmem:[%s3321_s30 + $0x58] sm:$0xff]  ;;  %v3220_v36 = vld [vmem:[%s4892_s3 + $0x48] sm:$0xff]  }
  0x4a   : > { %2744 = vrot.lane.b32.xlu1 %v2743_v32, %s3269_s13  ;;  %2754 = vrot.lane.b32.xlu0 %v2753_v49, %s3268_s20  ;;  %v3533_v60 = vsel %vm697_vm3, %v709_v44, %v711_v48  ;;  %v763_v8 = vrot.slane %v3524_v57, 2  ;;  %v764_v9 = vrot.slane %v3541_v63, 2  ;;  %v3569_v11 = vsel %vm616_vm4, %v632_v52, %v633_v55  ;;  %v3219_v23 = vld [vmem:[%s4892_s3 + $0x10] sm:$0xff]   ;;  %v3613_v37 = vld [vmem:[#allocation2 + $0x60] sm:$0xff]  ;;  %v3221_v39 = vld [vmem:[%s4892_s3 + $0x8] sm:$0xff]  }
  0x4b   : > { %v3562_v7 = vpack.i.bf16 %v3533_v60, %v3530_v59  ;;  %v3572_v13 = vsel %vm616_vm4, %v633_v55, %v635_v56  ;;  %v766_v14 = vrot.slane %v3543_v0, 2  ;;  %v386_v20 = vmul.f32 %v3395_v12, %v347_v2  ;;  %2543 = vmatpush3.bf16.msra.mxu0 %v3217_v15  ;;  %2712 = vmatpush3.bf16.msra.mxu1 %v3217_v15  ;;  %v348_v32 = vld [vmem:[%s3321_s30 + $0x50] sm:$0xff]  ;;  %v3631_v42 = vld [vmem:[#allocation2 + $0x68] sm:$0xff]  ;;  %v369_v2 = vld [vmem:[%s3321_s30 + $0xf8] sm:$0xff] }
  0x4c   : > { %v3594_v24 = vpack.i.bf16 %v3572_v13, %v3569_v11  ;;  %v677_v25 = vrot.slane %v3555_v6, 1  ;;  %v3599_v27 = vsel %vm697_vm3, %v763_v8, %v764_v9  ;;  %v678_v29 = vrot.slane %v3566_v10, 1  ;;  %2544 = vmatprep.subr.bf16.mxu0 %v3218_v21  ;;  %2705 = vmatprep.subr.bf16.mxu1 %v3218_v21  ;;  %v3645_v52 = vld [vmem:[#allocation2 + $0x150] sm:$0xff]  ;;  %v3675_v21 = vld [vmem:[#allocation2 + $0x160] sm:$0x3]  ;;  %v355_v4 = vld [vmem:[%s3321_s30 + $0x88] sm:$0xff] }
  0x4d   : > { %4934 = vst [vmem:[#allocation5_spill] sm:$0xff] %v3599_v27  ;;  %v3602_v28 = vsel %vm697_vm3, %v764_v9, %v766_v14  ;;  %v680_v30 = vrot.slane %v3578_v18, 1  ;;  %v424_v33 = vadd.f32 %v3404_v17, %v385_v19  ;;  %v425_v34 = vadd.f32 %v3404_v17, %v386_v20  ;;  %v3656_v5 = vld [vmem:[#allocation2 + $0x70] sm:$0x3]  ;;  %v350_v9 = vld [vmem:[%s3321_s30 + $0x60] sm:$0xff] }
  0x4e   : > { %2759 = vrot.lane.b32.xlu0 %v3518_v53, %s3269_s13  ;;  %2769 = vrot.lane.b32.xlu1 %v2768_v54, %s3268_s20  ;;  %4935 = vst [vmem:[#allocation6_spill] sm:$0xff] %v3602_v28  ;;  %v405_v38 = vmul.f32 %v3395_v12, %v366_v22  ;;  %v3625_v40 = vpack.i.bf16 %v3539_v62, %v3536_v61  ;;  %v758_v43 = vrot.slane %v3555_v6, 2  ;;  %v759_v48 = vrot.slane %v3566_v10, 2  ;;  %v3647_v54 = vld [vmem:[#allocation2 + $0x158] sm:$0xff]  ;;  %v351_v10 = vld [vmem:[%s3321_s30 + $0x68] sm:$0xff]  ;;  %v3223_v14 = vld [vmem:[%s4892_s3] sm:$0xff]  }
  0x4f   : > { %2545 = vmatpush3.bf16.msra.mxu0 %v3219_v23  ;;  %2713 = vmatpush3.bf16.msra.mxu1 %v3219_v23  ;;  %v3629_v41 = vpack.i.bf16 %v3602_v28, %v3599_v27  ;;  %v406_v44 = vmul.f32 %v3395_v12, %v367_v26  ;;  %v3636_v45 = vsel %vm616_vm4, %v677_v25, %v678_v29  ;;  %v456_v55 = vmax.f32 %v424_v33, 0.0  ;;  %v359_v28 = vld [vmem:[%s3321_s30 + $0xa8] sm:$0xff] }
  0x50   : > { %4936 = vst [vmem:[#allocation7_spill] sm:$0xff] %v3636_v45  ;;  %2546 = vmatprep.subr.bf16.mxu0 %v3220_v36  ;;  %2706 = vmatprep.subr.bf16.mxu1 %v3220_v36  ;;  %v457_v56 = vmax.f32 %v425_v34, 0.0  ;;  %v387_v58 = vmul.f32 %v3395_v12, %v348_v32  ;;  %v3654_v3 = vpack.i.bf16 %v3631_v42, %v3613_v37  ;;  %v761_v19 = vrot.slane %v3578_v18, 2 }
  0x51   : > { %v444_v6 = vadd.f32 %v3404_v17, %v405_v38  ;;  %v388_v8 = vmul.f32 %v3395_v12, %v349_v35  ;;  %v637_v20 = vrot.slane %v3613_v37, 1  ;;  %490 = vst.msk [vmem:[#allocation2 + $0x79] sm:$0xff] %vm481_vm5, %v456_v55  ;;  %v445_v22 = vadd.f32 %v3404_v17, %v406_v44 }
  0x52   : > { %2764 = vrot.lane.b32.xlu0 %v3562_v7, %s3268_s20  ;;  %2774 = vrot.lane.b32.xlu1 %v2753_v49, %s3267_s19  ;;  %v3222_v49 = vld [vmem:[%s4892_s3 + $0x40] sm:$0xff]   ;;  %491 = vst.msk [vmem:[#allocation2 + $0x81] sm:$0xff] %vm481_vm5, %v457_v56  ;;  %v3682_v23 = vpack.i.bf16 %v3647_v54, %v3645_v52  ;;  %v3685_v25 = vsel %vm697_vm3, %v758_v43, %v759_v48  ;;  %v638_v26 = vrot.slane %v3631_v42, 1  ;;  %v688_v34 = vrot.slane %v3647_v54, 1 }
  0x53   : > { %2547 = vmatpush3.bf16.msra.mxu0 %v3221_v39  ;;  %4938 = vst [vmem:[#allocation9_spill] sm:$0xff] %v3685_v25  ;;  %v476_v18 = vmax.f32 %v444_v6, 0.0  ;;  %2714 = vmatpush3.bf16.msra.mxu1 %v3221_v39  ;;  %v477_v32 = vmax.f32 %v445_v22, 0.0  ;;  %v426_v33 = vadd.f32 %v3404_v17, %v387_v58  ;;  %v427_v35 = vadd.f32 %v3404_v17, %v388_v8 }
  0x54   : > { %2548 = vmatprep.subr.bf16.mxu0 %v3222_v49  ;;  %2707 = vmatprep.subr.bf16.mxu1 %v3222_v49  ;;  %v407_v36 = vmul.f32 %v3395_v12, %v368_v1  ;;  %v408_v38 = vmul.f32 %v3395_v12, %v369_v2  ;;  %v3701_v39 = vsel %vm697_vm3, %v759_v48, %v761_v19  ;;  %v690_v55 = vrot.slane %v3675_v21, 1 }
  0x55   : > { %510 = vst.msk [vmem:[#allocation2 + $0x169] sm:$0xff] %vm481_vm5, %v476_v18  ;;  %4939 = vst [vmem:[#allocation10_spill] sm:$0xff] %v3701_v39  ;;  %v458_v43 = vmax.f32 %v426_v33, 0.0  ;;  %v389_v44 = vmul.f32 %v3395_v12, %v350_v9  ;;  %v390_v49 = vmul.f32 %v3395_v12, %v351_v10  ;;  %v459_v56 = vmax.f32 %v427_v35, 0.0 }
  0x56   : > { %2779 = vrot.lane.b32.xlu0 %v3594_v24, %s3269_s13  ;;  %2784 = vrot.lane.b32.xlu1 %v3494_v31, %s3269_s13  ;;  %v3639_v31 = vsel %vm616_vm4, %v678_v29, %v680_v30  ;;  %v640_v29 = vrot.slane %v3656_v5, 1  ;;  %v687_v30 = vrot.slane %v3645_v52, 1  ;;  %511 = vst.msk [vmem:[#allocation2 + $0x171] sm:$0xff] %vm481_vm5, %v477_v32  ;;  %v446_v58 = vadd.f32 %v3404_v17, %v407_v36 }
  0x57   : > { %4937 = vst [vmem:[#allocation8_spill] sm:$0xff] %v3639_v31  ;;  %v3671_v15 = vpack.i.bf16 %v3639_v31, %v3636_v45  ;;  %2549 = vmatpush3.bf16.msra.mxu0 %v3223_v14  ;;  %2715 = vmatpush3.bf16.msra.mxu1 %v3223_v14  ;;  %492 = vst.msk [vmem:[#allocation2 + $0x91] sm:$0xff] %vm481_vm5, %v458_v43  ;;  %v428_v48 = vadd.f32 %v3404_v17, %v389_v44  ;;  %v718_v32 = vrot.slane %v3613_v37, 2  ;;  %v356_v45 = vld [vmem:[%s3321_s30 + $0x90] sm:$0xff] }
  0x58   : > { %v429_v1 = vadd.f32 %v3404_v17, %v390_v49  ;;  %493 = vst.msk [vmem:[#allocation2 + $0x99] sm:$0xff] %vm481_vm5, %v459_v56  ;;  %v478_v2 = vmax.f32 %v446_v58, 0.0  ;;  %v3719_v8 = vpack.i.bf16 %v3701_v39, %v3685_v25  ;;  %v3722_v9 = vsel %vm616_vm4, %v637_v20, %v638_v26 }
  0x59   : > { %v3725_v10 = vsel %vm616_vm4, %v638_v26, %v640_v29  ;;  %v3728_v14 = vsel %vm616_vm4, %v687_v30, %v688_v34  ;;  %v3731_v19 = vsel %vm616_vm4, %v688_v34, %v690_v55  ;;  %v460_v22 = vmax.f32 %v428_v48, 0.0 }
  0x5a   : > { %2789 = vrot.lane.b32.xlu0 %v3625_v40, %s3268_s20  ;;  %2794 = vrot.lane.b32.xlu1 %v3629_v41, %s3268_s20  ;;  %512 = vst.msk [vmem:[#allocation2 + $0x181] sm:$0xff] %vm481_vm5, %v478_v2  ;;  %v461_v18 = vmax.f32 %v429_v1, 0.0  ;;  %v719_v20 = vrot.slane %v3631_v42, 2  ;;  %v3743_v26 = vpack.i.bf16 %v3725_v10, %v3722_v9  ;;  %v3747_v29 = vpack.i.bf16 %v3731_v19, %v3728_v14  ;;  %v3808_v1 = vld [vmem:[#allocation2 + $0x88] sm:$0x3] }
  0x5b   : > { %v721_v30 = vrot.slane %v3656_v5, 2  ;;  %494 = vst.msk [vmem:[#allocation2 + $0xa9] sm:$0xff] %vm481_vm5, %v460_v22  ;;  %v768_v37 = vrot.slane %v3645_v52, 2  ;;  %v771_v42 = vrot.slane %v3675_v21, 2  ;;  %v2843_v33 = vpack.i.bf16 %v3541_v63, %v3524_v57  ;;  %v3820_v22 = vld [vmem:[#allocation2 + $0x78] sm:$0xff] }
  0x5c   : > { %495 = vst.msk [vmem:[#allocation2 + $0xb1] sm:$0xff] %vm481_vm5, %v461_v18  ;;  %v3758_v34 = vsel %vm697_vm3, %v718_v32, %v719_v20  ;;  %v682_v52 = vrot.slane %v3524_v57, 1  ;;  %v685_v21 = vrot.slane %v3543_v0, 1  ;;  %v3822_v18 = vld [vmem:[#allocation2 + $0x80] sm:$0xff]  ;;  %v395_v62 = vmul.f32 %v3395_v12, %v356_v45 }
  0x5d   : > { %4940 = vst [vmem:[#allocation11_spill] sm:$0xff] %v3758_v34  ;;  %v3765_v5 = vsel %vm697_vm3, %v719_v20, %v721_v30 }
  0x5e   : > { %2799 = vrot.lane.b32.xlu0 %v3518_v53, %s3268_s20  ;;  %2804 = vrot.lane.b32.xlu1 %v3671_v15, %s3268_s20  ;;  %v447_v53 = vadd.f32 %v3404_v17, %v408_v38  ;;  %4941 = vst [vmem:[#allocation12_spill] sm:$0xff] %v3765_v5  ;;  %v3780_v43 = vpack.i.bf16 %v3765_v5, %v3758_v34 }
  0x60   : > { %v479_v6 = vmax.f32 %v447_v53, 0.0  ;;  %v352_v53 = vld [vmem:[%s3321_s30 + $0x70] sm:$0xff] }
  0x61   : > { %v3776_v38 = vld [vmem:[#allocation2 + $0x180] sm:$0xff]  ;;  %v391_v20 = vmul.f32 %v3395_v12, %v352_v53 }
  0x62   : > { %2809 = vrot.lane.b32.xlu0 %v3654_v3, %s3267_s19  ;;  %2814 = vrot.lane.b32.xlu1 %v3682_v23, %s3267_s19  ;;  %513 = vst.msk [vmem:[#allocation2 + $0x189] sm:$0xff] %vm481_vm5, %v479_v6  ;;  %v818_v57 = vrot.slane %v3776_v38, 2 }
  0x66   : > { %2819 = vrot.lane.b32.xlu0 %v3562_v7, %s3267_s19  ;;  %2824 = vrot.lane.b32.xlu1 %v3719_v8, %s3267_s19  ;;  %v769_v7 = vrot.slane %v3647_v54, 2  ;;  %v683_v54 = vrot.slane %v3541_v63, 1 }
  0x68   : > { %v3771_v35 = vsel %vm697_vm3, %v768_v37, %v769_v7  ;;  %v3774_v36 = vsel %vm697_vm3, %v769_v7, %v771_v42  ;;  %v3793_v0 = vsel %vm616_vm4, %v682_v52, %v683_v54  ;;  %v3796_v49 = vsel %vm616_vm4, %v683_v54, %v685_v21  ;;  %v3828_v37 = vld [vmem:[#allocation2 + $0x168] sm:$0xff]  ;;  %v3830_v7 = vld [vmem:[#allocation2 + $0x170] sm:$0xff]  ;;  %v3835_v54 = vld [vmem:[#allocation2 + $0x178] sm:$0x3] }
  0x69   : > { %4942 = vst [vmem:[#allocation13_spill] sm:$0xff] %v3771_v35  ;;  %4943 = vst [vmem:[#allocation14_spill] sm:$0xff] %v3774_v36  ;;  %v3782_v44 = vld [vmem:[#allocation2 + $0x188] sm:$0xff]  ;;  %v3790_v63 = vpack.i.bf16 %v3774_v36, %v3771_v35  ;;  %v3798_v55 = vld [vmem:[#allocation2 + $0x190] sm:$0x3]  ;;  %v3806_v48 = vpack.i.bf16 %v3796_v49, %v3793_v0  ;;  %v642_v42 = vrot.slane %v3820_v22, 1  ;;  %v3839_v21 = vpack.i.bf16 %v3822_v18, %v3820_v22 }
  0x6a   : > { %2829 = vrot.lane.b32.xlu0 %v3743_v26, %s3269_s13  ;;  %2834 = vrot.lane.b32.xlu1 %v3747_v29, %s3269_s13  ;;  %v819_v56 = vrot.slane %v3782_v44, 2  ;;  %v821_v58 = vrot.slane %v3798_v55, 2  ;;  %v645_v52 = vrot.slane %v3808_v1, 1  ;;  %v3850_v53 = vpack.i.bf16 %v3830_v7, %v3828_v37  ;;  %v357_v36 = vld [vmem:[%s3321_s30 + $0x98] sm:$0xff]  ;;  %v358_v35 = vld [vmem:[%s3321_s30 + $0xa0] sm:$0xff] }
  0x6b   : > { %v695_v31 = vrot.slane %v3835_v54, 1 }
  0x6c   : > { %v3811_v2 = vsel %vm697_vm3, %v818_v57, %v819_v56  ;;  %v3814_v6 = vsel %vm697_vm3, %v819_v56, %v821_v58  ;;  %v692_v57 = vrot.slane %v3828_v37, 1  ;;  %v693_v56 = vrot.slane %v3830_v7, 1  ;;  %v354_v58 = vld [vmem:[%s3321_s30 + $0x80] sm:$0xff] }
  0x6d   : > { %4944 = vst [vmem:[#allocation15_spill] sm:$0xff] %v3811_v2  ;;  %4945 = vst [vmem:[#allocation16_spill] sm:$0xff] %v3814_v6 }
  0x6e   : > { %2839 = vrot.lane.b32.xlu0 %v3476_v16, %s3269_s13  ;;  %2844 = vrot.lane.b32.xlu1 %v2843_v33, %s3269_s13  ;;  %v353_v16 = vld [vmem:[%s3321_s30 + $0x78] sm:$0xff]  ;;  %v643_v33 = vrot.slane %v3822_v18, 1  ;;  %v3867_v61 = vsel %vm616_vm4, %v692_v57, %v693_v56  ;;  %v3883_v45 = vsel %vm616_vm4, %v693_v56, %v695_v31 }
  0x6f   : > { %v392_v30 = vmul.f32 %v3395_v12, %v353_v16  ;;  %v430_v16 = vadd.f32 %v3404_v17, %v391_v20  ;;  %v393_v20 = vmul.f32 %v3395_v12, %v354_v58  ;;  %v434_v58 = vadd.f32 %v3404_v17, %v395_v62 }
  0x70   : > { %v3864_v27 = vsel %vm616_vm4, %v643_v33, %v645_v52  ;;  %v3902_v62 = vpack.i.bf16 %v3883_v45, %v3867_v61 }
  0x71   : > { %v431_v32 = vadd.f32 %v3404_v17, %v392_v30  ;;  %v462_v39 = vmax.f32 %v430_v16, 0.0  ;;  %v394_v30 = vmul.f32 %v3395_v12, %v355_v4  ;;  %v398_v4 = vmul.f32 %v3395_v12, %v359_v28 }
  0x72   : > { %2849 = vrot.lane.b32.xlu0 %v3780_v43, %s3268_s20  ;;  %2854 = vrot.lane.b32.xlu1 %v3790_v63, %s3268_s20  ;;  %v432_v52 = vadd.f32 %v3404_v17, %v393_v20  ;;  %v726_v16 = vrot.slane %v3808_v1, 2  ;;  %v773_v20 = vrot.slane %v3828_v37, 2 }
  0x73   : > { %v463_v25 = vmax.f32 %v431_v32, 0.0  ;;  %496 = vst.msk [vmem:[#allocation2 + $0xc1] sm:$0xff] %vm481_vm5, %v462_v39  ;;  %v396_v32 = vmul.f32 %v3395_v12, %v357_v36  ;;  %v433_v57 = vadd.f32 %v3404_v17, %v394_v30  ;;  %v437_v36 = vadd.f32 %v3404_v17, %v398_v4  ;;  %v534_v4 = vld [vmem:[#allocation2 + $0xa0] sm:$0x3] }
  0x74   : > { %v464_v28 = vmax.f32 %v432_v52, 0.0  ;;  %v774_v30 = vrot.slane %v3830_v7, 2 }
  0x75   : > { %497 = vst.msk [vmem:[#allocation2 + $0xc9] sm:$0xff] %vm481_vm5, %v463_v25  ;;  %v435_v39 = vadd.f32 %v3404_v17, %v396_v32  ;;  %v465_v31 = vmax.f32 %v433_v57, 0.0  ;;  %v776_v32 = vrot.slane %v3835_v54, 2 }
  0x76   : > { %2859 = vrot.lane.b32.xlu0 %v3594_v24, %s3268_s20  ;;  %2864 = vrot.lane.b32.xlu1 %v3806_v48, %s3268_s20  ;;  %v3861_v24 = vsel %vm616_vm4, %v642_v42, %v643_v33  ;;  %v723_v42 = vrot.slane %v3820_v22, 2  ;;  %v397_v33 = vmul.f32 %v3395_v12, %v358_v35  ;;  %v724_v22 = vrot.slane %v3822_v18, 2  ;;  %498 = vst.msk [vmem:[#allocation2 + $0xd9] sm:$0xff] %vm481_vm5, %v464_v28 }
  0x77   : > { %v3894_v12 = vpack.i.bf16 %v3864_v27, %v3861_v24  ;;  %v466_v35 = vmax.f32 %v434_v58, 0.0  ;;  %v467_v18 = vmax.f32 %v435_v39, 0.0  ;;  %499 = vst.msk [vmem:[#allocation2 + $0xe1] sm:$0xff] %vm481_vm5, %v465_v31  ;;  %v3925_v1 = vsel %vm697_vm3, %v773_v20, %v774_v30  ;;  %v536_v20 = vld [vmem:[#allocation2 + $0xb0] sm:$0xff] }
  0x78   : > { %v436_v25 = vadd.f32 %v3404_v17, %v397_v33  ;;  %v469_v17 = vmax.f32 %v437_v36, 0.0  ;;  %4948 = vst [vmem:[#allocation19_spill] sm:$0xff] %v3925_v1  ;;  %v3928_v37 = vsel %vm697_vm3, %v774_v30, %v776_v32  ;;  %v533_v33 = vld [vmem:[#allocation2 + $0x98] sm:$0xff]  ;;  %v650_v58 = vrot.slane %v534_v4, 1 }
  0x79   : > { %500 = vst.msk [vmem:[#allocation2 + $0xf1] sm:$0xff] %vm481_vm5, %v466_v35  ;;  %501 = vst.msk [vmem:[#allocation2 + $0xf9] sm:$0xff] %vm481_vm5, %v467_v18  ;;  %v2913_v54 = vpack.i.bf16 %v3928_v37, %v3925_v1  ;;  %v648_v57 = vrot.slane %v533_v33, 1  ;;  %v782_v39 = vrot.slane %v3782_v44, 1  ;;  %v729_v31 = vrot.slane %v533_v33, 2 }
  0x7a   : > { %2869 = vrot.lane.b32.xlu0 %v3839_v21, %s3267_s19  ;;  %2874 = vrot.lane.b32.xlu1 %v3850_v53, %s3267_s19  ;;  %v468_v56 = vmax.f32 %v436_v25, 0.0  ;;  %503 = vst.msk [vmem:[#allocation2 + $0x111] sm:$0xff] %vm481_vm5, %v469_v17  ;;  %4949 = vst [vmem:[#allocation20_spill] sm:$0xff] %v3928_v37  ;;  %v784_v25 = vrot.slane %v3798_v55, 1  ;;  %v731_v35 = vrot.slane %v534_v4, 2  ;;  %v4004_v17 = vld [vmem:[#allocation2 + $0x198] sm:$0xff] }
  0x7b   : > { %v537_v30 = vld [vmem:[#allocation2 + $0xb8] sm:$0x3]  ;;  %v826_v4 = vrot.slane %v4004_v17, 1 }
  0x7c   : > { %502 = vst.msk [vmem:[#allocation2 + $0x109] sm:$0xff] %vm481_vm5, %v468_v56  ;;  %v2973_v56 = vpack.i.bf16 %v3814_v6, %v3811_v2 }
  0x7e   : > { %2879 = vrot.lane.b32.xlu0 %v3625_v40, %s3267_s19  ;;  %2884 = vrot.lane.b32.xlu1 %v3629_v41, %s3267_s19  ;;  %v3919_v40 = vsel %vm697_vm3, %v723_v42, %v724_v22  ;;  %v3922_v41 = vsel %vm697_vm3, %v724_v22, %v726_v16  ;;  %v532_v42 = vld [vmem:[#allocation2 + $0x90] sm:$0xff]  ;;  %v781_v22 = vrot.slane %v3776_v38, 1  ;;  %v535_v16 = vld [vmem:[#allocation2 + $0xa8] sm:$0xff]  ;;  %v4078_v6 = vld [vmem:[#allocation2 + $0xe0] sm:$0xff] }
  0x7f   : > { %4946 = vst [vmem:[#allocation17_spill] sm:$0xff] %v3919_v40  ;;  %4947 = vst [vmem:[#allocation18_spill] sm:$0xff] %v3922_v41  ;;  %v3936_v7 = vpack.i.bf16 %v3922_v41, %v3919_v40  ;;  %v647_v52 = vrot.slane %v532_v42, 1  ;;  %v728_v28 = vrot.slane %v532_v42, 2  ;;  %v4014_v32 = vpack.i.bf16 %v536_v20, %v535_v16  ;;  %v4080_v37 = vld [vmem:[#allocation2 + $0xe8] sm:$0x3] }
  0x80   : > { %v3967_v36 = vsel %vm616_vm4, %v781_v22, %v782_v39 }
  0x82   : > { %2889 = vrot.lane.b32.xlu0 %v3894_v12, %s3269_s13  ;;  %2894 = vrot.lane.b32.xlu1 %v3902_v62, %s3269_s13 }
  0x86   : > { %2899 = vrot.lane.b32.xlu0 %v3654_v3, %s3269_s13  ;;  %2904 = vrot.lane.b32.xlu1 %v3682_v23, %s3269_s13  ;;  %v3947_v3 = vpack.i.bf16 %v533_v33, %v532_v42  ;;  %v3951_v23 = vpack.i.bf16 %v3782_v44, %v3776_v38  ;;  %v3970_v38 = vsel %vm616_vm4, %v782_v39, %v784_v25 }
  0x87   : > { %v2953_v55 = vpack.i.bf16 %v3970_v38, %v3967_v36 }
  0x8a   : > { %2909 = vrot.lane.b32.xlu0 %v3936_v7, %s3268_s20  ;;  %2914 = vrot.lane.b32.xlu1 %v2913_v54, %s3268_s20 }
  0x8e   : > { %2919 = vrot.lane.b32.xlu0 %v3743_v26, %s3268_s20  ;;  %2924 = vrot.lane.b32.xlu1 %v3747_v29, %s3268_s20  ;;  %v3961_v26 = vsel %vm616_vm4, %v647_v52, %v648_v57  ;;  %v3964_v29 = vsel %vm616_vm4, %v648_v57, %v650_v58  ;;  %v652_v52 = vrot.slane %v535_v16, 1  ;;  %v653_v57 = vrot.slane %v536_v20, 1 }
  0x8f   : > { %v3978_v44 = vpack.i.bf16 %v3964_v29, %v3961_v26  ;;  %v655_v58 = vrot.slane %v537_v30, 1 }
  0x92   : > { %2929 = vrot.lane.b32.xlu0 %v3947_v3, %s3267_s19  ;;  %2934 = vrot.lane.b32.xlu1 %v3951_v23, %s3267_s19 }
  0x96   : > { %2939 = vrot.lane.b32.xlu0 %v3780_v43, %s3267_s19  ;;  %2944 = vrot.lane.b32.xlu1 %v3790_v63, %s3267_s19  ;;  %v3986_v43 = vsel %vm697_vm3, %v728_v28, %v729_v31  ;;  %v3989_v63 = vsel %vm697_vm3, %v729_v31, %v731_v35  ;;  %v4042_v31 = vld [vmem:[%s4892_s3 + $0x88] sm:$0xff]   ;;  %v733_v35 = vrot.slane %v535_v16, 2 }
  0x97   : > { %4950 = vst [vmem:[#allocation21_spill] sm:$0xff] %v3986_v43  ;;  %4951 = vst [vmem:[#allocation22_spill] sm:$0xff] %v3989_v63  ;;  %v3997_v18 = vpack.i.bf16 %v3989_v63, %v3986_v43  ;;  %2664 = vmatprep.subr.bf16.mxu1 %v4042_v31  ;;  %v3226_v43 = vld [vmem:[#allocation2] sm:$0xff] }
  0x9a   : > { %2949 = vrot.lane.b32.xlu0 %v3978_v44, %s3269_s13  ;;  %2954 = vrot.lane.b32.xlu1 %v2953_v55, %s3269_s13 }
  0x9e   : > { %2959 = vrot.lane.b32.xlu0 %v3839_v21, %s3269_s13  ;;  %2964 = vrot.lane.b32.xlu1 %v3850_v53, %s3269_s13  ;;  %v4006_v21 = vld [vmem:[#allocation2 + $0x1a0] sm:$0xff]  ;;  %v4008_v53 = vld [vmem:[#allocation2 + $0x1a8] sm:$0x3] }
  0x9f   : > { %v827_v42 = vrot.slane %v4006_v21, 1  ;;  %v2993_v33 = vpack.i.bf16 %v4006_v21, %v4004_v17  ;;  %v829_v22 = vrot.slane %v4008_v53, 1 }
  0xa1   : > { %v828_v39 = vsel %vm616_vm4, %v826_v4, %v827_v42  ;;  %v830_v25 = vsel %vm616_vm4, %v827_v42, %v829_v22  ;;  %v538_v42 = vld [vmem:[#allocation2 + $0xc0] sm:$0xff] }
  0xa2   : > { %2969 = vrot.lane.b32.xlu0 %v3997_v18, %s3268_s20  ;;  %2974 = vrot.lane.b32.xlu1 %v2973_v56, %s3268_s20  ;;  %v3013_v28 = vpack.i.bf16 %v830_v25, %v828_v39  ;;  %v734_v56 = vrot.slane %v536_v20, 2  ;;  %v657_v16 = vrot.slane %v538_v42, 1  ;;  %v738_v22 = vrot.slane %v538_v42, 2 }
  0xa6   : > { %2979 = vrot.lane.b32.xlu0 %v3894_v12, %s3268_s20  ;;  %2984 = vrot.lane.b32.xlu1 %v3902_v62, %s3268_s20  ;;  %v4025_v12 = vsel %vm616_vm4, %v652_v52, %v653_v57  ;;  %v4028_v62 = vsel %vm616_vm4, %v653_v57, %v655_v58  ;;  %v540_v52 = vld [vmem:[#allocation2 + $0xd0] sm:$0x3]  ;;  %v4049_v57 = vsel %vm697_vm3, %v733_v35, %v734_v56 }
  0xa7   : > { %4952 = vst [vmem:[#allocation23_spill] sm:$0xff] %v4025_v12  ;;  %4953 = vst [vmem:[#allocation24_spill] sm:$0xff] %v4028_v62  ;;  %v4037_v55 = vpack.i.bf16 %v4028_v62, %v4025_v12  ;;  %v741_v25 = vrot.slane %v540_v52, 2 }
  0xa8   : > { %4954 = vst [vmem:[#allocation25_spill] sm:$0xff] %v4049_v57 }
  0xa9   : > { %v2730_v4 = vpop.permute.xlu0 %2729 }
  0xaa   : > { %2989 = vrot.lane.b32.xlu0 %v4014_v32, %s3267_s19  ;;  %2994 = vrot.lane.b32.xlu1 %v2993_v33, %s3267_s19  ;;  %v736_v33 = vrot.slane %v537_v30, 2  ;;  %v660_v30 = vrot.slane %v540_v52, 1  ;;  %v2732_v1 = vunpack.i.h.bf16 %v2730_v4 }
  0xac   : > { %v4052_v58 = vsel %vm697_vm3, %v734_v56, %v736_v33 }
  0xad   : > { %4955 = vst [vmem:[#allocation26_spill] sm:$0xff] %v4052_v58  ;;  %v4062_v35 = vpack.i.bf16 %v4052_v58, %v4049_v57  ;;  %v2731_v58 = vunpack.i.l.bf16 %v2730_v4  ;;  %v665_v57 = vrot.slane %v4080_v37, 1 }
  0xae   : > { %2999 = vrot.lane.b32.xlu0 %v3936_v7, %s3267_s19  ;;  %3004 = vrot.lane.b32.xlu1 %v2913_v54, %s3267_s19  ;;  %v539_v7 = vld [vmem:[#allocation2 + $0xc8] sm:$0xff]  ;;  %v2735_v54 = vpop.permute.xlu1 %2734 }
  0xaf   : > { %v658_v20 = vrot.slane %v539_v7, 1  ;;  %v739_v39 = vrot.slane %v539_v7, 2 }
  0xb1   : > { %v4065_v33 = vsel %vm616_vm4, %v657_v16, %v658_v20  ;;  %v4068_v2 = vsel %vm616_vm4, %v658_v20, %v660_v30  ;;  %v4071_v52 = vsel %vm697_vm3, %v738_v22, %v739_v39  ;;  %v4086_v16 = vpack.i.bf16 %v539_v7, %v538_v42 }
  0xb2   : > { %3009 = vrot.lane.b32.xlu0 %v4037_v55, %s3269_s13  ;;  %3014 = vrot.lane.b32.xlu1 %v3013_v28, %s3269_s13  ;;  %4956 = vst [vmem:[#allocation27_spill] sm:$0xff] %v4065_v33  ;;  %4957 = vst [vmem:[#allocation28_spill] sm:$0xff] %v4068_v2  ;;  %v4090_v20 = vpack.i.bf16 %v4068_v2, %v4065_v33  ;;  %v2736_v42 = vunpack.i.l.bf16 %v2735_v54  ;;  %v1444_v33 = vsel %vm481_vm5, %v3226_v43, %v2731_v58  ;;  %v3227_v2 = vld [vmem:[#allocation2 + $0x8] sm:$0xff] }
  0xb3   : > { %4958 = vst [vmem:[#allocation29_spill] sm:$0xff] %v4071_v52  ;;  %v1445_v41 = vsel %vm481_vm5, %v3227_v2, %v2732_v1  ;;  %v744_v43 = vrot.slane %v4078_v6, 2 }
  0xb4   : > { %v1477_v34 = vsel %vm1476_vm6, %v1444_v33, %v2736_v42 }
  0xb5   : > { %v4058_v28 = vpop.permute.xlu0 %2749 }
  0xb6   : > { %3019 = vrot.lane.b32.xlu0 %v3947_v3, %s3269_s13  ;;  %3024 = vrot.lane.b32.xlu1 %v3951_v23, %s3269_s13  ;;  %v4074_v3 = vsel %vm697_vm3, %v739_v39, %v741_v25  ;;  %v4076_v23 = vld [vmem:[#allocation2 + $0xd8] sm:$0xff]  ;;  %v663_v25 = vrot.slane %v4078_v6, 1 }
  0xb7   : > { %4959 = vst [vmem:[#allocation30_spill] sm:$0xff] %v4074_v3  ;;  %v4094_v39 = vpack.i.bf16 %v4074_v3, %v4071_v52  ;;  %v662_v4 = vrot.slane %v4076_v23, 1  ;;  %v743_v3 = vrot.slane %v4076_v23, 2 }
  0xb8   : > { %v2740_v56 = vpop.permute.xlu1 %2739 }
  0xb9   : > { %v2742_v58 = vunpack.i.h.bf16 %v2740_v56  ;;  %v2741_v2 = vunpack.i.l.bf16 %v2740_v56  ;;  %v4112_v62 = vsel %vm616_vm4, %v662_v4, %v663_v25  ;;  %v4127_v4 = vld [vmem:[#allocation2 + $0xf0] sm:$0xff] }
  0xba   : > { %3029 = vrot.lane.b32.xlu0 %v4062_v35, %s3268_s20  ;;  %3034 = vrot.lane.b32.xlu1 %v3978_v44, %s3268_s20  ;;  %v2737_v44 = vunpack.i.h.bf16 %v2735_v54  ;;  %4960 = vst [vmem:[#allocation31_spill] sm:$0xff] %v4112_v62 }
  0xbc   : > { %v2745_v30 = vpop.permute.xlu1 %2744  ;;  %v2755_v22 = vpop.permute.xlu0 %2754 }
  0xbd   : > { %v2757_v7 = vunpack.i.h.bf16 %v2755_v22  ;;  %v2756_v63 = vunpack.i.l.bf16 %v2755_v22  ;;  %v2746_v40 = vunpack.i.l.bf16 %v2745_v30  ;;  %v2747_v52 = vunpack.i.h.bf16 %v2745_v30 }
  0xbe   : > { %3039 = vrot.lane.b32.xlu0 %v4086_v16, %s3267_s19  ;;  %3044 = vrot.lane.b32.xlu1 %v3997_v18, %s3267_s19  ;;  %v4115_v18 = vsel %vm616_vm4, %v663_v25, %v665_v57  ;;  %v746_v57 = vrot.slane %v4080_v37, 2 }
  0xbf   : > { %v1542_v54 = vsel %vm481_vm5, %v3508_v50, %v2756_v63  ;;  %v1543_v22 = vsel %vm481_vm5, %v3511_v51, %v2757_v7  ;;  %4961 = vst [vmem:[#allocation32_spill] sm:$0xff] %v4115_v18  ;;  %v1478_v50 = vsel %vm1476_vm6, %v1445_v41, %v2737_v44  ;;  %v1510_v56 = vsel %vm1509_vm7, %v1477_v34, %v2746_v40 }
  0xc0   : > { %v2760_v1 = vpop.permute.xlu0 %2759  ;;  %v2770_v12 = vpop.permute.xlu1 %2769  ;;  %v1574_v51 = vsel %vm1476_vm6, %v1542_v54, %v2741_v2  ;;  %v1575_v63 = vsel %vm1476_vm6, %v1543_v22, %v2742_v58  ;;  %v1511_v44 = vsel %vm1509_vm7, %v1478_v50, %v2747_v52  ;;  %v4134_v54 = vpack.i.bf16 %v4078_v6, %v4076_v23  ;;  %v3228_v52 = vld [vmem:[#allocation2 + $0x18] sm:$0xff] }
  0xc1   : > { %v2762_v5 = vunpack.i.h.bf16 %v2760_v1  ;;  %v2761_v30 = vunpack.i.l.bf16 %v2760_v1  ;;  %v2771_v25 = vunpack.i.l.bf16 %v2770_v12  ;;  %v2772_v42 = vunpack.i.h.bf16 %v2770_v12  ;;  %v545_v50 = vld [vmem:[#allocation2 + $0xf8] sm:$0xff] }
  0xc2   : > { %3049 = vrot.lane.b32.xlu0 %v4090_v20, %s3269_s13  ;;  %3054 = vrot.lane.b32.xlu1 %v4014_v32, %s3269_s13  ;;  %v667_v22 = vrot.slane %v4127_v4, 1  ;;  %v4143_v12 = vpack.i.bf16 %v4115_v18, %v4112_v62  ;;  %v4146_v6 = vsel %vm697_vm3, %v743_v3, %v744_v43  ;;  %v3229_v3 = vld [vmem:[#allocation2 + $0x20] sm:$0xff] }
  0xc3   : > { %v1606_v33 = vsel %vm1509_vm7, %v1574_v51, %v2761_v30  ;;  %v1607_v41 = vsel %vm1509_vm7, %v1575_v63, %v2762_v5  ;;  %v1638_v5 = vpack.c.bf16 %v1511_v44, %v1510_v56  ;;  %v1446_v23 = vsel %vm481_vm5, %v3228_v52, %v2771_v25 }
  0xc4   : > { %v2765_v7 = vpop.permute.xlu0 %2764  ;;  %v2775_v32 = vpop.permute.xlu1 %2774  ;;  %v1639_v1 = vpack.c.bf16 %v1607_v41, %v1606_v33  ;;  %v2752_v51 = vunpack.i.h.bf16 %v4058_v28  ;;  %v2751_v63 = vunpack.i.l.bf16 %v4058_v28  ;;  %v1447_v56 = vsel %vm481_vm5, %v3229_v3, %v2772_v42 }
  0xc5   : > { %v2767_v34 = vunpack.i.h.bf16 %v2765_v7  ;;  %v2766_v40 = vunpack.i.l.bf16 %v2765_v7  ;;  %v2776_v37 = vunpack.i.l.bf16 %v2775_v32  ;;  %v2777_v58 = vunpack.i.h.bf16 %v2775_v32  ;;  %v546_v32 = vld [vmem:[#allocation2 + $0x100] sm:$0x3] }
  0xc6   : > { %3059 = vrot.lane.b32.xlu0 %v4094_v39, %s3268_s20  ;;  %3064 = vrot.lane.b32.xlu1 %v4037_v55, %s3268_s20  ;;  %v4154_v55 = vsel %vm697_vm3, %v744_v43, %v746_v57  ;;  %v668_v42 = vrot.slane %v545_v50, 1  ;;  %v670_v3 = vrot.slane %v546_v32, 1 }
  0xc7   : > { %v1545_v2 = vsel %vm481_vm5, %v3505_v47, %v2767_v34  ;;  %v1544_v30 = vsel %vm481_vm5, %v3502_v46, %v2766_v40  ;;  %1917 = vmatprep.mubr.bf16.mxu0 %v1639_v1  ;;  %v1479_v25 = vsel %vm1476_vm6, %v1446_v23, %v2776_v37  ;;  %v1480_v43 = vsel %vm1476_vm6, %v1447_v56, %v2777_v58 }
  0xc8   : > { %1918 = vmatmul.mubr.bf16.vlgmr.msra.gmra.mxu0 %v1638_v5  ;;  %v2780_v33 = vpop.permute.xlu0 %2779  ;;  %v2785_v47 = vpop.permute.xlu1 %2784  ;;  %v1576_v28 = vsel %vm1476_vm6, %v1544_v30, %v2751_v63  ;;  %v1577_v57 = vsel %vm1476_vm6, %v1545_v2, %v2752_v51  ;;  %v547_v2 = vld [vmem:[#allocation2 + $0x108] sm:$0xff]  ;;  %v548_v30 = vld [vmem:[#allocation2 + $0x110] sm:$0xff]  ;;  %v4180_v51 = vsel %vm616_vm4, %v667_v22, %v668_v42  ;;  %v549_v63 = vld [vmem:[#allocation2 + $0x118] sm:$0x3]  ;;  %v4193_v22 = vpack.i.bf16 %v545_v50, %v4127_v4 }
  0xc9   : > { %v2782_v41 = vunpack.i.h.bf16 %v2780_v33  ;;  %v2781_v44 = vunpack.i.l.bf16 %v2780_v33  ;;  %v2787_v46 = vunpack.i.h.bf16 %v2785_v47  ;;  %v2786_v7 = vunpack.i.l.bf16 %v2785_v47  ;;  %4962 = vst [vmem:[#allocation33_spill] sm:$0xff] %v4180_v51 }
  0xca   : > { %3069 = vrot.lane.b32.xlu0 %v4134_v54, %s3267_s19  ;;  %3074 = vrot.lane.b32.xlu1 %v4062_v35, %s3267_s19  ;;  %v4177_v35 = vpack.i.bf16 %v4154_v55, %v4146_v6  ;;  %v4185_v33 = vsel %vm616_vm4, %v668_v42, %v670_v3  ;;  %v749_v47 = vrot.slane %v545_v50, 2  ;;  %v754_v50 = vrot.slane %v548_v30, 2 }
  0xcb   : > { %v1608_v1 = vsel %vm1509_vm7, %v1576_v28, %v2781_v44  ;;  %v1609_v34 = vsel %vm1509_vm7, %v1577_v57, %v2782_v41  ;;  %v1512_v40 = vsel %vm1509_vm7, %v1479_v25, %v2786_v7  ;;  %v1513_v37 = vsel %vm1509_vm7, %v1480_v43, %v2787_v46  ;;  %4963 = vst [vmem:[#allocation34_spill] sm:$0xff] %v4185_v33 }
  0xcc   : > { %v2790_v58 = vpop.permute.xlu0 %2789  ;;  %v2795_v5 = vpop.permute.xlu1 %2794  ;;  %v1642_v52 = vpack.c.bf16 %v1609_v34, %v1608_v1  ;;  %v1641_v23 = vpack.c.bf16 %v1513_v37, %v1512_v40  ;;  %v751_v41 = vrot.slane %v546_v32, 2  ;;  %v672_v44 = vrot.slane %v547_v2, 1 }
  0xcd   : > { %v673_v46 = vrot.slane %v548_v30, 1  ;;  %v675_v7 = vrot.slane %v549_v63, 1  ;;  %v4197_v43 = vpack.i.bf16 %v4185_v33, %v4180_v51  ;;  %v4199_v28 = vpack.i.bf16 %v548_v30, %v547_v2 }
  0xce   : > { %3079 = vrot.lane.b32.xlu0 %v4143_v12, %s3269_s13  ;;  %3084 = vrot.lane.b32.xlu1 %v4086_v16, %s3269_s13  ;;  %v748_v16 = vrot.slane %v4127_v4, 2  ;;  %v4205_v1 = vsel %vm697_vm3, %v749_v47, %v751_v41  ;;  %v753_v34 = vrot.slane %v547_v2, 2  ;;  %v756_v40 = vrot.slane %v549_v63, 2 }
  0xcf   : > { %1925 = vmatprep.mubr.bf16.mxu0 %v1642_v52  ;;  %4964 = vst [vmem:[#allocation35_spill] sm:$0xff] %v4205_v1  ;;  %v4208_v4 = vsel %vm616_vm4, %v672_v44, %v673_v46  ;;  %v2791_v37 = vunpack.i.l.bf16 %v2790_v58  ;;  %v2797_v52 = vunpack.i.h.bf16 %v2795_v5  ;;  %v4215_v3 = vsel %vm616_vm4, %v673_v46, %v675_v7 }
  0xd0   : > { %1926 = vmatmul.mubr.bf16.gmra.mxu0 %v1641_v23  ;;  %v2800_v56 = vpop.permute.xlu0 %2799  ;;  %v4182_v25 = vpop.permute.xlu1 %2804  ;;  %v4202_v42 = vsel %vm697_vm3, %v748_v16, %v749_v47  ;;  %4965 = vst [vmem:[#allocation36_spill] sm:$0xff] %v4208_v4  ;;  %v2796_v23 = vunpack.i.l.bf16 %v2795_v5  ;;  %4966 = vst [vmem:[#allocation37_spill] sm:$0xff] %v4215_v3  ;;  %v4232_v46 = vsel %vm697_vm3, %v754_v50, %v756_v40  ;;  %v3231_v40 = vld [vmem:[#allocation2 + $0x30] sm:$0xff] }
  0xd1   : > { %v2802_v16 = vunpack.i.h.bf16 %v2800_v56  ;;  %v2801_v2 = vunpack.i.l.bf16 %v2800_v56  ;;  %v2807_v47 = vunpack.i.h.bf16 %v4182_v25  ;;  %v4220_v30 = vpack.i.bf16 %v4205_v1, %v4202_v42 }
  0xd2   : > { %3089 = vrot.lane.b32.xlu0 %v4177_v35, %s3268_s20  ;;  %3094 = vrot.lane.b32.xlu1 %v4090_v20, %s3268_s20  ;;  %v2792_v20 = vunpack.i.h.bf16 %v2790_v58  ;;  %v4229_v56 = vsel %vm697_vm3, %v753_v34, %v754_v50  ;;  %v1546_v7 = vsel %vm481_vm5, %v3569_v11, %v2791_v37  ;;  %v1567_v34 = vsel %vm481_vm5, %v3796_v49, %v2797_v52  ;;  %v4246_v11 = vld [vmem:[#allocation2 + $0x128] sm:$0xff] }
  0xd3   : > { %v2806_v37 = vunpack.i.l.bf16 %v4182_v25 }
  0xd4   : > { %v2810_v57 = vpop.permute.xlu0 %2809  ;;  %v2815_v32 = vpop.permute.xlu1 %2814  ;;  %v1547_v51 = vsel %vm481_vm5, %v3572_v13, %v2792_v20  ;;  %v1566_v13 = vsel %vm481_vm5, %v3793_v0, %v2796_v23  ;;  %v3230_v20 = vld [vmem:[#allocation2 + $0x38] sm:$0xff] }
  0xd5   : > { %v2812_v58 = vunpack.i.h.bf16 %v2810_v57  ;;  %v2811_v63 = vunpack.i.l.bf16 %v2810_v57  ;;  %v2816_v5 = vunpack.i.l.bf16 %v2815_v32  ;;  %v2817_v57 = vunpack.i.h.bf16 %v2815_v32 }
  0xd6   : > { %3099 = vrot.lane.b32.xlu0 %v4193_v22, %s3267_s19  ;;  %3104 = vrot.lane.b32.xlu1 %v4094_v39, %s3267_s19  ;;  %v4226_v39 = vpack.i.bf16 %v4215_v3, %v4208_v4  ;;  %v1449_v50 = vsel %vm481_vm5, %v3230_v20, %v2802_v16  ;;  %v1448_v4 = vsel %vm481_vm5, %v3231_v40, %v2801_v2 }
  0xd7   : > { %v1469_v32 = vsel %vm481_vm5, %v4246_v11, %v2807_v47  ;;  %v1579_v0 = vsel %vm1476_vm6, %v1547_v51, %v2812_v58  ;;  %v1598_v52 = vsel %vm1476_vm6, %v1566_v13, %v2816_v5  ;;  %v1599_v51 = vsel %vm1476_vm6, %v1567_v34, %v2817_v57 }
  0xd8   : > { %v2820_v41 = vpop.permute.xlu0 %2819  ;;  %v2825_v44 = vpop.permute.xlu1 %2824 }
  0xd9   : > { %v2821_v23 = vunpack.i.l.bf16 %v2820_v41  ;;  %v2822_v40 = vunpack.i.h.bf16 %v2820_v41  ;;  %v2827_v62 = vunpack.i.h.bf16 %v2825_v44  ;;  %v2826_v18 = vunpack.i.l.bf16 %v2825_v44 }
  0xda   : > { %3109 = vrot.lane.b32.xlu0 %v4197_v43, %s3269_s13  ;;  %3114 = vrot.lane.b32.xlu1 %v4134_v54, %s3269_s13  ;;  %v1578_v54 = vsel %vm1476_vm6, %v1546_v7, %v2811_v63  ;;  %v3233_v63 = vld [vmem:[#allocation2 + $0x120] sm:$0xff] }
  0xdb   : > { %v1468_v5 = vsel %vm481_vm5, %v3233_v63, %v2806_v37  ;;  %v1481_v41 = vsel %vm1476_vm6, %v1448_v4, %v2821_v23 }
  0xdc   : > { %v2830_v3 = vpop.permute.xlu0 %2829  ;;  %v2835_v49 = vpop.permute.xlu1 %2834 }
  0xdd   : > { %v2832_v16 = vunpack.i.h.bf16 %v2830_v3  ;;  %v2831_v20 = vunpack.i.l.bf16 %v2830_v3  ;;  %v2837_v33 = vunpack.i.h.bf16 %v2835_v49  ;;  %v2836_v2 = vunpack.i.l.bf16 %v2835_v49 }
  0xde   : > { %3119 = vrot.lane.b32.xlu0 %v4220_v30, %s3268_s20  ;;  %3124 = vrot.lane.b32.xlu1 %v4143_v12, %s3268_s20 }
  0xdf   : > { %v1610_v25 = vsel %vm1509_vm7, %v1578_v54, %v2831_v20  ;;  %v1611_v47 = vsel %vm1509_vm7, %v1579_v0, %v2832_v16  ;;  %v1630_v58 = vsel %vm1509_vm7, %v1598_v52, %v2836_v2  ;;  %v1631_v3 = vsel %vm1509_vm7, %v1599_v51, %v2837_v33 }
  0xe0   : > { %v2840_v44 = vpop.permute.xlu0 %2839  ;;  %v2845_v7 = vpop.permute.xlu1 %2844  ;;  %v1645_v13 = vpack.c.bf16 %v1611_v47, %v1610_v25  ;;  %v1675_v49 = vpack.c.bf16 %v1631_v3, %v1630_v58  ;;  %v1482_v54 = vsel %vm1476_vm6, %v1449_v50, %v2822_v40  ;;  %v1501_v0 = vsel %vm1476_vm6, %v1468_v5, %v2826_v18  ;;  %v4300_v3 = vld [vmem:[#allocation2 + $0x138] sm:$0xff] }
  0xe1   : > { %v2842_v12 = vunpack.i.h.bf16 %v2840_v44  ;;  %v2841_v1 = vunpack.i.l.bf16 %v2840_v44  ;;  %v2847_v57 = vunpack.i.h.bf16 %v2845_v7  ;;  %v2846_v34 = vunpack.i.l.bf16 %v2845_v7 }
  0xe2   : > { %v1502_v52 = vsel %vm1476_vm6, %v1469_v32, %v2827_v62  ;;  %3129 = vrot.lane.b32.xlu0 %v4199_v28, %s3267_s19  ;;  %3134 = vrot.lane.b32.xlu1 %v4177_v35, %s3267_s19  ;;  %v4282_v35 = vpack.i.bf16 %v4232_v46, %v4229_v56  ;;  %v832_v2 = vrot.slane %v4006_v21, 2  ;;  %v834_v40 = vrot.slane %v4008_v53, 2 }
  0xe3   : > { %1933 = vmatprep.mubr.bf16.mxu0 %v1645_v13  ;;  %2013 = vmatprep.mubr.bf16.mxu1 %v1675_v49  ;;  %v1514_v33 = vsel %vm1509_vm7, %v1481_v41, %v2841_v1  ;;  %v1515_v4 = vsel %vm1509_vm7, %v1482_v54, %v2842_v12  ;;  %v1534_v37 = vsel %vm1509_vm7, %v1501_v0, %v2846_v34  ;;  %v3225_v1 = vld [vmem:[%s4892_s3 + $0x80] sm:$0xff]  }
  0xe4   : > { %v2850_v23 = vpop.permute.xlu0 %2849  ;;  %v2855_v50 = vpop.permute.xlu1 %2854  ;;  %v1644_v16 = vpack.c.bf16 %v1515_v4, %v1514_v33  ;;  %v1535_v18 = vsel %vm1509_vm7, %v1502_v52, %v2847_v57  ;;  %v4298_v51 = vpack.i.bf16 %v4246_v11, %v3233_v63  ;;  %v4314_v11 = vsel %vm697_vm3, %v832_v2, %v834_v40  ;;  %v3236_v4 = vld [vmem:[#allocation2 + $0x50] sm:$0xff] }
  0xe5   : > { %v1674_v62 = vpack.c.bf16 %v1535_v18, %v1534_v37  ;;  %v2852_v58 = vunpack.i.h.bf16 %v2850_v23  ;;  %v2851_v21 = vunpack.i.l.bf16 %v2850_v23  ;;  %v2857_v53 = vunpack.i.h.bf16 %v2855_v50 }
  0xe6   : > { %3139 = vrot.lane.b32.xlu0 %v4226_v39, %s3269_s13  ;;  %3144 = vrot.lane.b32.xlu1 %v4193_v22, %s3269_s13  ;;  %v831_v22 = vrot.slane %v4004_v17, 2  ;;  %v2856_v5 = vunpack.i.l.bf16 %v2855_v50 }
  0xe7   : > { %1934 = vmatmul.mubr.bf16.gmra.mxu0 %v1644_v16  ;;  %2014 = vmatmul.mubr.bf16.vlgmr.msra.gmra.mxu1 %v1674_v62  ;;  %v1548_v54 = vsel %vm481_vm5, %v3722_v9, %v2851_v21  ;;  %v1569_v0 = vsel %vm481_vm5, %v3731_v19, %v2857_v53 }
  0xe8   : > { %v2860_v32 = vpop.permute.xlu0 %2859  ;;  %v4287_v20 = vpop.permute.xlu1 %2864  ;;  %2665 = vmatpush3.bf16.msra.mxu1 %v4042_v31  ;;  %v4302_v31 = vld [vmem:[#allocation2 + $0x140] sm:$0xff]  ;;  %v1568_v52 = vsel %vm481_vm5, %v3728_v14, %v2856_v5 }
  0xe9   : > { %2666 = vmatprep.subr.bf16.mxu1 %v3225_v1  ;;  %v3188_v17 = vpack.i.bf16 %v4302_v31, %v4300_v3  ;;  %v2862_v63 = vunpack.i.h.bf16 %v2860_v32  ;;  %v2861_v41 = vunpack.i.l.bf16 %v2860_v32  ;;  %v2867_v44 = vunpack.i.h.bf16 %v4287_v20 }
  0xea   : > { %3149 = vrot.lane.b32.xlu0 %v4282_v35, %s3268_s20  ;;  %3154 = vrot.lane.b32.xlu1 %v4197_v43, %s3268_s20  ;;  %v4311_v43 = vsel %vm697_vm3, %v831_v22, %v832_v2  ;;  %v2866_v19 = vunpack.i.l.bf16 %v4287_v20 }
  0xeb   : > { %v1685_v34 = vpack.c.bf16 %v4314_v11, %v4311_v43  ;;  %v1451_v37 = vsel %vm481_vm5, %v3236_v4, %v2862_v63  ;;  %v1471_v9 = vsel %vm481_vm5, %v4302_v31, %v2867_v44 }
  0xec   : > { %v2870_v25 = vpop.permute.xlu0 %2869  ;;  %v2875_v47 = vpop.permute.xlu1 %2874  ;;  %2667 = vmatpush3.bf16.msra.mxu1 %v3225_v1  ;;  %v1470_v5 = vsel %vm481_vm5, %v4300_v3, %v2866_v19 }
  0xed   : > { %v2872_v7 = vunpack.i.h.bf16 %v2870_v25  ;;  %v2871_v13 = vunpack.i.l.bf16 %v2870_v25  ;;  %v2876_v49 = vunpack.i.l.bf16 %v2875_v47  ;;  %v2877_v33 = vunpack.i.h.bf16 %v2875_v47 }
  0xee   : > { %3159 = vrot.lane.b32.xlu0 %v4298_v51, %s3267_s19  ;;  %3164 = vrot.lane.b32.xlu1 %v4220_v30, %s3267_s19  ;;  %v1549_v30 = vsel %vm481_vm5, %v3725_v10, %v2852_v58  ;;  %v3237_v10 = vld [vmem:[#allocation2 + $0x48] sm:$0xff] }
  0xef   : > { %v1450_v23 = vsel %vm481_vm5, %v3237_v10, %v2861_v41  ;;  %v1580_v14 = vsel %vm1476_vm6, %v1548_v54, %v2871_v13  ;;  %v1581_v50 = vsel %vm1476_vm6, %v1549_v30, %v2872_v7  ;;  %v1601_v22 = vsel %vm1476_vm6, %v1569_v0, %v2877_v33 }
  0xf0   : > { %v2880_v12 = vpop.permute.xlu0 %2879  ;;  %v2885_v57 = vpop.permute.xlu1 %2884 }
  0xf1   : > { %v2881_v16 = vunpack.i.l.bf16 %v2880_v12  ;;  %v2882_v40 = vunpack.i.h.bf16 %v2880_v12  ;;  %v2887_v25 = vunpack.i.h.bf16 %v2885_v57  ;;  %v2886_v47 = vunpack.i.l.bf16 %v2885_v57 }
  0xf2   : > { %3169 = vrot.lane.b32.xlu0 %v3671_v15, %s3269_s13  ;;  %3174 = vrot.lane.b32.xlu1 %v4199_v28, %s3269_s13  ;;  %v1600_v15 = vsel %vm1476_vm6, %v1568_v52, %v2876_v49 }
  0xf3   : > { %v1483_v63 = vsel %vm1476_vm6, %v1450_v23, %v2881_v16  ;;  %v1484_v57 = vsel %vm1476_vm6, %v1451_v37, %v2882_v40  ;;  %v1503_v30 = vsel %vm1476_vm6, %v1470_v5, %v2886_v47  ;;  %v1504_v54 = vsel %vm1476_vm6, %v1471_v9, %v2887_v25  ;;  %v3240_v5 = vld [vmem:[#allocation2 + $0x158] sm:$0xff] }
  0xf4   : > { %v2890_v18 = vpop.permute.xlu0 %2889  ;;  %v2895_v28 = vpop.permute.xlu1 %2894 }
  0xf5   : > { %v2892_v62 = vunpack.i.h.bf16 %v2890_v18  ;;  %v2891_v1 = vunpack.i.l.bf16 %v2890_v18  ;;  %v2897_v32 = vunpack.i.h.bf16 %v2895_v28  ;;  %v2896_v2 = vunpack.i.l.bf16 %v2895_v28 }
  0xf6   : > { %3179 = vrot.lane.b32.xlu0 %v3719_v8, %s3268_s20  ;;  %3184 = vrot.lane.b32.xlu1 %v4226_v39, %s3268_s20 }
  0xf7   : > { %v1612_v20 = vsel %vm1509_vm7, %v1580_v14, %v2891_v1  ;;  %v1613_v58 = vsel %vm1509_vm7, %v1581_v50, %v2892_v62  ;;  %v1632_v21 = vsel %vm1509_vm7, %v1600_v15, %v2896_v2  ;;  %v1633_v53 = vsel %vm1509_vm7, %v1601_v22, %v2897_v32 }
  0xf8   : > { %v2900_v41 = vpop.permute.xlu0 %2899  ;;  %v2905_v44 = vpop.permute.xlu1 %2904  ;;  %v1648_v7 = vpack.c.bf16 %v1613_v58, %v1612_v20  ;;  %v1678_v8 = vpack.c.bf16 %v1633_v53, %v1632_v21  ;;  %v3238_v20 = vld [vmem:[#allocation2 + $0x68] sm:$0xff]  ;;  %v3239_v21 = vld [vmem:[#allocation2 + $0x60] sm:$0xff] }
  0xf9   : > { %v2902_v13 = vunpack.i.h.bf16 %v2900_v41  ;;  %v2901_v49 = vunpack.i.l.bf16 %v2900_v41  ;;  %v2907_v39 = vunpack.i.h.bf16 %v2905_v44  ;;  %v2906_v12 = vunpack.i.l.bf16 %v2905_v44 }
  0xfa   : > { %3189 = vrot.lane.b32.xlu0 %v3188_v17, %s3267_s19  ;;  %3194 = vrot.lane.b32.xlu1 %v4282_v35, %s3267_s19 }
  0xfb   : > { %1941 = vmatprep.mubr.bf16.mxu0 %v1648_v7  ;;  %2021 = vmatprep.mubr.bf16.mxu1 %v1678_v8  ;;  %v1516_v0 = vsel %vm1509_vm7, %v1483_v63, %v2901_v49  ;;  %v1517_v52 = vsel %vm1509_vm7, %v1484_v57, %v2902_v13  ;;  %v1536_v33 = vsel %vm1509_vm7, %v1503_v30, %v2906_v12 }
  0xfc   : > { %v2910_v4 = vpop.permute.xlu0 %2909  ;;  %v2915_v37 = vpop.permute.xlu1 %2914  ;;  %v1647_v10 = vpack.c.bf16 %v1517_v52, %v1516_v0  ;;  %v1537_v23 = vsel %vm1509_vm7, %v1504_v54, %v2907_v39 }
  0xfd   : > { %v1677_v35 = vpack.c.bf16 %v1537_v23, %v1536_v33  ;;  %v2912_v19 = vunpack.i.h.bf16 %v2910_v4  ;;  %v2911_v14 = vunpack.i.l.bf16 %v2910_v4  ;;  %v2917_v50 = vunpack.i.h.bf16 %v2915_v37 }
  0xfe   : > { %3199 = vrot.lane.b32.xlu0 %v3806_v48, %s3269_s13  ;;  %3204 = vrot.lane.b32.xlu1 %v4298_v51, %s3269_s13  ;;  %v2916_v15 = vunpack.i.l.bf16 %v2915_v37  ;;  %v3241_v37 = vld [vmem:[#allocation2 + $0x150] sm:$0xff] }
  0xff   : > { %1942 = vmatmul.mubr.bf16.gmra.mxu0 %v1647_v10  ;;  %2022 = vmatmul.mubr.bf16.gmra.mxu1 %v1677_v35  ;;  %v1551_v51 = vsel %vm481_vm5, %v3864_v27, %v2912_v19  ;;  %v1550_v22 = vsel %vm481_vm5, %v3861_v24, %v2911_v14  ;;  %v1571_v40 = vsel %vm481_vm5, %v3883_v45, %v2917_v50 }
 0x100   : > { %v2920_v3 = vpop.permute.xlu0 %2919  ;;  %v2925_v31 = vpop.permute.xlu1 %2924  ;;  %v1570_v25 = vsel %vm481_vm5, %v3867_v61, %v2916_v15 }
 0x101   : > { %v2922_v16 = vunpack.i.h.bf16 %v2920_v3  ;;  %v2921_v18 = vunpack.i.l.bf16 %v2920_v3  ;;  %v2927_v28 = vunpack.i.h.bf16 %v2925_v31  ;;  %v2926_v27 = vunpack.i.l.bf16 %v2925_v31 }
 0x103   : > { %v1453_v58 = vsel %vm481_vm5, %v3238_v20, %v2922_v16  ;;  %v1452_v53 = vsel %vm481_vm5, %v3239_v21, %v2921_v18  ;;  %v1473_v63 = vsel %vm481_vm5, %v3240_v5, %v2927_v28  ;;  %v1472_v10 = vsel %vm481_vm5, %v3241_v37, %v2926_v27 }
 0x104   : > { %v2930_v17 = vpop.permute.xlu0 %2929  ;;  %v2935_v9 = vpop.permute.xlu1 %2934 }
 0x105   : > { %v2932_v62 = vunpack.i.h.bf16 %v2930_v17  ;;  %v2931_v1 = vunpack.i.l.bf16 %v2930_v17  ;;  %v2936_v48 = vunpack.i.l.bf16 %v2935_v9  ;;  %v2937_v47 = vunpack.i.h.bf16 %v2935_v9 }
 0x107   : > { %v1582_v41 = vsel %vm1476_vm6, %v1550_v22, %v2931_v1  ;;  %v1583_v24 = vsel %vm1476_vm6, %v1551_v51, %v2932_v62  ;;  %v1602_v45 = vsel %vm1476_vm6, %v1570_v25, %v2936_v48  ;;  %v1603_v12 = vsel %vm1476_vm6, %v1571_v40, %v2937_v47 }
 0x108   : > { %v2940_v32 = vpop.permute.xlu0 %2939  ;;  %v2945_v2 = vpop.permute.xlu1 %2944 }
 0x109   : > { %v2941_v44 = vunpack.i.l.bf16 %v2940_v32  ;;  %v2942_v57 = vunpack.i.h.bf16 %v2940_v32  ;;  %v2947_v30 = vunpack.i.h.bf16 %v2945_v2  ;;  %v2946_v54 = vunpack.i.l.bf16 %v2945_v2 }
 0x10b   : > { %v1485_v23 = vsel %vm1476_vm6, %v1452_v53, %v2941_v44  ;;  %v1486_v15 = vsel %vm1476_vm6, %v1453_v58, %v2942_v57  ;;  %v1505_v16 = vsel %vm1476_vm6, %v1472_v10, %v2946_v54  ;;  %v1506_v18 = vsel %vm1476_vm6, %v1473_v63, %v2947_v30  ;;  %v3242_v30 = vld [vmem:[#allocation2 + $0x80] sm:$0xff] }
 0x10c   : > { %v2950_v7 = vpop.permute.xlu0 %2949  ;;  %v2955_v61 = vpop.permute.xlu1 %2954 }
 0x10d   : > { %v2952_v8 = vunpack.i.h.bf16 %v2950_v7  ;;  %v2951_v13 = vunpack.i.l.bf16 %v2950_v7  ;;  %v2957_v49 = vunpack.i.h.bf16 %v2955_v61  ;;  %v2956_v39 = vunpack.i.l.bf16 %v2955_v61 }
 0x10f   : > { %v1614_v0 = vsel %vm1509_vm7, %v1582_v41, %v2951_v13  ;;  %v1615_v52 = vsel %vm1509_vm7, %v1583_v24, %v2952_v8  ;;  %v1634_v33 = vsel %vm1509_vm7, %v1602_v45, %v2956_v39  ;;  %v1635_v4 = vsel %vm1509_vm7, %v1603_v12, %v2957_v49 }
 0x110   : > { %v2960_v35 = vpop.permute.xlu0 %2959  ;;  %v2965_v3 = vpop.permute.xlu1 %2964  ;;  %v1651_v31 = vpack.c.bf16 %v1615_v52, %v1614_v0  ;;  %v1681_v17 = vpack.c.bf16 %v1635_v4, %v1634_v33  ;;  %v1640_v13 = vpack.c.bf16 %v3533_v60, %v3530_v59  ;;  %v3243_v0 = vld [vmem:[#allocation2 + $0x78] sm:$0xff] }
 0x111   : > { %v2962_v9 = vunpack.i.h.bf16 %v2960_v35  ;;  %v2961_v19 = vunpack.i.l.bf16 %v2960_v35  ;;  %v2967_v14 = vunpack.i.h.bf16 %v2965_v3  ;;  %v2966_v50 = vunpack.i.l.bf16 %v2965_v3 }
 0x112   : > { %1949 = vmatprep.mubr.bf16.mxu0 %v1651_v31  ;;  %2029 = vmatprep.mubr.bf16.mxu1 %v1681_v17 }
 0x113   : > { %v1518_v28 = vsel %vm1509_vm7, %v1485_v23, %v2961_v19  ;;  %v1519_v62 = vsel %vm1509_vm7, %v1486_v15, %v2962_v9  ;;  %v1538_v1 = vsel %vm1509_vm7, %v1505_v16, %v2966_v50  ;;  %v1539_v48 = vsel %vm1509_vm7, %v1506_v18, %v2967_v14  ;;  %v3245_v18 = vld [vmem:[#allocation2 + $0x168] sm:$0xff] }
 0x114   : > { %v2970_v32 = vpop.permute.xlu0 %2969  ;;  %v2975_v2 = vpop.permute.xlu1 %2974  ;;  %v1650_v51 = vpack.c.bf16 %v1519_v62, %v1518_v28  ;;  %v1680_v22 = vpack.c.bf16 %v1539_v48, %v1538_v1 }
 0x115   : > { %v2972_v58 = vunpack.i.h.bf16 %v2970_v32  ;;  %v2971_v21 = vunpack.i.l.bf16 %v2970_v32  ;;  %v2977_v53 = vunpack.i.h.bf16 %v2975_v2  ;;  %v2976_v5 = vunpack.i.l.bf16 %v2975_v2 }
 0x116   : > { %1950 = vmatmul.mubr.bf16.gmra.mxu0 %v1650_v51  ;;  %2030 = vmatmul.mubr.bf16.gmra.mxu1 %v1680_v22 }
 0x117   : > { %v1553_v8 = vsel %vm481_vm5, %v3964_v29, %v2972_v58  ;;  %v1552_v49 = vsel %vm481_vm5, %v3961_v26, %v2971_v21  ;;  %v1573_v39 = vsel %vm481_vm5, %v3970_v38, %v2977_v53  ;;  %v1572_v12 = vsel %vm481_vm5, %v3967_v36, %v2976_v5  ;;  %v3244_v29 = vld [vmem:[#allocation2 + $0x170] sm:$0xff] }
 0x118   : > { %v2980_v40 = vpop.permute.xlu0 %2979  ;;  %v2985_v25 = vpop.permute.xlu1 %2984 }
 0x119   : > { %v2982_v63 = vunpack.i.h.bf16 %v2980_v40  ;;  %v2981_v27 = vunpack.i.l.bf16 %v2980_v40  ;;  %v2987_v41 = vunpack.i.h.bf16 %v2985_v25  ;;  %v2986_v59 = vunpack.i.l.bf16 %v2985_v25 }
 0x11b   : > { %v1455_v54 = vsel %vm481_vm5, %v3242_v30, %v2982_v63  ;;  %v1454_v52 = vsel %vm481_vm5, %v3243_v0, %v2981_v27  ;;  %v1475_v33 = vsel %vm481_vm5, %v3244_v29, %v2987_v41  ;;  %v1474_v28 = vsel %vm481_vm5, %v3245_v18, %v2986_v59  ;;  %v4967_v0 = vld [vmem:[#allocation11_spill] sm:$0xff] }
 0x11c   : > { %v2990_v47 = vpop.permute.xlu0 %2989  ;;  %v2995_v20 = vpop.permute.xlu1 %2994 }
 0x11d   : > { %v2992_v24 = vunpack.i.h.bf16 %v2990_v47  ;;  %v2991_v45 = vunpack.i.l.bf16 %v2990_v47  ;;  %v2996_v44 = vunpack.i.l.bf16 %v2995_v20  ;;  %v2997_v57 = vunpack.i.h.bf16 %v2995_v20 }
 0x11f   : > { %v1584_v60 = vsel %vm1476_vm6, %v1552_v49, %v2991_v45  ;;  %v1585_v26 = vsel %vm1476_vm6, %v1553_v8, %v2992_v24  ;;  %v1604_v38 = vsel %vm1476_vm6, %v1572_v12, %v2996_v44  ;;  %v1605_v31 = vsel %vm1476_vm6, %v1573_v39, %v2997_v57 }
 0x120   : > { %v3000_v7 = vpop.permute.xlu0 %2999  ;;  %v3005_v61 = vpop.permute.xlu1 %3004 }
 0x121   : > { %v3001_v4 = vunpack.i.l.bf16 %v3000_v7  ;;  %v3002_v17 = vunpack.i.h.bf16 %v3000_v7  ;;  %v3007_v9 = vunpack.i.h.bf16 %v3005_v61  ;;  %v3006_v19 = vunpack.i.l.bf16 %v3005_v61 }
 0x123   : > { %v1487_v62 = vsel %vm1476_vm6, %v1454_v52, %v3001_v4  ;;  %v1488_v47 = vsel %vm1476_vm6, %v1455_v54, %v3002_v17  ;;  %v1507_v20 = vsel %vm1476_vm6, %v1474_v28, %v3006_v19  ;;  %v1508_v58 = vsel %vm1476_vm6, %v1475_v33, %v3007_v9  ;;  %v4968_v52 = vld [vmem:[#allocation12_spill] sm:$0xff]  ;;  %v3247_v4 = vld [vmem:[#allocation2 + $0x90] sm:$0xff] }
 0x124   : > { %v3010_v37 = vpop.permute.xlu0 %3009  ;;  %v3015_v36 = vpop.permute.xlu1 %3014  ;;  %v1646_v29 = vpack.c.bf16 %v4968_v52, %v4967_v0  ;;  %v4969_v33 = vld [vmem:[#allocation24_spill] sm:$0xff]  ;;  %v3249_v52 = vld [vmem:[#allocation2 + $0xa8] sm:$0xff] }
 0x125   : > { %v3012_v10 = vunpack.i.h.bf16 %v3010_v37  ;;  %v3011_v23 = vunpack.i.l.bf16 %v3010_v37  ;;  %v3017_v35 = vunpack.i.h.bf16 %v3015_v36  ;;  %v3016_v3 = vunpack.i.l.bf16 %v3015_v36 }
 0x127   : > { %v1616_v14 = vsel %vm1509_vm7, %v1584_v60, %v3011_v23  ;;  %v1617_v50 = vsel %vm1509_vm7, %v1585_v26, %v3012_v10  ;;  %v1636_v15 = vsel %vm1509_vm7, %v1604_v38, %v3016_v3  ;;  %v1637_v16 = vsel %vm1509_vm7, %v1605_v31, %v3017_v35  ;;  %v4970_v60 = vld [vmem:[#allocation23_spill] sm:$0xff] }
 0x128   : > { %v3020_v1 = vpop.permute.xlu0 %3019  ;;  %v3025_v48 = vpop.permute.xlu1 %3024  ;;  %v1654_v32 = vpack.c.bf16 %v1617_v50, %v1616_v14  ;;  %v1684_v2 = vpack.c.bf16 %v1637_v16, %v1636_v15  ;;  %v4971_v50 = vld [vmem:[#allocation4_spill] sm:$0xff]  ;;  %v4972_v15 = vld [vmem:[#allocation3_spill] sm:$0xff] }
 0x129   : > { %v3022_v51 = vunpack.i.h.bf16 %v3020_v1  ;;  %v3021_v22 = vunpack.i.l.bf16 %v3020_v1  ;;  %v3027_v40 = vunpack.i.h.bf16 %v3025_v48  ;;  %v3026_v25 = vunpack.i.l.bf16 %v3025_v48 }
 0x12a   : > { %1957 = vmatprep.mubr.bf16.mxu0 %v1654_v32  ;;  %2037 = vmatprep.mubr.bf16.mxu1 %v1684_v2  ;;  %v4973_v16 = vpack.c.bf16 %v4971_v50, %v4972_v15  ;;  %v4982_v50 = vld [vmem:[#allocation29_spill] sm:$0xff]  ;;  %v4983_v15 = vld [vmem:[#allocation30_spill] sm:$0xff] }
 0x12b   : > { %v1520_v21 = vsel %vm1509_vm7, %v1487_v62, %v3021_v22  ;;  %v1521_v53 = vsel %vm1509_vm7, %v1488_v47, %v3022_v51  ;;  %v1540_v5 = vsel %vm1509_vm7, %v1507_v20, %v3026_v25  ;;  %v1541_v63 = vsel %vm1509_vm7, %v1508_v58, %v3027_v40  ;;  %v4974_v22 = vld [vmem:[#allocation17_spill] sm:$0xff]  ;;  %v4975_v40 = vld [vmem:[#allocation18_spill] sm:$0xff] }
 0x12c   : > { %v3030_v27 = vpop.permute.xlu0 %3029  ;;  %v3035_v41 = vpop.permute.xlu1 %3034  ;;  %v1653_v24 = vpack.c.bf16 %v1521_v53, %v1520_v21  ;;  %v1683_v45 = vpack.c.bf16 %v1541_v63, %v1540_v5  ;;  %v1649_v25 = vpack.c.bf16 %v4975_v40, %v4974_v22  ;;  %v4976_v47 = vld [vmem:[#allocation21_spill] sm:$0xff]  ;;  %v4977_v20 = vld [vmem:[#allocation22_spill] sm:$0xff] }
 0x12d   : > { %v3032_v44 = vunpack.i.h.bf16 %v3030_v27  ;;  %v3031_v7 = vunpack.i.l.bf16 %v3030_v27  ;;  %v3037_v61 = vunpack.i.h.bf16 %v3035_v41  ;;  %v3036_v8 = vunpack.i.l.bf16 %v3035_v41 }
 0x12e   : > { %1958 = vmatmul.mubr.bf16.gmra.mxu0 %v1653_v24  ;;  %2038 = vmatmul.mubr.bf16.gmra.mxu1 %v1683_v45  ;;  %v1652_v58 = vpack.c.bf16 %v4977_v20, %v4976_v47  ;;  %v4984_v47 = vld [vmem:[#allocation35_spill] sm:$0xff] }
 0x12f   : > { %2668 = vmatprep.mubr.msk.bf16.mxu1 %vm481_vm5, %v1640_v13  ;;  %v1555_v59 = vsel %vm481_vm5, %v4969_v33, %v3032_v44  ;;  %v1554_v26 = vsel %vm481_vm5, %v4970_v60, %v3031_v7  ;;  %v3246_v13 = vld [vmem:[#allocation2 + $0x98] sm:$0xff]  ;;  %v1456_v37 = vsel %vm481_vm5, %v3247_v4, %v3036_v8  ;;  %v4979_v8 = vld [vmem:[#allocation26_spill] sm:$0xff]  ;;  %v1664_v20 = vpack.c.bf16 %v4984_v47, %v4202_v42 }
 0x130   : > { %v3040_v49 = vpop.permute.xlu0 %3039  ;;  %v3045_v39 = vpop.permute.xlu1 %3044  ;;  %v1457_v38 = vsel %vm481_vm5, %v3246_v13, %v3037_v61  ;;  %v4978_v61 = vld [vmem:[#allocation25_spill] sm:$0xff] }
 0x131   : > { %v3042_v12 = vunpack.i.h.bf16 %v3040_v49  ;;  %v3041_v57 = vunpack.i.l.bf16 %v3040_v49  ;;  %v3047_v30 = vunpack.i.h.bf16 %v3045_v39  ;;  %v3046_v54 = vunpack.i.l.bf16 %v3045_v39  ;;  %v4980_v39 = vld [vmem:[#allocation28_spill] sm:$0xff] }
 0x132   : > { %v1655_v49 = vpack.c.bf16 %v4979_v8, %v4978_v61 }
 0x133   : > { %v1586_v17 = vsel %vm1476_vm6, %v1554_v26, %v3041_v57  ;;  %v1587_v9 = vsel %vm1476_vm6, %v1555_v59, %v3042_v12  ;;  %v1489_v19 = vsel %vm1476_vm6, %v1456_v37, %v3046_v54  ;;  %v1490_v14 = vsel %vm1476_vm6, %v1457_v38, %v3047_v30  ;;  %v4981_v57 = vld [vmem:[#allocation27_spill] sm:$0xff] }
 0x134   : > { %v3050_v36 = vpop.permute.xlu0 %3049  ;;  %v3055_v10 = vpop.permute.xlu1 %3054  ;;  %v3248_v54 = vld [vmem:[#allocation2 + $0xb0] sm:$0xff] }
 0x135   : > { %v3052_v23 = vunpack.i.h.bf16 %v3050_v36  ;;  %v3051_v35 = vunpack.i.l.bf16 %v3050_v36  ;;  %v3057_v3 = vunpack.i.h.bf16 %v3055_v10  ;;  %v3056_v31 = vunpack.i.l.bf16 %v3055_v10 }
 0x136   : > { %2669 = vmatmul.mubr.msk.bf16.vlgmr.msra.gmra.mxu1 %vm481_vm5, %v4973_v16  ;;  %v1658_v16 = vpack.c.bf16 %v4983_v15, %v4982_v50  ;;  %v4992_v50 = vld [vmem:[#allocation33_spill] sm:$0xff] }
 0x137   : > { %v1618_v18 = vsel %vm1509_vm7, %v1586_v17, %v3051_v35  ;;  %v1619_v28 = vsel %vm1509_vm7, %v1587_v9, %v3052_v23  ;;  %v1522_v62 = vsel %vm1509_vm7, %v1489_v19, %v3056_v31  ;;  %v1523_v1 = vsel %vm1509_vm7, %v1490_v14, %v3057_v3  ;;  %2672 = vmatprep.mubr.msk.bf16.mxu1 %vm481_vm5, %v1646_v29 }
 0x138   : > { %v3060_v48 = vpop.permute.xlu0 %3059  ;;  %v3065_v32 = vpop.permute.xlu1 %3064  ;;  %v1657_v2 = vpack.c.bf16 %v1619_v28, %v1618_v18  ;;  %v1656_v51 = vpack.c.bf16 %v1523_v1, %v1522_v62 }
 0x139   : > { %v3062_v21 = vunpack.i.h.bf16 %v3060_v48  ;;  %v3061_v53 = vunpack.i.l.bf16 %v3060_v48  ;;  %v3067_v5 = vunpack.i.h.bf16 %v3065_v32  ;;  %v3066_v63 = vunpack.i.l.bf16 %v3065_v32 }
 0x13a   : > { %1965 = vmatprep.mubr.bf16.mxu0 %v1657_v2  ;;  %v1661_v2 = vpack.c.bf16 %v4154_v55, %v4146_v6 }
 0x13b   : > { %1966 = vmatmul.mubr.bf16.gmra.mxu0 %v1656_v51  ;;  %v1557_v12 = vsel %vm481_vm5, %v4980_v39, %v3062_v21  ;;  %v1556_v30 = vsel %vm481_vm5, %v4981_v57, %v3061_v53  ;;  %v1459_v0 = vsel %vm481_vm5, %v3248_v54, %v3067_v5  ;;  %v1458_v29 = vsel %vm481_vm5, %v3249_v52, %v3066_v63  ;;  %v4986_v53 = vld [vmem:[#allocation31_spill] sm:$0xff]  ;;  %v3250_v63 = vld [vmem:[#allocation2 + $0xc8] sm:$0xff] }
 0x13c   : > { %v3070_v27 = vpop.permute.xlu0 %3069  ;;  %v3075_v41 = vpop.permute.xlu1 %3074 }
 0x13d   : > { %v3072_v24 = vunpack.i.h.bf16 %v3070_v27  ;;  %v3071_v45 = vunpack.i.l.bf16 %v3070_v27  ;;  %v3077_v44 = vunpack.i.h.bf16 %v3075_v41  ;;  %v3076_v7 = vunpack.i.l.bf16 %v3075_v41  ;;  %v3251_v41 = vld [vmem:[#allocation2 + $0xc0] sm:$0xff] }
 0x13e   : > { %2673 = vmatmul.mubr.msk.bf16.gmra.mxu1 %vm481_vm5, %v1649_v25 }
 0x13f   : > { %2676 = vmatprep.mubr.msk.bf16.mxu1 %vm481_vm5, %v1652_v58  ;;  %v1588_v4 = vsel %vm1476_vm6, %v1556_v30, %v3071_v45  ;;  %v1589_v37 = vsel %vm1476_vm6, %v1557_v12, %v3072_v24  ;;  %v1491_v36 = vsel %vm1476_vm6, %v1458_v29, %v3076_v7  ;;  %v1492_v10 = vsel %vm1476_vm6, %v1459_v0, %v3077_v44  ;;  %v4985_v58 = vld [vmem:[#allocation32_spill] sm:$0xff] }
 0x140   : > { %v3080_v33 = vpop.permute.xlu0 %3079  ;;  %v3085_v59 = vpop.permute.xlu1 %3084 }
 0x141   : > { %v3082_v60 = vunpack.i.h.bf16 %v3080_v33  ;;  %v3081_v26 = vunpack.i.l.bf16 %v3080_v33  ;;  %v3087_v13 = vunpack.i.h.bf16 %v3085_v59  ;;  %v3086_v38 = vunpack.i.l.bf16 %v3085_v59 }
 0x142   : > { %v1667_v59 = vpack.c.bf16 %v4232_v46, %v4229_v56  ;;  %v4990_v56 = vld [vmem:[#allocation6_spill] sm:$0xff] }
 0x143   : > { %v1620_v23 = vsel %vm1509_vm7, %v1588_v4, %v3081_v26  ;;  %v1621_v35 = vsel %vm1509_vm7, %v1589_v37, %v3082_v60  ;;  %v1524_v3 = vsel %vm1509_vm7, %v1491_v36, %v3086_v38  ;;  %v1525_v31 = vsel %vm1509_vm7, %v1492_v10, %v3087_v13  ;;  %v4987_v60 = vld [vmem:[#allocation9_spill] sm:$0xff]  ;;  %v4988_v26 = vld [vmem:[#allocation10_spill] sm:$0xff] }
 0x144   : > { %v3090_v17 = vpop.permute.xlu0 %3089  ;;  %v3095_v9 = vpop.permute.xlu1 %3094  ;;  %v1660_v19 = vpack.c.bf16 %v1621_v35, %v1620_v23  ;;  %v1659_v14 = vpack.c.bf16 %v1525_v31, %v1524_v3  ;;  %v1670_v13 = vpack.c.bf16 %v4988_v26, %v4987_v60  ;;  %v3254_v26 = vld [vmem:[#allocation2 + $0xf8] sm:$0xff] }
 0x145   : > { %v3092_v18 = vunpack.i.h.bf16 %v3090_v17  ;;  %v3091_v28 = vunpack.i.l.bf16 %v3090_v17  ;;  %v3097_v62 = vunpack.i.h.bf16 %v3095_v9  ;;  %v3096_v1 = vunpack.i.l.bf16 %v3095_v9  ;;  %v4989_v9 = vld [vmem:[#allocation5_spill] sm:$0xff] }
 0x146   : > { %1973 = vmatprep.mubr.bf16.mxu0 %v1660_v19  ;;  %2677 = vmatmul.mubr.msk.bf16.gmra.mxu1 %vm481_vm5, %v1655_v49  ;;  %v1673_v46 = vpack.c.bf16 %v4990_v56, %v4989_v9  ;;  %v4991_v19 = vld [vmem:[#allocation34_spill] sm:$0xff] }
 0x147   : > { %1974 = vmatmul.mubr.bf16.gmra.mxu0 %v1659_v14  ;;  %2680 = vmatprep.mubr.msk.bf16.mxu1 %vm481_vm5, %v1658_v16  ;;  %v1559_v21 = vsel %vm481_vm5, %v4985_v58, %v3092_v18  ;;  %v1558_v5 = vsel %vm481_vm5, %v4986_v53, %v3091_v28  ;;  %v1461_v27 = vsel %vm481_vm5, %v3250_v63, %v3097_v62  ;;  %v3252_v16 = vld [vmem:[#allocation2 + $0xe0] sm:$0xff]  ;;  %v3253_v28 = vld [vmem:[#allocation2 + $0xd8] sm:$0xff] }
 0x148   : > { %v3100_v48 = vpop.permute.xlu0 %3099  ;;  %v3105_v32 = vpop.permute.xlu1 %3104  ;;  %v1460_v24 = vsel %vm481_vm5, %v3251_v41, %v3096_v1 }
 0x149   : > { %v3102_v51 = vunpack.i.h.bf16 %v3100_v48  ;;  %v3101_v22 = vunpack.i.l.bf16 %v3100_v48  ;;  %v3107_v40 = vunpack.i.h.bf16 %v3105_v32  ;;  %v3106_v25 = vunpack.i.l.bf16 %v3105_v32 }
 0x14b   : > { %v1590_v42 = vsel %vm1476_vm6, %v1558_v5, %v3101_v22  ;;  %v1591_v8 = vsel %vm1476_vm6, %v1559_v21, %v3102_v51  ;;  %v1493_v49 = vsel %vm1476_vm6, %v1460_v24, %v3106_v25  ;;  %v1494_v39 = vsel %vm1476_vm6, %v1461_v27, %v3107_v40 }
 0x14c   : > { %v3110_v6 = vpop.permute.xlu0 %3109  ;;  %v3115_v55 = vpop.permute.xlu1 %3114 }
 0x14d   : > { %v3112_v45 = vunpack.i.h.bf16 %v3110_v6  ;;  %v3111_v44 = vunpack.i.l.bf16 %v3110_v6  ;;  %v3117_v7 = vunpack.i.h.bf16 %v3115_v55  ;;  %v3116_v61 = vunpack.i.l.bf16 %v3115_v55  ;;  %v4993_v6 = vld [vmem:[#allocation13_spill] sm:$0xff]  ;;  %v4994_v55 = vld [vmem:[#allocation14_spill] sm:$0xff] }
 0x14e   : > { %2681 = vmatmul.mubr.msk.bf16.gmra.mxu1 %vm481_vm5, %v1661_v2 }
 0x14f   : > { %v1622_v12 = vsel %vm1509_vm7, %v1590_v42, %v3111_v44  ;;  %v1623_v57 = vsel %vm1509_vm7, %v1591_v8, %v3112_v45  ;;  %v1526_v30 = vsel %vm1509_vm7, %v1493_v49, %v3116_v61  ;;  %v1527_v54 = vsel %vm1509_vm7, %v1494_v39, %v3117_v7  ;;  %2684 = vmatprep.mubr.msk.bf16.mxu1 %vm481_vm5, %v1664_v20  ;;  %v4995_v39 = vld [vmem:[#allocation19_spill] sm:$0xff] }
 0x150   : > { %v3120_v0 = vpop.permute.xlu0 %3119  ;;  %v3125_v52 = vpop.permute.xlu1 %3124  ;;  %v1663_v29 = vpack.c.bf16 %v1623_v57, %v1622_v12  ;;  %v1662_v33 = vpack.c.bf16 %v1527_v54, %v1526_v30  ;;  %v1676_v45 = vpack.c.bf16 %v4994_v55, %v4993_v6  ;;  %v4996_v12 = vld [vmem:[#allocation20_spill] sm:$0xff]  ;;  %v3257_v6 = vld [vmem:[#allocation2 + $0x108] sm:$0xff] }
 0x151   : > { %v3122_v38 = vunpack.i.h.bf16 %v3120_v0  ;;  %v3121_v4 = vunpack.i.l.bf16 %v3120_v0  ;;  %v3127_v37 = vunpack.i.h.bf16 %v3125_v52  ;;  %v3126_v36 = vunpack.i.l.bf16 %v3125_v52 }
 0x152   : > { %1981 = vmatprep.mubr.bf16.mxu0 %v1663_v29  ;;  %v1679_v57 = vpack.c.bf16 %v4996_v12, %v4995_v39  ;;  %v4997_v29 = vld [vmem:[#allocation37_spill] sm:$0xff] }
 0x153   : > { %1982 = vmatmul.mubr.bf16.gmra.mxu0 %v1662_v33  ;;  %v1561_v14 = vsel %vm481_vm5, %v4991_v19, %v3122_v38  ;;  %v1560_v15 = vsel %vm481_vm5, %v4992_v50, %v3121_v4  ;;  %v1463_v18 = vsel %vm481_vm5, %v3252_v16, %v3127_v37  ;;  %v1462_v62 = vsel %vm481_vm5, %v3253_v28, %v3126_v36  ;;  %v3255_v38 = vld [vmem:[#allocation2 + $0xf0] sm:$0xff] }
 0x154   : > { %v3130_v10 = vpop.permute.xlu0 %3129  ;;  %v3135_v23 = vpop.permute.xlu1 %3134  ;;  %v5000_v16 = vld [vmem:[#allocation15_spill] sm:$0xff] }
 0x155   : > { %v3132_v35 = vunpack.i.h.bf16 %v3130_v10  ;;  %v3131_v3 = vunpack.i.l.bf16 %v3130_v10  ;;  %v3137_v31 = vunpack.i.h.bf16 %v3135_v23  ;;  %v3136_v17 = vunpack.i.l.bf16 %v3135_v23 }
 0x156   : > { %2685 = vmatmul.mubr.msk.bf16.gmra.mxu1 %vm481_vm5, %v1667_v59  ;;  %v4998_v59 = vld [vmem:[#allocation36_spill] sm:$0xff] }
 0x157   : > { %2688 = vmatprep.mubr.msk.bf16.mxu1 %vm481_vm5, %v1670_v13  ;;  %v1592_v40 = vsel %vm1476_vm6, %v1560_v15, %v3131_v3  ;;  %v1593_v25 = vsel %vm1476_vm6, %v1561_v14, %v3132_v35  ;;  %v1495_v47 = vsel %vm1476_vm6, %v1462_v62, %v3136_v17  ;;  %v1496_v20 = vsel %vm1476_vm6, %v1463_v18, %v3137_v31  ;;  %v4999_v15 = vld [vmem:[#allocation16_spill] sm:$0xff] }
 0x158   : > { %v3140_v1 = vpop.permute.xlu0 %3139  ;;  %v3145_v48 = vpop.permute.xlu1 %3144  ;;  %v5001_v18 = vpack.c.bf16 %v4999_v15, %v5000_v16 }
 0x159   : > { %v3142_v32 = vunpack.i.h.bf16 %v3140_v1  ;;  %v3141_v2 = vunpack.i.l.bf16 %v3140_v1  ;;  %v3147_v51 = vunpack.i.h.bf16 %v3145_v48  ;;  %v3146_v22 = vunpack.i.l.bf16 %v3145_v48 }
 0x15b   : > { %v1624_v58 = vsel %vm1509_vm7, %v1592_v40, %v3141_v2  ;;  %v1625_v21 = vsel %vm1509_vm7, %v1593_v25, %v3142_v32  ;;  %v1528_v53 = vsel %vm1509_vm7, %v1495_v47, %v3146_v22  ;;  %v1529_v5 = vsel %vm1509_vm7, %v1496_v20, %v3147_v51 }
 0x15c   : > { %v3150_v63 = vpop.permute.xlu0 %3149  ;;  %v3155_v27 = vpop.permute.xlu1 %3154  ;;  %v1666_v41 = vpack.c.bf16 %v1625_v21, %v1624_v58  ;;  %v1665_v24 = vpack.c.bf16 %v1529_v5, %v1528_v53  ;;  %v5002_v53 = vld [vmem:[#allocation8_spill] sm:$0xff] }
 0x15d   : > { %v3152_v44 = vunpack.i.h.bf16 %v3150_v63  ;;  %v3151_v7 = vunpack.i.l.bf16 %v3150_v63  ;;  %v3157_v61 = vunpack.i.h.bf16 %v3155_v27  ;;  %v3156_v42 = vunpack.i.l.bf16 %v3155_v27  ;;  %v5003_v63 = vld [vmem:[#allocation7_spill] sm:$0xff] }
 0x15e   : > { %1989 = vmatprep.mubr.bf16.mxu0 %v1666_v41  ;;  %2689 = vmatmul.mubr.msk.bf16.gmra.mxu1 %vm481_vm5, %v1673_v46  ;;  %v3256_v41 = vld [vmem:[#allocation2 + $0x110] sm:$0xff] }
 0x15f   : > { %1990 = vmatmul.mubr.bf16.gmra.mxu0 %v1665_v24  ;;  %2692 = vmatprep.mubr.msk.bf16.mxu1 %vm481_vm5, %v1676_v45  ;;  %v1563_v33 = vsel %vm481_vm5, %v4997_v29, %v3152_v44  ;;  %v1562_v60 = vsel %vm481_vm5, %v4998_v59, %v3151_v7  ;;  %v1465_v13 = vsel %vm481_vm5, %v3254_v26, %v3157_v61 }
 0x160   : > { %v3160_v8 = vpop.permute.xlu0 %3159  ;;  %v3165_v49 = vpop.permute.xlu1 %3164  ;;  %v1464_v4 = vsel %vm481_vm5, %v3255_v38, %v3156_v42 }
 0x161   : > { %v3162_v30 = vunpack.i.h.bf16 %v3160_v8  ;;  %v3161_v54 = vunpack.i.l.bf16 %v3160_v8  ;;  %v3167_v0 = vunpack.i.h.bf16 %v3165_v49  ;;  %v3166_v52 = vunpack.i.l.bf16 %v3165_v49 }
 0x163   : > { %v1594_v31 = vsel %vm1476_vm6, %v1562_v60, %v3161_v54  ;;  %v1595_v17 = vsel %vm1476_vm6, %v1563_v33, %v3162_v30  ;;  %v1497_v9 = vsel %vm1476_vm6, %v1464_v4, %v3166_v52  ;;  %v1498_v56 = vsel %vm1476_vm6, %v1465_v13, %v3167_v0 }
 0x164   : > { %v3170_v37 = vpop.permute.xlu0 %3169  ;;  %v3175_v36 = vpop.permute.xlu1 %3174 }
 0x165   : > { %v3172_v10 = vunpack.i.h.bf16 %v3170_v37  ;;  %v3171_v23 = vunpack.i.l.bf16 %v3170_v37  ;;  %v3177_v35 = vunpack.i.h.bf16 %v3175_v36  ;;  %v3176_v3 = vunpack.i.l.bf16 %v3175_v36 }
 0x166   : > { %2693 = vmatmul.mubr.msk.bf16.gmra.mxu1 %vm481_vm5, %v1679_v57 }
 0x167   : > { %v1626_v46 = vsel %vm1509_vm7, %v1594_v31, %v3171_v23  ;;  %v1627_v19 = vsel %vm1509_vm7, %v1595_v17, %v3172_v10  ;;  %v1530_v14 = vsel %vm1509_vm7, %v1497_v9, %v3176_v3  ;;  %v1531_v50 = vsel %vm1509_vm7, %v1498_v56, %v3177_v35  ;;  %2696 = vmatprep.mubr.msk.bf16.mxu1 %vm481_vm5, %v5001_v18 }
 0x168   : > { %v3180_v28 = vpop.permute.xlu0 %3179  ;;  %v3185_v62 = vpop.permute.xlu1 %3184  ;;  %v1669_v1 = vpack.c.bf16 %v1627_v19, %v1626_v46  ;;  %v1668_v48 = vpack.c.bf16 %v1531_v50, %v1530_v14 }
 0x169   : > { %v3182_v32 = vunpack.i.h.bf16 %v3180_v28  ;;  %v3181_v2 = vunpack.i.l.bf16 %v3180_v28  ;;  %v3187_v51 = vunpack.i.h.bf16 %v3185_v62  ;;  %v3186_v22 = vunpack.i.l.bf16 %v3185_v62 }
 0x16a   : > { %1997 = vmatprep.mubr.bf16.mxu0 %v1669_v1 }
 0x16b   : > { %1998 = vmatmul.mubr.bf16.gmra.mxu0 %v1668_v48  ;;  %v1565_v5 = vsel %vm481_vm5, %v5002_v53, %v3182_v32  ;;  %v1564_v27 = vsel %vm481_vm5, %v5003_v63, %v3181_v2  ;;  %v1467_v24 = vsel %vm481_vm5, %v3256_v41, %v3187_v51  ;;  %v1466_v55 = vsel %vm481_vm5, %v3257_v6, %v3186_v22  ;;  %v4586_v6 = vld [vmem:[%s4893_s4] ss:$0 sm:$0xff] }
 0x16c   : > { %v3190_v40 = vpop.permute.xlu0 %3189  ;;  %v3195_v25 = vpop.permute.xlu1 %3194 }
 0x16d   : > { %v3192_v47 = vunpack.i.h.bf16 %v3190_v40  ;;  %v3191_v20 = vunpack.i.l.bf16 %v3190_v40  ;;  %v3197_v58 = vunpack.i.h.bf16 %v3195_v25  ;;  %v3196_v21 = vunpack.i.l.bf16 %v3195_v25 }
 0x16e   : > { %2697 = vmatmul.mubr.msk.bf16.gmra.mxu1 %vm481_vm5, %v1685_v34 }
 0x16f   : > { %v1596_v11 = vsel %vm1476_vm6, %v1564_v27, %v3191_v20  ;;  %v1597_v34 = vsel %vm1476_vm6, %v1565_v5, %v3192_v47  ;;  %v1499_v8 = vsel %vm1476_vm6, %v1466_v55, %v3196_v21  ;;  %v1500_v49 = vsel %vm1476_vm6, %v1467_v24, %v3197_v58 }
 0x170   : > { %v3200_v45 = vpop.permute.xlu0 %3199  ;;  %v3205_v44 = vpop.permute.xlu1 %3204 }
 0x171   : > { %v3202_v7 = vunpack.i.h.bf16 %v3200_v45  ;;  %v3201_v61 = vunpack.i.l.bf16 %v3200_v45  ;;  %v3207_v42 = vunpack.i.h.bf16 %v3205_v44  ;;  %v3206_v43 = vunpack.i.l.bf16 %v3205_v44 }
 0x173   : > { %v1628_v39 = vsel %vm1509_vm7, %v1596_v11, %v3201_v61  ;;  %v1629_v12 = vsel %vm1509_vm7, %v1597_v34, %v3202_v7  ;;  %v1532_v57 = vsel %vm1509_vm7, %v1499_v8, %v3206_v43  ;;  %v1533_v30 = vsel %vm1509_vm7, %v1500_v49, %v3207_v42 }
 0x174   : > { %v1672_v54 = vpack.c.bf16 %v1629_v12, %v1628_v39  ;;  %v1671_v0 = vpack.c.bf16 %v1533_v30, %v1532_v57 }
 0x176   : > { %2005 = vmatprep.mubr.bf16.mxu0 %v1672_v54 }
 0x177   : > { %2006 = vmatmul.mubr.bf16.gmra.mxu0 %v1671_v0 }
 0x188   : > { %v2550_v52 = vpop.f32.mrf.mxu0 }
 0x18a   : > { %v2551_v33 = vpop.f32.mrf.mxu0 }
 0x18b   : > { %v2552_v41 = vadd.f32 %v2551_v33, %v2550_v52 }
 0x18c   : > { %v2553_v13 = vpop.f32.mrf.mxu0 }
 0x18d   : > { %v1920_v43 = vadd.f32 %v2552_v41, %v4586_v6 }
 0x18e   : > { %v2554_v37 = vpop.f32.mrf.mxu0 }
 0x18f   : > { %v2555_v61 = vadd.f32 %v2554_v37, %v2553_v13 }
 0x190   : > { %v2556_v36 = vpop.f32.mrf.mxu0 }
 0x191   : > { %v1923_v0 = vadd.f32 %v2555_v61, %v4586_v6 }
 0x192   : > { %v2557_v10 = vpop.f32.mrf.mxu0 }
 0x193   : > { %v2558_v5 = vadd.f32 %v2557_v10, %v2556_v36 }
 0x194   : > { %v2559_v23 = vpop.f32.mrf.mxu0 }
 0x195   : > { %v1928_v44 = vadd.f32 %v2558_v5, %v4586_v6 }
 0x196   : > { %v2560_v3 = vpop.f32.mrf.mxu0 }
 0x197   : > { %v2561_v55 = vadd.f32 %v2560_v3, %v2559_v23 }
 0x199   : > { %v1931_v39 = vadd.f32 %v2561_v55, %v4586_v6 }
 0x1a7   : > { %v2622_v29 = vpop.f32.mrf.mxu1  ;;  %v2562_v9 = vpop.f32.mrf.mxu0 }
 0x1a9   : > { %v2623_v59 = vpop.f32.mrf.mxu1  ;;  %v2563_v14 = vpop.f32.mrf.mxu0 }
 0x1aa   : > { %v4559_v60 = vadd.f32 %v2623_v59, %v2622_v29  ;;  %v2564_v12 = vadd.f32 %v2563_v14, %v2562_v9 }
 0x1ab   : > { %v2625_v26 = vpop.f32.mrf.mxu1  ;;  %v2565_v50 = vpop.f32.mrf.mxu0 }
 0x1ac   : > { %v1936_v10 = vadd.f32 %v2564_v12, %v4586_v6 }
 0x1ad   : > { %v2626_v38 = vpop.f32.mrf.mxu1  ;;  %v2566_v15 = vpop.f32.mrf.mxu0 }
 0x1ae   : > { %v4561_v4 = vadd.f32 %v2626_v38, %v2625_v26  ;;  %v2567_v38 = vadd.f32 %v2566_v15, %v2565_v50 }
 0x1bf   : > { %v2628_v35 = vpop.f32.mrf.mxu1  ;;  %v2568_v16 = vpop.f32.mrf.mxu0 }
 0x1c1   : > { %v2629_v31 = vpop.f32.mrf.mxu1  ;;  %v2569_v18 = vpop.f32.mrf.mxu0 }
 0x1c2   : > { %v4563_v17 = vadd.f32 %v2629_v31, %v2628_v35  ;;  %v2570_v34 = vadd.f32 %v2569_v18, %v2568_v16 }
 0x1c3   : > { %v2631_v56 = vpop.f32.mrf.mxu1  ;;  %v2571_v48 = vpop.f32.mrf.mxu0 }
 0x1c4   : > { %v1944_v13 = vadd.f32 %v2570_v34, %v4586_v6 }
 0x1c5   : > { %v2632_v46 = vpop.f32.mrf.mxu1  ;;  %v2572_v22 = vpop.f32.mrf.mxu0 }
 0x1c6   : > { %v4565_v19 = vadd.f32 %v2632_v46, %v2631_v56  ;;  %v2573_v52 = vadd.f32 %v2572_v22, %v2571_v48 }
 0x1c8   : > { %v1947_v50 = vadd.f32 %v2573_v52, %v4586_v6 }
 0x1d6   : > { %v2634_v28 = vpop.f32.mrf.mxu1  ;;  %v2574_v40 = vpop.f32.mrf.mxu0 }
 0x1d8   : > { %v2635_v62 = vpop.f32.mrf.mxu1  ;;  %v2575_v25 = vpop.f32.mrf.mxu0 }
 0x1d9   : > { %v4567_v1 = vadd.f32 %v2635_v62, %v2634_v28  ;;  %v2576_v48 = vadd.f32 %v2575_v25, %v2574_v40 }
 0x1da   : > { %v2637_v32 = vpop.f32.mrf.mxu1  ;;  %v4571_v47 = vpop.f32.mrf.mxu0 }
 0x1dc   : > { %v2638_v2 = vpop.f32.mrf.mxu1  ;;  %v4573_v20 = vpop.f32.mrf.mxu0 }
 0x1dd   : > { %v4569_v51 = vadd.f32 %v2638_v2, %v2637_v32 }
 0x1ee   : > { %v2580_v58 = vpop.f32.mrf.mxu0  ;;  %v4575_v21 = vpop.f32.mrf.mxu1 }
 0x1f0   : > { %v4577_v53 = vpop.f32.mrf.mxu1  ;;  %v2581_v63 = vpop.f32.mrf.mxu0 }
 0x1f1   : > { %v2582_v9 = vadd.f32 %v2581_v63, %v2580_v58  ;;  %v1939_v58 = vadd.f32 %v2567_v38, %v4586_v6 }
 0x1f2   : > { %v4579_v27 = vpop.f32.mrf.mxu1  ;;  %v2583_v45 = vpop.f32.mrf.mxu0 }
 0x1f3   : > { %v1960_v40 = vadd.f32 %v2582_v9, %v4586_v6 }
 0x1f4   : > { %v4581_v24 = vpop.f32.mrf.mxu1  ;;  %v2584_v8 = vpop.f32.mrf.mxu0 }
 0x1f5   : > { %v2585_v25 = vadd.f32 %v2584_v8, %v2583_v45 }
 0x1f6   : > { %v2670_v7 = vpop.f32.mrf.mxu1 }
 0x1f7   : > { %v2089_v42 = vadd.f32 %v2670_v7, %v1928_v44 }
 0x1f8   : > { %v2080_v11 = vpop.f32.mrf.mxu1 }
 0x1f9   : > { %2209 = vst.msk [vmem:[%s3326_s10 + $0x10] sm:$0xff] %vm481_vm5, %v2089_v42  ;;  %v2081_v49 = vadd.f32 %v2080_v11, %v1920_v43  ;;  %v2315_v37 = vmul.f32 %v2089_v42, %v2089_v42  ;;  %v2243_v56 = vsel %vm481_vm5, %v2089_v42, 0.0 }
 0x1fa   : > { %v2671_v57 = vpop.f32.mrf.mxu1 }
 0x1fb   : > { %2207 = vst.msk [vmem:[%s3326_s10] sm:$0xff] %vm481_vm5, %v2081_v49  ;;  %v2092_v30 = vadd.f32 %v2671_v57, %v1931_v39  ;;  %v4595_v54 = vpop.f32.mrf.mxu0  ;;  %v2313_v33 = vmul.f32 %v2081_v49, %v2081_v49  ;;  %v2240_v23 = vsel %vm481_vm5, %v2081_v49, 0.0  ;;  %v2348_v5 = vsel %vm481_vm5, %v2315_v37, 0.0 }
 0x1fc   : > { %v2083_v29 = vpop.f32.mrf.mxu1  ;;  %v2579_v49 = vadd.f32 %v4573_v20, %v4571_v47  ;;  %v1963_v37 = vadd.f32 %v2585_v25, %v4586_v6 }
 0x1fd   : > { %2210 = vst.msk [vmem:[%s3326_s10 + $0x18] sm:$0xff] %vm481_vm5, %v2092_v30  ;;  %v2084_v59 = vadd.f32 %v2083_v29, %v1923_v0  ;;  %v4600_v26 = vpop.f32.mrf.mxu0  ;;  %v2345_v15 = vsel %vm481_vm5, %v2313_v33, 0.0  ;;  %v2316_v16 = vmul.f32 %v2092_v30, %v2092_v30  ;;  %v2245_v63 = vsel %vm481_vm5, %v2092_v30, 0.0 }
 0x1fe   : > { %v2674_v36 = vpop.f32.mrf.mxu1  ;;  %v1952_v30 = vadd.f32 %v2576_v48, %v4586_v6 }
 0x1ff   : > { %2208 = vst.msk [vmem:[%s3326_s10 + $0x8] sm:$0xff] %vm481_vm5, %v2084_v59  ;;  %v2241_v35 = vsel %vm481_vm5, %v2084_v59, 0.0  ;;  %v2314_v3 = vmul.f32 %v2084_v59, %v2084_v59  ;;  %v2105_v31 = vadd.f32 %v2674_v36, %v1944_v13  ;;  %v2589_v28 = vpop.f32.mrf.mxu0  ;;  %v2350_v42 = vsel %vm481_vm5, %v2316_v16, 0.0 }
 0x200   : > { %v2242_v46 = vadd.f32 %v2241_v35, %v2240_v23  ;;  %v2096_v14 = vpop.f32.mrf.mxu1  ;;  %v2588_v35 = vadd.f32 %v4600_v26, %v4595_v54 }
 0x201   : > { %v2346_v18 = vsel %vm481_vm5, %v2314_v3, 0.0  ;;  %2213 = vst.msk [vmem:[%s3326_s10 + $0x30] sm:$0xff] %vm481_vm5, %v2105_v31  ;;  %v2097_v62 = vadd.f32 %v2096_v14, %v1936_v10  ;;  %v2590_v11 = vpop.f32.mrf.mxu0  ;;  %v2319_v36 = vmul.f32 %v2105_v31, %v2105_v31  ;;  %v2251_v14 = vsel %vm481_vm5, %v2105_v31, 0.0 }
 0x202   : > { %v2244_v32 = vadd.f32 %v2243_v56, %v2242_v46  ;;  %v2347_v2 = vadd.f32 %v2346_v18, %v2345_v15  ;;  %v2675_v22 = vpop.f32.mrf.mxu1  ;;  %v1955_v46 = vadd.f32 %v2579_v49, %v4586_v6 }
 0x203   : > { %2211 = vst.msk [vmem:[%s3326_s10 + $0x20] sm:$0xff] %vm481_vm5, %v2097_v62  ;;  %v2317_v41 = vmul.f32 %v2097_v62, %v2097_v62  ;;  %v2108_v55 = vadd.f32 %v2675_v22, %v1947_v50  ;;  %v2247_v43 = vsel %vm481_vm5, %v2097_v62, 0.0  ;;  %v2356_v18 = vsel %vm481_vm5, %v2319_v36, 0.0 }
 0x204   : > { %v2349_v44 = vadd.f32 %v2348_v5, %v2347_v2  ;;  %v2246_v7 = vadd.f32 %v2245_v63, %v2244_v32  ;;  %v2099_v61 = vpop.f32.mrf.mxu1  ;;  %v2591_v2 = vadd.f32 %v2590_v11, %v2589_v28 }
 0x205   : > { %2214 = vst.msk [vmem:[%s3326_s10 + $0x38] sm:$0xff] %vm481_vm5, %v2108_v55  ;;  %v2100_v34 = vadd.f32 %v2099_v61, %v1939_v58  ;;  %v2352_v0 = vsel %vm481_vm5, %v2317_v41, 0.0  ;;  %v2320_v62 = vmul.f32 %v2108_v55, %v2108_v55  ;;  %v1968_v58 = vadd.f32 %v2588_v35, %v4586_v6 }
 0x206   : > { %v2248_v39 = vadd.f32 %v2247_v43, %v2246_v7  ;;  %v2351_v12 = vadd.f32 %v2350_v42, %v2349_v44  ;;  %v2678_v57 = vpop.f32.mrf.mxu1  ;;  %v2253_v5 = vsel %vm481_vm5, %v2108_v55, 0.0  ;;  %v1971_v43 = vadd.f32 %v2591_v2, %v4586_v6 }
 0x207   : > { %2212 = vst.msk [vmem:[%s3326_s10 + $0x28] sm:$0xff] %vm481_vm5, %v2100_v34  ;;  %v2249_v45 = vsel %vm481_vm5, %v2100_v34, 0.0  ;;  %v2318_v8 = vmul.f32 %v2100_v34, %v2100_v34  ;;  %v4631_v52 = vadd.f32 %v2678_v57, %v1960_v40  ;;  %v2592_v29 = vpop.f32.mrf.mxu0  ;;  %v2358_v28 = vsel %vm481_vm5, %v2320_v62, 0.0 }
 0x208   : > { %v2353_v33 = vadd.f32 %v2352_v0, %v2351_v12  ;;  %v2112_v59 = vpop.f32.mrf.mxu1  ;;  %v2250_v13 = vadd.f32 %v2249_v45, %v2248_v39 }
 0x209   : > { %v2354_v47 = vsel %vm481_vm5, %v2318_v8, 0.0  ;;  %2217 = vst.msk [vmem:[%s3326_s10 + $0x50] sm:$0xff] %vm481_vm5, %v4631_v52  ;;  %v2113_v20 = vadd.f32 %v2112_v59, %v1952_v30  ;;  %v2593_v38 = vpop.f32.mrf.mxu0 }
 0x20a   : > { %v2594_v10 = vadd.f32 %v2593_v38, %v2592_v29  ;;  %v2679_v23 = vpop.f32.mrf.mxu1  ;;  %v2355_v3 = vadd.f32 %v2354_v47, %v2353_v33  ;;  %v2252_v16 = vadd.f32 %v2251_v14, %v2250_v13 }
 0x20b   : > { %2215 = vst.msk [vmem:[%s3326_s10 + $0x40] sm:$0xff] %vm481_vm5, %v2113_v20  ;;  %v4642_v9 = vadd.f32 %v2679_v23, %v1963_v37  ;;  %v2595_v56 = vpop.f32.mrf.mxu0  ;;  %v2321_v61 = vmul.f32 %v2113_v20, %v2113_v20  ;;  %v2255_v11 = vsel %vm481_vm5, %v2113_v20, 0.0  ;;  %v2323_v37 = vmul.f32 %v4631_v52, %v4631_v52 }
 0x20c   : > { %v2115_v50 = vpop.f32.mrf.mxu1  ;;  %v1976_v15 = vadd.f32 %v2594_v10, %v4586_v6  ;;  %v2357_v22 = vadd.f32 %v2356_v18, %v2355_v3  ;;  %v2254_v44 = vadd.f32 %v2253_v5, %v2252_v16  ;;  %v2259_v3 = vsel %vm481_vm5, %v4631_v52, 0.0 }
 0x20d   : > { %2218 = vst.msk [vmem:[%s3326_s10 + $0x58] sm:$0xff] %vm481_vm5, %v4642_v9  ;;  %v2116_v54 = vadd.f32 %v2115_v50, %v1955_v46  ;;  %v2596_v26 = vpop.f32.mrf.mxu0  ;;  %v2360_v30 = vsel %vm481_vm5, %v2321_v61, 0.0  ;;  %v2364_v50 = vsel %vm481_vm5, %v2323_v37, 0.0  ;;  %v2261_v52 = vsel %vm481_vm5, %v4642_v9, 0.0 }
 0x20e   : > { %v2597_v48 = vadd.f32 %v2596_v26, %v2595_v56  ;;  %v2682_v32 = vpop.f32.mrf.mxu1  ;;  %v2359_v25 = vadd.f32 %v2358_v28, %v2357_v22  ;;  %v2256_v39 = vadd.f32 %v2255_v11, %v2254_v44  ;;  %v2645_v37 = vadd.f32 %v4581_v24, %v4579_v27 }
 0x20f   : > { %2216 = vst.msk [vmem:[%s3326_s10 + $0x48] sm:$0xff] %vm481_vm5, %v2116_v54  ;;  %v4653_v31 = vadd.f32 %v2682_v32, %v1976_v15  ;;  %v2322_v34 = vmul.f32 %v2116_v54, %v2116_v54  ;;  %v2257_v0 = vsel %vm481_vm5, %v2116_v54, 0.0  ;;  %v2324_v15 = vmul.f32 %v4642_v9, %v4642_v9 }
 0x210   : > { %v2128_v63 = vpop.f32.mrf.mxu1  ;;  %v1979_v41 = vadd.f32 %v2597_v48, %v4586_v6  ;;  %v2361_v29 = vadd.f32 %v2360_v30, %v2359_v25  ;;  %v2258_v20 = vadd.f32 %v2257_v0, %v2256_v39  ;;  %v2016_v30 = vadd.f32 %v4559_v60, %v4586_v6 }
 0x211   : > { %2221 = vst.msk [vmem:[%s3326_s10 + $0x70] sm:$0xff] %vm481_vm5, %v4653_v31  ;;  %v2129_v7 = vadd.f32 %v2128_v63, %v1968_v58  ;;  %v2362_v59 = vsel %vm481_vm5, %v2322_v34, 0.0  ;;  %v2366_v2 = vsel %vm481_vm5, %v2324_v15, 0.0  ;;  %v2327_v60 = vmul.f32 %v4653_v31, %v4653_v31 }
 0x212   : > { %v2683_v40 = vpop.f32.mrf.mxu1  ;;  %v2363_v35 = vadd.f32 %v2362_v59, %v2361_v29  ;;  %v2260_v46 = vadd.f32 %v2259_v3, %v2258_v20  ;;  %v2027_v59 = vadd.f32 %v4565_v19, %v4586_v6  ;;  %v2267_v20 = vsel %vm481_vm5, %v4653_v31, 0.0 }
 0x213   : > { %2219 = vst.msk [vmem:[%s3326_s10 + $0x60] sm:$0xff] %vm481_vm5, %v2129_v7  ;;  %v4664_v42 = vadd.f32 %v2683_v40, %v1979_v41  ;;  %v2598_v55 = vpop.f32.mrf.mxu0  ;;  %v2325_v22 = vmul.f32 %v2129_v7, %v2129_v7  ;;  %v2263_v44 = vsel %vm481_vm5, %v2129_v7, 0.0 }
 0x214   : > { %v2131_v49 = vpop.f32.mrf.mxu1  ;;  %v2365_v54 = vadd.f32 %v2364_v50, %v2363_v35  ;;  %v2262_v48 = vadd.f32 %v2261_v52, %v2260_v46  ;;  %v2032_v50 = vadd.f32 %v4567_v1, %v4586_v6  ;;  %v2043_v1 = vadd.f32 %v2645_v37, %v4586_v6 }
 0x215   : > { %2222 = vst.msk [vmem:[%s3326_s10 + $0x78] sm:$0xff] %vm481_vm5, %v4664_v42  ;;  %v2132_v12 = vadd.f32 %v2131_v49, %v1971_v43  ;;  %v2599_v57 = vpop.f32.mrf.mxu0  ;;  %v2368_v43 = vsel %vm481_vm5, %v2325_v22, 0.0  ;;  %v2328_v31 = vmul.f32 %v4664_v42, %v4664_v42  ;;  %v2269_v15 = vsel %vm481_vm5, %v4664_v42, 0.0 }
 0x216   : > { %v2600_v45 = vadd.f32 %v2599_v57, %v2598_v55  ;;  %v2686_v8 = vpop.f32.mrf.mxu1  ;;  %v2367_v63 = vadd.f32 %v2366_v2, %v2365_v54  ;;  %v2264_v40 = vadd.f32 %v2263_v44, %v2262_v48  ;;  %v2024_v55 = vadd.f32 %v4563_v17, %v4586_v6 }
 0x217   : > { %2220 = vst.msk [vmem:[%s3326_s10 + $0x68] sm:$0xff] %vm481_vm5, %v2132_v12  ;;  %v2601_v33 = vpop.f32.mrf.mxu0  ;;  %v2326_v28 = vmul.f32 %v2132_v12, %v2132_v12  ;;  %v2265_v11 = vsel %vm481_vm5, %v2132_v12, 0.0  ;;  %v2374_v22 = vsel %vm481_vm5, %v2328_v31, 0.0 }
 0x218   : > { %v1984_v13 = vadd.f32 %v2600_v45, %v4586_v6  ;;  %v2144_v47 = vpop.f32.mrf.mxu1  ;;  %v2369_v39 = vadd.f32 %v2368_v43, %v2367_v63  ;;  %v2642_v45 = vadd.f32 %v4577_v53, %v4575_v21  ;;  %v2019_v53 = vadd.f32 %v4561_v4, %v4586_v6 }
 0x219   : > { %v2602_v38 = vpop.f32.mrf.mxu0  ;;  %v2370_v0 = vsel %vm481_vm5, %v2326_v28, 0.0  ;;  %v2372_v4 = vsel %vm481_vm5, %v2327_v60, 0.0 }
 0x21a   : > { %v4679_v36 = vadd.f32 %v2144_v47, %v1984_v13  ;;  %v2603_v10 = vadd.f32 %v2602_v38, %v2601_v33  ;;  %v2687_v23 = vpop.f32.mrf.mxu1  ;;  %v2371_v47 = vadd.f32 %v2370_v0, %v2369_v39  ;;  %v2040_v3 = vadd.f32 %v2642_v45, %v4586_v6 }
 0x21c   : > { %2223 = vst.msk [vmem:[%s3326_s10 + $0x80] sm:$0xff] %vm481_vm5, %v4679_v36  ;;  %v2147_v56 = vpop.f32.mrf.mxu1  ;;  %v1987_v14 = vadd.f32 %v2603_v10, %v4586_v6  ;;  %v2329_v54 = vmul.f32 %v4679_v36, %v4679_v36  ;;  %v2271_v42 = vsel %vm481_vm5, %v4679_v36, 0.0 }
 0x21e   : > { %v4690_v16 = vpop.f32.mrf.mxu1  ;;  %v4692_v26 = vadd.f32 %v2147_v56, %v1987_v14  ;;  %v2373_v14 = vadd.f32 %v2372_v4, %v2371_v47 }
 0x21f   : > { %v2604_v18 = vpop.f32.mrf.mxu0 }
 0x220   : > { %v4696_v62 = vpop.f32.mrf.mxu1  ;;  %2224 = vst.msk [vmem:[%s3326_s10 + $0x88] sm:$0xff] %vm481_vm5, %v4692_v26  ;;  %v2375_v44 = vadd.f32 %v2374_v22, %v2373_v14  ;;  %v2273_v43 = vsel %vm481_vm5, %v4692_v26, 0.0 }
 0x221   : > { %v2605_v32 = vpop.f32.mrf.mxu0 }
 0x222   : > { %v2606_v58 = vadd.f32 %v2605_v32, %v2604_v18  ;;  %v4702_v5 = vpop.f32.mrf.mxu1 }
 0x223   : > { %v2607_v41 = vpop.f32.mrf.mxu0 }
 0x224   : > { %v1992_v9 = vadd.f32 %v2606_v58, %v4586_v6  ;;  %v4706_v61 = vpop.f32.mrf.mxu1 }
 0x225   : > { %v2608_v25 = vpop.f32.mrf.mxu0 }
 0x226   : > { %v4712_v34 = vadd.f32 %v2686_v8, %v1992_v9  ;;  %v2609_v49 = vadd.f32 %v2608_v25, %v2607_v41  ;;  %v2694_v7 = vpop.f32.mrf.mxu1  ;;  %v2266_v8 = vadd.f32 %v2265_v11, %v2264_v40  ;;  %v2376_v9 = vsel %vm481_vm5, %v2329_v54, 0.0 }
 0x227   : > { %v4714_v57 = vadd.f32 %v2694_v7, %v2024_v55  ;;  %v2330_v40 = vmul.f32 %v4692_v26, %v4692_v26  ;;  %v2377_v39 = vadd.f32 %v2376_v9, %v2375_v44 }
 0x228   : > { %2225 = vst.msk [vmem:[%s3326_s10 + $0x90] sm:$0xff] %vm481_vm5, %v4712_v34  ;;  %v1995_v17 = vadd.f32 %v2609_v49, %v4586_v6  ;;  %v2176_v12 = vpop.f32.mrf.mxu1  ;;  %v2268_v10 = vadd.f32 %v2267_v20, %v2266_v8  ;;  %v2331_v11 = vmul.f32 %v4712_v34, %v4712_v34 }
 0x229   : > { %2233 = vst.msk [vmem:[%s3326_s10 + $0xd0] sm:$0xff] %vm481_vm5, %v4714_v57  ;;  %v4728_v29 = vadd.f32 %v2176_v12, %v2016_v30  ;;  %v2378_v0 = vsel %vm481_vm5, %v2330_v40, 0.0  ;;  %v2339_v9 = vmul.f32 %v4714_v57, %v4714_v57 }
 0x22a   : > { %v4732_v33 = vadd.f32 %v2687_v23, %v1995_v17  ;;  %v2695_v13 = vpop.f32.mrf.mxu1  ;;  %v2270_v48 = vadd.f32 %v2269_v15, %v2268_v10 }
 0x22b   : > { %2231 = vst.msk [vmem:[%s3326_s10 + $0xc0] sm:$0xff] %vm481_vm5, %v4728_v29  ;;  %v2610_v21 = vpop.f32.mrf.mxu0  ;;  %v4746_v38 = vadd.f32 %v2695_v13, %v2027_v59  ;;  %v2379_v59 = vadd.f32 %v2378_v0, %v2377_v39  ;;  %v2396_v39 = vsel %vm481_vm5, %v2339_v9, 0.0 }
 0x22c   : > { %2226 = vst.msk [vmem:[%s3326_s10 + $0x98] sm:$0xff] %vm481_vm5, %v4732_v33  ;;  %v2179_v19 = vpop.f32.mrf.mxu1  ;;  %v2272_v55 = vadd.f32 %v2271_v42, %v2270_v48  ;;  %v2332_v17 = vmul.f32 %v4732_v33, %v4732_v33  ;;  %v2277_v45 = vsel %vm481_vm5, %v4732_v33, 0.0 }
 0x22d   : > { %v4750_v23 = vadd.f32 %v2179_v19, %v2019_v53  ;;  %v2611_v35 = vpop.f32.mrf.mxu0  ;;  %2234 = vst.msk [vmem:[%s3326_s10 + $0xd8] sm:$0xff] %vm481_vm5, %v4746_v38 }
 0x22e   : > { %v2612_v56 = vadd.f32 %v2611_v35, %v2610_v21  ;;  %v2698_v46 = vpop.f32.mrf.mxu1  ;;  %v2274_v26 = vadd.f32 %v2273_v43, %v2272_v55  ;;  %v2382_v47 = vsel %vm481_vm5, %v2332_v17, 0.0  ;;  %v2340_v55 = vmul.f32 %v4746_v38, %v4746_v38 }
 0x22f   : > { %2232 = vst.msk [vmem:[%s3326_s10 + $0xc8] sm:$0xff] %vm481_vm5, %v4750_v23  ;;  %v4762_v27 = vadd.f32 %v2698_v46, %v2040_v3  ;;  %v2613_v24 = vpop.f32.mrf.mxu0 }
 0x230   : > { %v2000_v18 = vadd.f32 %v2612_v56, %v4586_v6  ;;  %v2192_v52 = vpop.f32.mrf.mxu1  ;;  %v2398_v17 = vsel %vm481_vm5, %v2340_v55, 0.0 }
 0x231   : > { %2237 = vst.msk [vmem:[%s3326_s10 + $0xf0] sm:$0xff] %vm481_vm5, %v4762_v27  ;;  %v4774_v32 = vadd.f32 %v2192_v52, %v2032_v50  ;;  %v2614_v2 = vpop.f32.mrf.mxu0 }
 0x232   : > { %v2161_v58 = vadd.f32 %v4696_v62, %v2000_v18  ;;  %v2615_v63 = vadd.f32 %v2614_v2, %v2613_v24  ;;  %v2699_v41 = vpop.f32.mrf.mxu1  ;;  %v2035_v62 = vadd.f32 %v4569_v51, %v4586_v6  ;;  %v2275_v51 = vsel %vm481_vm5, %v4712_v34, 0.0 }
 0x233   : > { %2235 = vst.msk [vmem:[%s3326_s10 + $0xe0] sm:$0xff] %vm481_vm5, %v4774_v32  ;;  %v4784_v28 = vadd.f32 %v2699_v41, %v2043_v1  ;;  %v2276_v13 = vadd.f32 %v2275_v51, %v2274_v26  ;;  %v2337_v2 = vmul.f32 %v4728_v29, %v4728_v29 }
 0x234   : > { %2227 = vst.msk [vmem:[%s3326_s10 + $0xa0] sm:$0xff] %vm481_vm5, %v2161_v58  ;;  %v2003_v36 = vadd.f32 %v2615_v63, %v4586_v6  ;;  %v2195_v25 = vpop.f32.mrf.mxu1  ;;  %v2333_v8 = vmul.f32 %v2161_v58, %v2161_v58  ;;  %v2279_v21 = vsel %vm481_vm5, %v2161_v58, 0.0  ;;  %v2338_v63 = vmul.f32 %v4750_v23, %v4750_v23 }
 0x235   : > { %2238 = vst.msk [vmem:[%s3326_s10 + $0xf8] sm:$0xff] %vm481_vm5, %v4784_v28  ;;  %v4802_v7 = vadd.f32 %v2195_v25, %v2035_v62  ;;  %v2278_v37 = vadd.f32 %v2277_v45, %v2276_v13  ;;  %v2392_v40 = vsel %vm481_vm5, %v2337_v2, 0.0  ;;  %v2343_v45 = vmul.f32 %v4762_v27, %v4762_v27 }
 0x236   : > { %v2164_v49 = vadd.f32 %v4706_v61, %v2003_v36  ;;  %v2380_v61 = vsel %vm481_vm5, %v2331_v11, 0.0  ;;  %v2384_v35 = vsel %vm481_vm5, %v2333_v8, 0.0  ;;  %v2289_v36 = vsel %vm481_vm5, %v4750_v23, 0.0 }
 0x237   : > { %v2616_v30 = vpop.f32.mrf.mxu0  ;;  %2236 = vst.msk [vmem:[%s3326_s10 + $0xe8] sm:$0xff] %vm481_vm5, %v4802_v7  ;;  %v2381_v19 = vadd.f32 %v2380_v61, %v2379_v59  ;;  %v2280_v56 = vadd.f32 %v2279_v21, %v2278_v37  ;;  %v2394_v43 = vsel %vm481_vm5, %v2338_v63, 0.0  ;;  %v2341_v23 = vmul.f32 %v4774_v32, %v4774_v32 }
 0x238   : > { %2228 = vst.msk [vmem:[%s3326_s10 + $0xa8] sm:$0xff] %vm481_vm5, %v2164_v49  ;;  %v2334_v53 = vmul.f32 %v2164_v49, %v2164_v49  ;;  %v2281_v33 = vsel %vm481_vm5, %v2164_v49, 0.0  ;;  %v2342_v26 = vmul.f32 %v4802_v7, %v4802_v7  ;;  %v2297_v8 = vsel %vm481_vm5, %v4802_v7, 0.0 }
 0x239   : > { %v2617_v12 = vpop.f32.mrf.mxu0  ;;  %v2383_v31 = vadd.f32 %v2382_v47, %v2381_v19  ;;  %v2282_v54 = vadd.f32 %v2281_v33, %v2280_v56  ;;  %v2299_v13 = vsel %vm481_vm5, %v4762_v27, 0.0 }
 0x23a   : > { %v2618_v60 = vadd.f32 %v2617_v12, %v2616_v30  ;;  %v2386_v46 = vsel %vm481_vm5, %v2334_v53, 0.0  ;;  %v2293_v30 = vsel %vm481_vm5, %v4746_v38, 0.0  ;;  %v2400_v38 = vsel %vm481_vm5, %v2341_v23, 0.0 }
 0x23b   : > { %v2619_v34 = vpop.f32.mrf.mxu0  ;;  %v2385_v15 = vadd.f32 %v2384_v35, %v2383_v31  ;;  %v2404_v53 = vsel %vm481_vm5, %v2343_v45, 0.0 }
 0x23c   : > { %v2008_v20 = vadd.f32 %v2618_v60, %v4586_v6 }
 0x23d   : > { %v2620_v10 = vpop.f32.mrf.mxu0 }
 0x23e   : > { %v2169_v3 = vadd.f32 %v4690_v16, %v2008_v20  ;;  %v2621_v4 = vadd.f32 %v2620_v10, %v2619_v34  ;;  %v2387_v16 = vadd.f32 %v2386_v46, %v2385_v15  ;;  %v2402_v34 = vsel %vm481_vm5, %v2342_v26, 0.0  ;;  %v2312_v15 = vld [vmem:[%s4896_s7] sm:$0x1] }
 0x23f   : > { %v2301_v20 = vsel %vm481_vm5, %v4784_v28, 0.0 }
 0x240   : > { %2229 = vst.msk [vmem:[%s3326_s10 + $0xb0] sm:$0xff] %vm481_vm5, %v2169_v3  ;;  %v2283_v14 = vsel %vm481_vm5, %v2169_v3, 0.0  ;;  %v2335_v24 = vmul.f32 %v2169_v3, %v2169_v3  ;;  %v2011_v50 = vadd.f32 %v2621_v4, %v4586_v6  ;;  %v2287_v6 = vsel %vm481_vm5, %v4728_v29, 0.0 }
 0x241   : > { %v2284_v48 = vadd.f32 %v2283_v14, %v2282_v54  ;;  %v2291_v29 = vsel %vm481_vm5, %v4714_v57, 0.0  ;;  %v2295_v57 = vsel %vm481_vm5, %v4774_v32, 0.0  ;;  %v2344_v32 = vmul.f32 %v4784_v28, %v4784_v28 }
 0x242   : > { %v2388_v18 = vsel %vm481_vm5, %v2335_v24, 0.0  ;;  %v2172_v52 = vadd.f32 %v4702_v5, %v2011_v50  ;;  %v2239_v24 = vld [vmem:[%s4895_s6] sm:$0x1] }
 0x243   : > { %v2389_v42 = vadd.f32 %v2388_v18, %v2387_v16  ;;  %v2406_v7 = vsel %vm481_vm5, %v2344_v32, 0.0 }
 0x244   : > { %2230 = vst.msk [vmem:[%s3326_s10 + $0xb8] sm:$0xff] %vm481_vm5, %v2172_v52  ;;  %v2285_v1 = vsel %vm481_vm5, %v2172_v52, 0.0  ;;  %v2336_v22 = vmul.f32 %v2172_v52, %v2172_v52 }
 0x245   : > { %v2286_v58 = vadd.f32 %v2285_v1, %v2284_v48 }
 0x246   : > { %v2390_v5 = vsel %vm481_vm5, %v2336_v22, 0.0 }
 0x247   : > { %v2288_v41 = vadd.f32 %v2287_v6, %v2286_v58  ;;  %v2391_v44 = vadd.f32 %v2390_v5, %v2389_v42 }
 0x249   : > { %v2290_v62 = vadd.f32 %v2289_v36, %v2288_v41  ;;  %v2393_v25 = vadd.f32 %v2392_v40, %v2391_v44 }
 0x24b   : > { %v2292_v11 = vadd.f32 %v2291_v29, %v2290_v62  ;;  %v2395_v49 = vadd.f32 %v2394_v43, %v2393_v25 }
 0x24d   : > { %v2294_v0 = vadd.f32 %v2293_v30, %v2292_v11  ;;  %v2397_v51 = vadd.f32 %v2396_v39, %v2395_v49 }
 0x24f   : > { %v2296_v12 = vadd.f32 %v2295_v57, %v2294_v0  ;;  %v2399_v61 = vadd.f32 %v2398_v17, %v2397_v51 }
 0x251   : > { %v2298_v60 = vadd.f32 %v2297_v8, %v2296_v12  ;;  %v2401_v59 = vadd.f32 %v2400_v38, %v2399_v61 }
 0x253   : > { %v2300_v47 = vadd.f32 %v2299_v13, %v2298_v60  ;;  %v2403_v21 = vadd.f32 %v2402_v34, %v2401_v59 }
 0x255   : > { %v2302_v19 = vadd.f32 %v2301_v20, %v2300_v47  ;;  %v2405_v37 = vadd.f32 %v2404_v53, %v2403_v21 }
 0x257   : > { %v2303_v10 = vrot.slane %v2302_v19, 4  ;;  %v2407_v35 = vadd.f32 %v2406_v7, %v2405_v37 }
 0x259   : > { %v2304_v33 = vadd.f32 %v2303_v10, %v2302_v19  ;;  %v2408_v27 = vrot.slane %v2407_v35, 4 }
 0x25b   : > { %v2305_v3 = vrot.slane %v2304_v33, 2  ;;  %v2409_v4 = vadd.f32 %v2408_v27, %v2407_v35 }
 0x25d   : > { %v2306_v31 = vadd.f32 %v2305_v3, %v2304_v33  ;;  %v2410_v56 = vrot.slane %v2409_v4, 2 }
 0x25f   : > { %v2307_v46 = vrot.slane %v2306_v31, 1  ;;  %v2411_v14 = vadd.f32 %v2410_v56, %v2409_v4 }
 0x261   : > { %v2308_v50 = vadd.f32 %v2307_v46, %v2306_v31  ;;  %v2412_v28 = vrot.slane %v2411_v14, 1 }
 0x263   : > { %v2309_v54 = vadd.f32 %v2308_v50, %v2239_v24  ;;  %v2413_v18 = vadd.f32 %v2412_v28, %v2411_v14 }
 0x265   : > { %2311 = vst.msk [vmem:[%s4895_s6] sm:$0x1] %vm2310_vm8, %v2309_v54  ;;  %v2414_v52 = vadd.f32 %v2413_v18, %v2312_v15 }
 0x267   : > { %2415 = vst.msk [vmem:[%s4896_s7] sm:$0x1] %vm2310_vm8, %v2414_v52 }
 0x268 PF: > { %s18_s24 = sadd.s32 1, %s3264_s24  }
 0x269   : > { %p15_p5 = scmp.ge.s32.totalorder %s18_s24, 4  }
 0x26b   :  { %17 = sbr.rel (!%p15_p5) target bundleno = 1 (0x1), region = 91 }

</bundles_post_ra>
